<compile_context>
chip_gen: v6e
topology: v6e:2x2x1
jax: 0.10.0
libtpu: 0.0.40
codegen_flags: <defaults>
</compile_context>

<pallas_src>
import functools

import jax
import jax.numpy as jnp
from jax.experimental import pallas as pl
from jax.experimental.pallas import tpu as pltpu


def _round_up(x, m):
    return ((x + m - 1) // m) * m


# ---------------------------------------------------------------------------
# Pallas kernel: tiled matmul + bias (+ReLU), f32 accumulator, bf16 operands
# ---------------------------------------------------------------------------
def _matmul_bias_kernel(a_ref, b_ref, bias_ref, o_ref, acc_ref, *, relu):
    k = pl.program_id(2)

    @pl.when(k == 0)
    def _():
        acc_ref[...] = jnp.zeros_like(acc_ref)

    acc_ref[...] += jnp.dot(
        a_ref[...], b_ref[...], preferred_element_type=jnp.float32
    )

    @pl.when(k == pl.num_programs(2) - 1)
    def _():
        acc = acc_ref[...] + bias_ref[...]
        if relu:
            acc = jnp.maximum(acc, 0.0)
        o_ref[...] = acc.astype(o_ref.dtype)


def _pick_tile(d):
    """Largest MXU-friendly tile (<=512) that divides the padded extent d."""
    if d % 512 == 0 and d >= 1024:
        return 512
    if d % 256 == 0:
        return 256
    return 128


def matmul_bias(a, b, bias, relu=False, out_dtype=jnp.float32):
    """a:(M,K) @ b:(K,N) + bias:(N,), optional ReLU.  Tiled over M, N, K."""
    M, K = a.shape
    K2, N = b.shape
    assert K == K2

    # bf16 operands for the MXU; accumulation stays f32 inside the kernel.
    a = a.astype(jnp.bfloat16)
    b = b.astype(jnp.bfloat16)
    bias2 = bias.reshape(1, N).astype(jnp.float32)

    # Pad every dim to a multiple of 128: full MXU tiles, lane-dense stores,
    # no tiny-tile grid overhead.  Zero padding is exact for matmul.
    Mp, Kp, Np = _round_up(M, 128), _round_up(K, 128), _round_up(N, 128)
    if (Mp, Kp) != (M, K):
        a = jnp.pad(a, ((0, Mp - M), (0, Kp - K)))
    if (Kp, Np) != (K, N):
        b = jnp.pad(b, ((0, Kp - K), (0, Np - N)))
    if Np != N:
        bias2 = jnp.pad(bias2, ((0, 0), (0, Np - N)))

    tm, tn, tk = _pick_tile(Mp), _pick_tile(Np), _pick_tile(Kp)
    grid = (Mp // tm, Np // tn, Kp // tk)

    flops = 2 * Mp * Kp * Np
    bytes_accessed = (
        Mp * Kp * 2 + Kp * Np * 2 + Mp * Np * jnp.dtype(out_dtype).itemsize
    )

    out = pl.pallas_call(
        functools.partial(_matmul_bias_kernel, relu=relu),
        out_shape=jax.ShapeDtypeStruct((Mp, Np), out_dtype),
        grid=grid,
        in_specs=[
            pl.BlockSpec((tm, tk), lambda i, j, k: (i, k)),
            pl.BlockSpec((tk, tn), lambda i, j, k: (k, j)),
            pl.BlockSpec((1, tn), lambda i, j, k: (0, j)),
        ],
        out_specs=pl.BlockSpec((tm, tn), lambda i, j, k: (i, j)),
        scratch_shapes=[pltpu.VMEM((tm, tn), jnp.float32)],
        compiler_params=pltpu.CompilerParams(
            dimension_semantics=("parallel", "parallel", "arbitrary"),
            vmem_limit_bytes=32 * 1024 * 1024,
        ),
        cost_estimate=pl.CostEstimate(
            flops=flops, transcendentals=0, bytes_accessed=bytes_accessed
        ),
    )(a, b, bias2)
    return out[:M, :N]


# ---------------------------------------------------------------------------
# Pallas kernel: global average pool over the reduction axis, lane-dense out
# ---------------------------------------------------------------------------
def _avg_pool_kernel(x_ref, o_ref, acc_ref, *, inv_count):
    r = pl.program_id(0)

    @pl.when(r == 0)
    def _():
        acc_ref[...] = jnp.zeros_like(acc_ref)

    # x block: (N, tr, C) -> sum over the tiled reduction axis.
    acc_ref[...] += jnp.sum(x_ref[...].astype(jnp.float32), axis=1)

    @pl.when(r == pl.num_programs(0) - 1)
    def _():
        o_ref[...] = (acc_ref[...] * inv_count).astype(o_ref.dtype)


def global_avg_pool(x):
    """(N, R, C) channels-last -> (N, C) mean over R, tiled over R."""
    N, R, C = x.shape
    Rp = _round_up(R, 8)
    xf = x
    if Rp != R:
        xf = jnp.pad(x, ((0, 0), (0, Rp - R), (0, 0)))   # zeros don't bias sum

    # Largest reduction tile dividing Rp with a modest VMEM footprint.
    tr = 8
    for cand in (2048, 1024, 512, 256, 128, 64, 32, 16, 8):
        if Rp % cand == 0 and N * cand * C * xf.dtype.itemsize <= (4 << 20):
            tr = cand
            break

    out = pl.pallas_call(
        functools.partial(_avg_pool_kernel, inv_count=1.0 / R),
        out_shape=jax.ShapeDtypeStruct((N, C), jnp.float32),
        grid=(Rp // tr,),
        in_specs=[pl.BlockSpec((N, tr, C), lambda r: (0, r, 0))],
        out_specs=pl.BlockSpec((N, C), lambda r: (0, 0)),
        scratch_shapes=[pltpu.VMEM((N, C), jnp.float32)],
        compiler_params=pltpu.CompilerParams(
            dimension_semantics=("arbitrary",)
        ),
    )(xf)
    return out


# ---------------------------------------------------------------------------
# Conv layers = channels-last im2col (glue) + Pallas matmul (MXU hot path)
# ---------------------------------------------------------------------------
def conv2d_relu_nhwc(x, w, b, stride, pad, out_dtype=jnp.bfloat16):
    """x:(N,H,W,C) channels-last, w:(Cout,Cin,KH,KW) PyTorch layout, b:(Cout,)."""
    N, H, W, C = x.shape
    Cout, Cin, KH, KW = w.shape
    xp = jnp.pad(x, ((0, 0), (pad, pad), (pad, pad), (0, 0)))
    Ho = (H + 2 * pad - KH) // stride + 1
    Wo = (W + 2 * pad - KW) // stride + 1
    patches = [
        xp[:, kh:kh + stride * Ho:stride, kw:kw + stride * Wo:stride, :]
        for kh in range(KH) for kw in range(KW)
    ]
    pmat = jnp.concatenate(patches, axis=-1).reshape(N * Ho * Wo, KH * KW * C)
    wmat = jnp.transpose(w, (2, 3, 1, 0)).reshape(KH * KW * Cin, Cout)
    out = matmul_bias(pmat, wmat, b, relu=True, out_dtype=out_dtype)
    return out.reshape(N, Ho, Wo, Cout)          # stays channels-last


def conv3d_relu_ndhwc(x, w, b, stride, pad, out_dtype=jnp.bfloat16):
    """x:(N,T,H,W,C) channels-last, w:(Cout,Cin,KT,KH,KW) PyTorch layout."""
    N, T, H, W, C = x.shape
    Cout, Cin, KT, KH, KW = w.shape
    xp = jnp.pad(x, ((0, 0), (pad, pad), (pad, pad), (pad, pad), (0, 0)))
    To = (T + 2 * pad - KT) // stride + 1
    Ho = (H + 2 * pad - KH) // stride + 1
    Wo = (W + 2 * pad - KW) // stride + 1
    patches = [
        xp[:, kt:kt + stride * To:stride,
           kh:kh + stride * Ho:stride,
           kw:kw + stride * Wo:stride, :]
        for kt in range(KT) for kh in range(KH) for kw in range(KW)
    ]
    pmat = jnp.concatenate(patches, axis=-1).reshape(
        N * To * Ho * Wo, KT * KH * KW * C)
    wmat = jnp.transpose(w, (2, 3, 4, 1, 0)).reshape(KT * KH * KW * Cin, Cout)
    out = matmul_bias(pmat, wmat, b, relu=True, out_dtype=out_dtype)
    return out.reshape(N, To, Ho, Wo, Cout)      # stays channels-last


# ---------------------------------------------------------------------------
# ECO forward (channels-last end-to-end)
# ---------------------------------------------------------------------------
def eco_forward(x, params):
    """x: (batch, time, channel, h, w)  ->  (batch, 10)"""
    n, t, c, h, w = x.shape

    # Single layout change at the input; everything downstream is channels-last.
    x2d = jnp.transpose(x.reshape(n * t, c, h, w), (0, 2, 3, 1))   # (n*t,H,W,C)

    # inception_v2 (stand-in): frame-wise 2D conv feature extractor.
    out = conv2d_relu_nhwc(x2d, params["w2d"], params["b2d"], stride=2, pad=1)
    nt, ho, wo, c2d = out.shape

    # PyTorch: view(n,t,c,h,w) then transpose(1,2) -> NCDHW.  In channels-last
    # (NDHWC) form that tensor is exactly (n, t, ho, wo, c2d): pure reshape,
    # no transpose / data movement needed.
    out = out.reshape(n, t, ho, wo, c2d)

    # resnet3d (stand-in): 3D conv + global average pool + fc to 4096.
    out = conv3d_relu_ndhwc(out, params["w3d"], params["b3d"], stride=1, pad=1)
    n_, to, ho2, wo2, c3d = out.shape
    feat = global_avg_pool(out.reshape(n_, to * ho2 * wo2, c3d))   # (n, C3D)
    feat = matmul_bias(feat, params["w_fc"], params["b_fc"],
                       relu=True, out_dtype=jnp.float32)           # (n, 4096)

    # out_layer: Linear(4096 -> 10, bias=True); N padded to 128 inside.
    logits = matmul_bias(feat, params["w_out"], params["b_out"],
                         relu=False, out_dtype=jnp.float32)
    return logits


# ---------------------------------------------------------------------------
# Main
# ---------------------------------------------------------------------------
if __name__ == "__main__":
    key = jax.random.PRNGKey(0)
    ks = jax.random.split(key, 9)

    # Small shapes consistent with the ECO forward contract.
    n, t, c, h, w = 2, 4, 3, 16, 16
    C2D, C3D, FEAT, NUM_CLASSES = 32, 128, 4096, 10

    x = jax.random.normal(ks[0], (n, t, c, h, w), jnp.float32)

    params = {
        # 2D conv (PyTorch weight layout Cout,Cin,KH,KW)
        "w2d": jax.random.normal(ks[1], (C2D, c, 3, 3), jnp.float32)
        * (1.0 / (c * 9) ** 0.5),
        "b2d": jax.random.normal(ks[2], (C2D,), jnp.float32) * 0.01,
        # 3D conv (Cout,Cin,KT,KH,KW)
        "w3d": jax.random.normal(ks[3], (C3D, C2D, 3, 3, 3), jnp.float32)
        * (1.0 / (C2D * 27) ** 0.5),
        "b3d": jax.random.normal(ks[4], (C3D,), jnp.float32) * 0.01,
        # fc to 4096 (stored as (in, out) for the matmul kernel)
        "w_fc": jax.random.normal(ks[5], (C3D, FEAT), jnp.float32)
        * (1.0 / C3D ** 0.5),
        "b_fc": jax.random.normal(ks[6], (FEAT,), jnp.float32) * 0.01,
        # out_layer: Linear(4096 -> 10)
        "w_out": jax.random.normal(ks[7], (FEAT, NUM_CLASSES), jnp.float32)
        * (1.0 / FEAT ** 0.5),
        "b_out": jax.random.normal(ks[8], (NUM_CLASSES,), jnp.float32) * 0.01,
    }

    logits = jax.jit(eco_forward)(x, params)
    jax.block_until_ready(logits)
    assert logits.shape == (n, NUM_CLASSES)
    assert logits.dtype == jnp.float32
    assert bool(jnp.all(jnp.isfinite(logits)))
    print("KERNEL_OK")
</pallas_src>

<mosaic_0001>
module attributes {stable_mosaic.version = 11 : i64} {
  func.func @_matmul_bias_kernel(%arg0: i32, %arg1: i32, %arg2: i32, %arg3: memref<256x128xbf16, #tpu.memory_space<vmem>>, %arg4: memref<128x128xbf16, #tpu.memory_space<vmem>>, %arg5: memref<1x128xf32, #tpu.memory_space<vmem>>, %arg6: memref<256x128xbf16, #tpu.memory_space<vmem>>, %arg7: memref<256x128xf32, #tpu.memory_space<vmem>>) attributes {dimension_semantics = [#tpu.dimension_semantics<parallel>, #tpu.dimension_semantics<parallel>, #tpu.dimension_semantics<arbitrary>], iteration_bounds = array<i64: 2, 1, 1>, scalar_prefetch = 0 : i64, scratch_operands = 1 : i64, tpu.core_type = #tpu.core_type<tc>, window_params = [{transform_indices = @transform_0, window_bounds = array<i64: 256, 128>}, {transform_indices = @transform_1, window_bounds = array<i64: 128, 128>}, {transform_indices = @transform_2, window_bounds = array<i64: 1, 128>}, {transform_indices = @transform_3, window_bounds = array<i64: 256, 128>}]} {
    %c0_i32 = arith.constant 0 : i32
    %0 = arith.cmpi eq, %arg2, %c0_i32 : i32
    %1 = arith.extui %0 : i1 to i32
    %c0_i32_0 = arith.constant 0 : i32
    %2 = arith.cmpi ne, %1, %c0_i32_0 : i32
    scf.if %2 {
      %cst_10 = arith.constant 0.000000e+00 : f32
      %12 = vector.broadcast %cst_10 : f32 to vector<256x128xf32>
      %c0_11 = arith.constant 0 : index
      %c0_12 = arith.constant 0 : index
      %13 = vector.load %arg7[%c0_11, %c0_12] : memref<256x128xf32, #tpu.memory_space<vmem>>, vector<256x128xf32>
      tpu.vector_store %arg7[%c0_11, %c0_12], %12 {strides = array<i32>} : memref<256x128xf32, #tpu.memory_space<vmem>>, vector<256x128xf32>,
    } else {
    }
    %c0 = arith.constant 0 : index
    %c0_1 = arith.constant 0 : index
    %3 = vector.load %arg7[%c0, %c0_1] : memref<256x128xf32, #tpu.memory_space<vmem>>, vector<256x128xf32>
    %c0_2 = arith.constant 0 : index
    %c0_3 = arith.constant 0 : index
    %4 = vector.load %arg3[%c0_2, %c0_3] : memref<256x128xbf16, #tpu.memory_space<vmem>>, vector<256x128xbf16>
    %c0_4 = arith.constant 0 : index
    %c0_5 = arith.constant 0 : index
    %5 = vector.load %arg4[%c0_4, %c0_5] : memref<128x128xbf16, #tpu.memory_space<vmem>>, vector<128x128xbf16>
    %cst = arith.constant dense<0.000000e+00> : vector<256x128xf32>
    %6 = tpu.matmul %4, %5, %cst {dimension_numbers = #tpu.dot_dimension_numbers<[1], [0], [0], [1], [0, 0, 1, 1], [], []>} : vector<256x128xbf16>, vector<128x128xbf16>, vector<256x128xf32> -> vector<256x128xf32>
    %7 = arith.addf %3, %6 : vector<256x128xf32>
    %c0_6 = arith.constant 0 : index
    %c0_7 = arith.constant 0 : index
    %8 = vector.load %arg7[%c0_6, %c0_7] : memref<256x128xf32, #tpu.memory_space<vmem>>, vector<256x128xf32>
    tpu.vector_store %arg7[%c0_6, %c0_7], %7 {strides = array<i32>} : memref<256x128xf32, #tpu.memory_space<vmem>>, vector<256x128xf32>,
    %c0_i32_8 = arith.constant 0 : i32
    %9 = arith.cmpi eq, %arg2, %c0_i32_8 : i32
    %10 = arith.extui %9 : i1 to i32
    %c0_i32_9 = arith.constant 0 : i32
    %11 = arith.cmpi ne, %10, %c0_i32_9 : i32
    scf.if %11 {
      %c0_10 = arith.constant 0 : index
      %c0_11 = arith.constant 0 : index
      %12 = vector.load %arg7[%c0_10, %c0_11] : memref<256x128xf32, #tpu.memory_space<vmem>>, vector<256x128xf32>
      %c0_12 = arith.constant 0 : index
      %c0_13 = arith.constant 0 : index
      %13 = vector.load %arg5[%c0_12, %c0_13] : memref<1x128xf32, #tpu.memory_space<vmem>>, vector<1x128xf32>
      %14 = vector.broadcast %13 : vector<1x128xf32> to vector<256x128xf32>
      %15 = arith.addf %12, %14 : vector<256x128xf32>
      %cst_14 = arith.constant 0.000000e+00 : f32
      %16 = vector.broadcast %cst_14 : f32 to vector<256x128xf32>
      %17 = arith.maximumf %15, %16 : vector<256x128xf32>
      %18 = arith.truncf %17 : vector<256x128xf32> to vector<256x128xbf16>
      %c0_15 = arith.constant 0 : index
      %c0_16 = arith.constant 0 : index
      %19 = vector.load %arg6[%c0_15, %c0_16] : memref<256x128xbf16, #tpu.memory_space<vmem>>, vector<256x128xbf16>
      tpu.vector_store %arg6[%c0_15, %c0_16], %18 {strides = array<i32>} : memref<256x128xbf16, #tpu.memory_space<vmem>>, vector<256x128xbf16>,
    } else {
    }
    return
  }
  func.func @transform_0(%arg0: i32, %arg1: i32, %arg2: i32) -> (i32, i32) {
    %c0_i32 = arith.constant 0 : i32
    return %arg0, %arg2 : i32, i32
  }
  func.func @transform_1(%arg0: i32, %arg1: i32, %arg2: i32) -> (i32, i32) {
    %c0_i32 = arith.constant 0 : i32
    return %arg2, %arg1 : i32, i32
  }
  func.func @transform_2(%arg0: i32, %arg1: i32, %arg2: i32) -> (i32, i32) {
    %c0_i32 = arith.constant 0 : i32
    %c0_i32_0 = arith.constant 0 : i32
    return %c0_i32, %arg1 : i32, i32
  }
  func.func @transform_3(%arg0: i32, %arg1: i32, %arg2: i32) -> (i32, i32) {
    %c0_i32 = arith.constant 0 : i32
    return %arg0, %arg1 : i32, i32
  }
}

module attributes {stable_mosaic.version = 11 : i64} {
  func.func @_matmul_bias_kernel(%arg0: i32, %arg1: i32, %arg2: i32, %arg3: memref<256x128xbf16, #tpu.memory_space<vmem>>, %arg4: memref<128x128xbf16, #tpu.memory_space<vmem>>, %arg5: memref<1x128xf32, #tpu.memory_space<vmem>>, %arg6: memref<256x128xbf16, #tpu.memory_space<vmem>>, %arg7: memref<256x128xf32, #tpu.memory_space<vmem>>) attributes {dimension_semantics = [#tpu.dimension_semantics<parallel>, #tpu.dimension_semantics<parallel>, #tpu.dimension_semantics<arbitrary>], iteration_bounds = array<i64: 2, 1, 7>, scalar_prefetch = 0 : i64, scratch_operands = 1 : i64, tpu.core_type = #tpu.core_type<tc>, window_params = [{transform_indices = @transform_0, window_bounds = array<i64: 256, 128>}, {transform_indices = @transform_1, window_bounds = array<i64: 128, 128>}, {transform_indices = @transform_2, window_bounds = array<i64: 1, 128>}, {transform_indices = @transform_3, window_bounds = array<i64: 256, 128>}]} {
    %c0_i32 = arith.constant 0 : i32
    %0 = arith.cmpi eq, %arg2, %c0_i32 : i32
    %1 = arith.extui %0 : i1 to i32
    %c0_i32_0 = arith.constant 0 : i32
    %2 = arith.cmpi ne, %1, %c0_i32_0 : i32
    scf.if %2 {
      %cst_9 = arith.constant 0.000000e+00 : f32
      %12 = vector.broadcast %cst_9 : f32 to vector<256x128xf32>
      %c0_10 = arith.constant 0 : index
      %c0_11 = arith.constant 0 : index
      %13 = vector.load %arg7[%c0_10, %c0_11] : memref<256x128xf32, #tpu.memory_space<vmem>>, vector<256x128xf32>
      tpu.vector_store %arg7[%c0_10, %c0_11], %12 {strides = array<i32>} : memref<256x128xf32, #tpu.memory_space<vmem>>, vector<256x128xf32>,
    } else {
    }
    %c0 = arith.constant 0 : index
    %c0_1 = arith.constant 0 : index
    %3 = vector.load %arg7[%c0, %c0_1] : memref<256x128xf32, #tpu.memory_space<vmem>>, vector<256x128xf32>
    %c0_2 = arith.constant 0 : index
    %c0_3 = arith.constant 0 : index
    %4 = vector.load %arg3[%c0_2, %c0_3] : memref<256x128xbf16, #tpu.memory_space<vmem>>, vector<256x128xbf16>
    %c0_4 = arith.constant 0 : index
    %c0_5 = arith.constant 0 : index
    %5 = vector.load %arg4[%c0_4, %c0_5] : memref<128x128xbf16, #tpu.memory_space<vmem>>, vector<128x128xbf16>
    %cst = arith.constant dense<0.000000e+00> : vector<256x128xf32>
    %6 = tpu.matmul %4, %5, %cst {dimension_numbers = #tpu.dot_dimension_numbers<[1], [0], [0], [1], [0, 0, 1, 1], [], []>} : vector<256x128xbf16>, vector<128x128xbf16>, vector<256x128xf32> -> vector<256x128xf32>
    %7 = arith.addf %3, %6 : vector<256x128xf32>
    %c0_6 = arith.constant 0 : index
    %c0_7 = arith.constant 0 : index
    %8 = vector.load %arg7[%c0_6, %c0_7] : memref<256x128xf32, #tpu.memory_space<vmem>>, vector<256x128xf32>
    tpu.vector_store %arg7[%c0_6, %c0_7], %7 {strides = array<i32>} : memref<256x128xf32, #tpu.memory_space<vmem>>, vector<256x128xf32>,
    %c6_i32 = arith.constant 6 : i32
    %9 = arith.cmpi eq, %arg2, %c6_i32 : i32
    %10 = arith.extui %9 : i1 to i32
    %c0_i32_8 = arith.constant 0 : i32
    %11 = arith.cmpi ne, %10, %c0_i32_8 : i32
    scf.if %11 {
      %c0_9 = arith.constant 0 : index
      %c0_10 = arith.constant 0 : index
      %12 = vector.load %arg7[%c0_9, %c0_10] : memref<256x128xf32, #tpu.memory_space<vmem>>, vector<256x128xf32>
      %c0_11 = arith.constant 0 : index
      %c0_12 = arith.constant 0 : index
      %13 = vector.load %arg5[%c0_11, %c0_12] : memref<1x128xf32, #tpu.memory_space<vmem>>, vector<1x128xf32>
      %14 = vector.broadcast %13 : vector<1x128xf32> to vector<256x128xf32>
      %15 = arith.addf %12, %14 : vector<256x128xf32>
      %cst_13 = arith.constant 0.000000e+00 : f32
      %16 = vector.broadcast %cst_13 : f32 to vector<256x128xf32>
      %17 = arith.maximumf %15, %16 : vector<256x128xf32>
      %18 = arith.truncf %17 : vector<256x128xf32> to vector<256x128xbf16>
      %c0_14 = arith.constant 0 : index
      %c0_15 = arith.constant 0 : index
      %19 = vector.load %arg6[%c0_14, %c0_15] : memref<256x128xbf16, #tpu.memory_space<vmem>>, vector<256x128xbf16>
      tpu.vector_store %arg6[%c0_14, %c0_15], %18 {strides = array<i32>} : memref<256x128xbf16, #tpu.memory_space<vmem>>, vector<256x128xbf16>,
    } else {
    }
    return
  }
  func.func @transform_0(%arg0: i32, %arg1: i32, %arg2: i32) -> (i32, i32) {
    %c0_i32 = arith.constant 0 : i32
    return %arg0, %arg2 : i32, i32
  }
  func.func @transform_1(%arg0: i32, %arg1: i32, %arg2: i32) -> (i32, i32) {
    %c0_i32 = arith.constant 0 : i32
    return %arg2, %arg1 : i32, i32
  }
  func.func @transform_2(%arg0: i32, %arg1: i32, %arg2: i32) -> (i32, i32) {
    %c0_i32 = arith.constant 0 : i32
    %c0_i32_0 = arith.constant 0 : i32
    return %c0_i32, %arg1 : i32, i32
  }
  func.func @transform_3(%arg0: i32, %arg1: i32, %arg2: i32) -> (i32, i32) {
    %c0_i32 = arith.constant 0 : i32
    return %arg0, %arg1 : i32, i32
  }
}

module attributes {stable_mosaic.version = 11 : i64} {
  func.func @_avg_pool_kernel(%arg0: i32, %arg1: memref<2x256x128xbf16, #tpu.memory_space<vmem>>, %arg2: memref<2x128xf32, #tpu.memory_space<vmem>>, %arg3: memref<2x128xf32, #tpu.memory_space<vmem>>) attributes {dimension_semantics = [#tpu.dimension_semantics<arbitrary>], iteration_bounds = array<i64: 1>, scalar_prefetch = 0 : i64, scratch_operands = 1 : i64, tpu.core_type = #tpu.core_type<tc>, window_params = [{transform_indices = @transform_0, window_bounds = array<i64: 2, 256, 128>}, {pipeline_mode = #tpu.pipeline_mode<synchronous>, transform_indices = @transform_1, window_bounds = array<i64: 2, 128>}]} {
    %c0_i32 = arith.constant 0 : i32
    %0 = arith.cmpi eq, %arg0, %c0_i32 : i32
    %1 = arith.extui %0 : i1 to i32
    %c0_i32_0 = arith.constant 0 : i32
    %2 = arith.cmpi ne, %1, %c0_i32_0 : i32
    scf.if %2 {
      %cst_9 = arith.constant 0.000000e+00 : f32
      %12 = vector.broadcast %cst_9 : f32 to vector<2x128xf32>
      %c0_10 = arith.constant 0 : index
      %c0_11 = arith.constant 0 : index
      %13 = vector.load %arg3[%c0_10, %c0_11] : memref<2x128xf32, #tpu.memory_space<vmem>>, vector<2x128xf32>
      tpu.vector_store %arg3[%c0_10, %c0_11], %12 {strides = array<i32>} : memref<2x128xf32, #tpu.memory_space<vmem>>, vector<2x128xf32>,
    } else {
    }
    %c0 = arith.constant 0 : index
    %c0_1 = arith.constant 0 : index
    %3 = vector.load %arg3[%c0, %c0_1] : memref<2x128xf32, #tpu.memory_space<vmem>>, vector<2x128xf32>
    %c0_2 = arith.constant 0 : index
    %c0_3 = arith.constant 0 : index
    %c0_4 = arith.constant 0 : index
    %4 = vector.load %arg1[%c0_2, %c0_3, %c0_4] : memref<2x256x128xbf16, #tpu.memory_space<vmem>>, vector<2x256x128xbf16>
    %5 = arith.extf %4 : vector<2x256x128xbf16> to vector<2x256x128xf32>
    %cst = arith.constant dense<0.000000e+00> : vector<2x128xf32>
    %6 = vector.multi_reduction <add>, %5, %cst [1] : vector<2x256x128xf32> to vector<2x128xf32>
    %7 = arith.addf %3, %6 : vector<2x128xf32>
    %c0_5 = arith.constant 0 : index
    %c0_6 = arith.constant 0 : index
    %8 = vector.load %arg3[%c0_5, %c0_6] : memref<2x128xf32, #tpu.memory_space<vmem>>, vector<2x128xf32>
    tpu.vector_store %arg3[%c0_5, %c0_6], %7 {strides = array<i32>} : memref<2x128xf32, #tpu.memory_space<vmem>>, vector<2x128xf32>,
    %c0_i32_7 = arith.constant 0 : i32
    %9 = arith.cmpi eq, %arg0, %c0_i32_7 : i32
    %10 = arith.extui %9 : i1 to i32
    %c0_i32_8 = arith.constant 0 : i32
    %11 = arith.cmpi ne, %10, %c0_i32_8 : i32
    scf.if %11 {
      %c0_9 = arith.constant 0 : index
      %c0_10 = arith.constant 0 : index
      %12 = vector.load %arg3[%c0_9, %c0_10] : memref<2x128xf32, #tpu.memory_space<vmem>>, vector<2x128xf32>
      %cst_11 = arith.constant 3.906250e-03 : f32
      %13 = vector.broadcast %cst_11 : f32 to vector<2x128xf32>
      %14 = arith.mulf %12, %13 : vector<2x128xf32>
      %c0_12 = arith.constant 0 : index
      %c0_13 = arith.constant 0 : index
      %15 = vector.load %arg2[%c0_12, %c0_13] : memref<2x128xf32, #tpu.memory_space<vmem>>, vector<2x128xf32>
      tpu.vector_store %arg2[%c0_12, %c0_13], %14 {strides = array<i32>} : memref<2x128xf32, #tpu.memory_space<vmem>>, vector<2x128xf32>,
    } else {
    }
    return
  }
  func.func @transform_0(%arg0: i32) -> (i32, i32, i32) {
    %c0_i32 = arith.constant 0 : i32
    %c0_i32_0 = arith.constant 0 : i32
    %c0_i32_1 = arith.constant 0 : i32
    return %c0_i32, %arg0, %c0_i32_0 : i32, i32, i32
  }
  func.func @transform_1(%arg0: i32) -> (i32, i32) {
    %c0_i32 = arith.constant 0 : i32
    %c0_i32_0 = arith.constant 0 : i32
    %c0_i32_1 = arith.constant 0 : i32
    return %c0_i32, %c0_i32_0 : i32, i32
  }
}

module attributes {stable_mosaic.version = 11 : i64} {
  func.func @_matmul_bias_kernel(%arg0: i32, %arg1: i32, %arg2: i32, %arg3: memref<128x128xbf16, #tpu.memory_space<vmem>>, %arg4: memref<128x512xbf16, #tpu.memory_space<vmem>>, %arg5: memref<1x512xf32, #tpu.memory_space<vmem>>, %arg6: memref<128x512xf32, #tpu.memory_space<vmem>>, %arg7: memref<128x512xf32, #tpu.memory_space<vmem>>) attributes {dimension_semantics = [#tpu.dimension_semantics<parallel>, #tpu.dimension_semantics<parallel>, #tpu.dimension_semantics<arbitrary>], iteration_bounds = array<i64: 1, 8, 1>, scalar_prefetch = 0 : i64, scratch_operands = 1 : i64, tpu.core_type = #tpu.core_type<tc>, window_params = [{transform_indices = @transform_0, window_bounds = array<i64: 128, 128>}, {transform_indices = @transform_1, window_bounds = array<i64: 128, 512>}, {transform_indices = @transform_2, window_bounds = array<i64: 1, 512>}, {transform_indices = @transform_3, window_bounds = array<i64: 128, 512>}]} {
    %c0_i32 = arith.constant 0 : i32
    %0 = arith.cmpi eq, %arg2, %c0_i32 : i32
    %1 = arith.extui %0 : i1 to i32
    %c0_i32_0 = arith.constant 0 : i32
    %2 = arith.cmpi ne, %1, %c0_i32_0 : i32
    scf.if %2 {
      %cst_10 = arith.constant 0.000000e+00 : f32
      %12 = vector.broadcast %cst_10 : f32 to vector<128x512xf32>
      %c0_11 = arith.constant 0 : index
      %c0_12 = arith.constant 0 : index
      %13 = vector.load %arg7[%c0_11, %c0_12] : memref<128x512xf32, #tpu.memory_space<vmem>>, vector<128x512xf32>
      tpu.vector_store %arg7[%c0_11, %c0_12], %12 {strides = array<i32>} : memref<128x512xf32, #tpu.memory_space<vmem>>, vector<128x512xf32>,
    } else {
    }
    %c0 = arith.constant 0 : index
    %c0_1 = arith.constant 0 : index
    %3 = vector.load %arg7[%c0, %c0_1] : memref<128x512xf32, #tpu.memory_space<vmem>>, vector<128x512xf32>
    %c0_2 = arith.constant 0 : index
    %c0_3 = arith.constant 0 : index
    %4 = vector.load %arg3[%c0_2, %c0_3] : memref<128x128xbf16, #tpu.memory_space<vmem>>, vector<128x128xbf16>
    %c0_4 = arith.constant 0 : index
    %c0_5 = arith.constant 0 : index
    %5 = vector.load %arg4[%c0_4, %c0_5] : memref<128x512xbf16, #tpu.memory_space<vmem>>, vector<128x512xbf16>
    %cst = arith.constant dense<0.000000e+00> : vector<128x512xf32>
    %6 = tpu.matmul %4, %5, %cst {dimension_numbers = #tpu.dot_dimension_numbers<[1], [0], [0], [1], [0, 0, 1, 1], [], []>} : vector<128x128xbf16>, vector<128x512xbf16>, vector<128x512xf32> -> vector<128x512xf32>
    %7 = arith.addf %3, %6 : vector<128x512xf32>
    %c0_6 = arith.constant 0 : index
    %c0_7 = arith.constant 0 : index
    %8 = vector.load %arg7[%c0_6, %c0_7] : memref<128x512xf32, #tpu.memory_space<vmem>>, vector<128x512xf32>
    tpu.vector_store %arg7[%c0_6, %c0_7], %7 {strides = array<i32>} : memref<128x512xf32, #tpu.memory_space<vmem>>, vector<128x512xf32>,
    %c0_i32_8 = arith.constant 0 : i32
    %9 = arith.cmpi eq, %arg2, %c0_i32_8 : i32
    %10 = arith.extui %9 : i1 to i32
    %c0_i32_9 = arith.constant 0 : i32
    %11 = arith.cmpi ne, %10, %c0_i32_9 : i32
    scf.if %11 {
      %c0_10 = arith.constant 0 : index
      %c0_11 = arith.constant 0 : index
      %12 = vector.load %arg7[%c0_10, %c0_11] : memref<128x512xf32, #tpu.memory_space<vmem>>, vector<128x512xf32>
      %c0_12 = arith.constant 0 : index
      %c0_13 = arith.constant 0 : index
      %13 = vector.load %arg5[%c0_12, %c0_13] : memref<1x512xf32, #tpu.memory_space<vmem>>, vector<1x512xf32>
      %14 = vector.broadcast %13 : vector<1x512xf32> to vector<128x512xf32>
      %15 = arith.addf %12, %14 : vector<128x512xf32>
      %cst_14 = arith.constant 0.000000e+00 : f32
      %16 = vector.broadcast %cst_14 : f32 to vector<128x512xf32>
      %17 = arith.maximumf %15, %16 : vector<128x512xf32>
      %c0_15 = arith.constant 0 : index
      %c0_16 = arith.constant 0 : index
      %18 = vector.load %arg6[%c0_15, %c0_16] : memref<128x512xf32, #tpu.memory_space<vmem>>, vector<128x512xf32>
      tpu.vector_store %arg6[%c0_15, %c0_16], %17 {strides = array<i32>} : memref<128x512xf32, #tpu.memory_space<vmem>>, vector<128x512xf32>,
    } else {
    }
    return
  }
  func.func @transform_0(%arg0: i32, %arg1: i32, %arg2: i32) -> (i32, i32) {
    %c0_i32 = arith.constant 0 : i32
    return %arg0, %arg2 : i32, i32
  }
  func.func @transform_1(%arg0: i32, %arg1: i32, %arg2: i32) -> (i32, i32) {
    %c0_i32 = arith.constant 0 : i32
    return %arg2, %arg1 : i32, i32
  }
  func.func @transform_2(%arg0: i32, %arg1: i32, %arg2: i32) -> (i32, i32) {
    %c0_i32 = arith.constant 0 : i32
    %c0_i32_0 = arith.constant 0 : i32
    return %c0_i32, %arg1 : i32, i32
  }
  func.func @transform_3(%arg0: i32, %arg1: i32, %arg2: i32) -> (i32, i32) {
    %c0_i32 = arith.constant 0 : i32
    return %arg0, %arg1 : i32, i32
  }
}

module attributes {stable_mosaic.version = 11 : i64} {
  func.func @_matmul_bias_kernel(%arg0: i32, %arg1: i32, %arg2: i32, %arg3: memref<128x512xbf16, #tpu.memory_space<vmem>>, %arg4: memref<512x128xbf16, #tpu.memory_space<vmem>>, %arg5: memref<1x128xf32, #tpu.memory_space<vmem>>, %arg6: memref<128x128xf32, #tpu.memory_space<vmem>>, %arg7: memref<128x128xf32, #tpu.memory_space<vmem>>) attributes {dimension_semantics = [#tpu.dimension_semantics<parallel>, #tpu.dimension_semantics<parallel>, #tpu.dimension_semantics<arbitrary>], iteration_bounds = array<i64: 1, 1, 8>, scalar_prefetch = 0 : i64, scratch_operands = 1 : i64, tpu.core_type = #tpu.core_type<tc>, window_params = [{transform_indices = @transform_0, window_bounds = array<i64: 128, 512>}, {transform_indices = @transform_1, window_bounds = array<i64: 512, 128>}, {transform_indices = @transform_2, window_bounds = array<i64: 1, 128>}, {transform_indices = @transform_3, window_bounds = array<i64: 128, 128>}]} {
    %c0_i32 = arith.constant 0 : i32
    %0 = arith.cmpi eq, %arg2, %c0_i32 : i32
    %1 = arith.extui %0 : i1 to i32
    %c0_i32_0 = arith.constant 0 : i32
    %2 = arith.cmpi ne, %1, %c0_i32_0 : i32
    scf.if %2 {
      %cst_9 = arith.constant 0.000000e+00 : f32
      %12 = vector.broadcast %cst_9 : f32 to vector<128x128xf32>
      %c0_10 = arith.constant 0 : index
      %c0_11 = arith.constant 0 : index
      %13 = vector.load %arg7[%c0_10, %c0_11] : memref<128x128xf32, #tpu.memory_space<vmem>>, vector<128x128xf32>
      tpu.vector_store %arg7[%c0_10, %c0_11], %12 {strides = array<i32>} : memref<128x128xf32, #tpu.memory_space<vmem>>, vector<128x128xf32>,
    } else {
    }
    %c0 = arith.constant 0 : index
    %c0_1 = arith.constant 0 : index
    %3 = vector.load %arg7[%c0, %c0_1] : memref<128x128xf32, #tpu.memory_space<vmem>>, vector<128x128xf32>
    %c0_2 = arith.constant 0 : index
    %c0_3 = arith.constant 0 : index
    %4 = vector.load %arg3[%c0_2, %c0_3] : memref<128x512xbf16, #tpu.memory_space<vmem>>, vector<128x512xbf16>
    %c0_4 = arith.constant 0 : index
    %c0_5 = arith.constant 0 : index
    %5 = vector.load %arg4[%c0_4, %c0_5] : memref<512x128xbf16, #tpu.memory_space<vmem>>, vector<512x128xbf16>
    %cst = arith.constant dense<0.000000e+00> : vector<128x128xf32>
    %6 = tpu.matmul %4, %5, %cst {dimension_numbers = #tpu.dot_dimension_numbers<[1], [0], [0], [1], [0, 0, 1, 1], [], []>} : vector<128x512xbf16>, vector<512x128xbf16>, vector<128x128xf32> -> vector<128x128xf32>
    %7 = arith.addf %3, %6 : vector<128x128xf32>
    %c0_6 = arith.constant 0 : index
    %c0_7 = arith.constant 0 : index
    %8 = vector.load %arg7[%c0_6, %c0_7] : memref<128x128xf32, #tpu.memory_space<vmem>>, vector<128x128xf32>
    tpu.vector_store %arg7[%c0_6, %c0_7], %7 {strides = array<i32>} : memref<128x128xf32, #tpu.memory_space<vmem>>, vector<128x128xf32>,
    %c7_i32 = arith.constant 7 : i32
    %9 = arith.cmpi eq, %arg2, %c7_i32 : i32
    %10 = arith.extui %9 : i1 to i32
    %c0_i32_8 = arith.constant 0 : i32
    %11 = arith.cmpi ne, %10, %c0_i32_8 : i32
    scf.if %11 {
      %c0_9 = arith.constant 0 : index
      %c0_10 = arith.constant 0 : index
      %12 = vector.load %arg7[%c0_9, %c0_10] : memref<128x128xf32, #tpu.memory_space<vmem>>, vector<128x128xf32>
      %c0_11 = arith.constant 0 : index
      %c0_12 = arith.constant 0 : index
      %13 = vector.load %arg5[%c0_11, %c0_12] : memref<1x128xf32, #tpu.memory_space<vmem>>, vector<1x128xf32>
      %14 = vector.broadcast %13 : vector<1x128xf32> to vector<128x128xf32>
      %15 = arith.addf %12, %14 : vector<128x128xf32>
      %c0_13 = arith.constant 0 : index
      %c0_14 = arith.constant 0 : index
      %16 = vector.load %arg6[%c0_13, %c0_14] : memref<128x128xf32, #tpu.memory_space<vmem>>, vector<128x128xf32>
      tpu.vector_store %arg6[%c0_13, %c0_14], %15 {strides = array<i32>} : memref<128x128xf32, #tpu.memory_space<vmem>>, vector<128x128xf32>,
    } else {
    }
    return
  }
  func.func @transform_0(%arg0: i32, %arg1: i32, %arg2: i32) -> (i32, i32) {
    %c0_i32 = arith.constant 0 : i32
    return %arg0, %arg2 : i32, i32
  }
  func.func @transform_1(%arg0: i32, %arg1: i32, %arg2: i32) -> (i32, i32) {
    %c0_i32 = arith.constant 0 : i32
    return %arg2, %arg1 : i32, i32
  }
  func.func @transform_2(%arg0: i32, %arg1: i32, %arg2: i32) -> (i32, i32) {
    %c0_i32 = arith.constant 0 : i32
    %c0_i32_0 = arith.constant 0 : i32
    return %c0_i32, %arg1 : i32, i32
  }
  func.func @transform_3(%arg0: i32, %arg1: i32, %arg2: i32) -> (i32, i32) {
    %c0_i32 = arith.constant 0 : i32
    return %arg0, %arg1 : i32, i32
  }
}

</mosaic_0001>

<bundles_post_ra>
// kernel: eco_forward.5
= control target key start
LH: loop header
LB: loop body
LE: loop exit
PB: predicated region body
PF: predicated region fallthrough
CT: control target
= control target key end

     0   :  { %s1499_s12 = smov 0   ;;  %s1501_s13 = smov 0   ;;  %s1636_s0 = inlined_call_operand.vmem [shape: bf16[512,128], index: 0, kind: input, shape index: {}]   ;;  %s1637_s1 = inlined_call_operand.vmem [shape: bf16[128,128], index: 1, kind: input, shape index: {}]   ;;  %s1638_s2 = inlined_call_operand.vmem [shape: f32[1,128], index: 2, kind: input, shape index: {}]   ;;  %s1639_s3 = inlined_call_operand.vmem [shape: bf16[512,128], index: 3, kind: output, shape index: {}]  }
   0x1   :  { %s1503_s14 = smov 0  }
   0x2 LB: > { %s32_s15 = sadd.s32 1, %s1473_s13  ;;  %p1128_p0 = scmp.ge.s32.totalorder %s1477_s14, 1  ;;  %s1477_s14 = sphi %s1503_s14, %s13_s14   ;;  %s1473_s13 = sphi %s1501_s13, %s1641_s13   ;;  %s1469_s12 = sphi %s1499_s12, %s1640_s12  }
   0x3   : > { %p34_p1 = scmp.ge.s32.totalorder %s32_s15, 2  ;;  %p188_p2 = scmp.lt.s32.totalorder %s1477_s14, 3 }
   0x5   : > { %s1643_s15 = smov (%p34_p1, %s32_s15), 0  ;;  %p189_p3 = pnand %p1128_p0, %p188_p2 }
   0x6   : > { %s1129_s18 = sshll.u32 (!%p189_p3), %s1469_s12, 5 }
   0x7   : > { %192 = sbr.rel (%p189_p3) target bundleno = 275 (0x113), region = 32  ;;  %p230_p4 = scmp.lt.s32.totalorder (!%p189_p3), %s1129_s18, 63 }
   0xc   : > { %v1431_v0 = vld [vmem:[%s1637_s1 + $0x38] sm:$0xff]   ;;  %v1432_v1 = vld [vmem:[%s1637_s1 + $0x30] sm:$0xff]   ;;  %s1645_s18 = smov (!%p230_p4, %s1129_s18), 63  ;;  %v1433_v2 = vld [vmem:[%s1637_s1 + $0x28] sm:$0xff]  }
   0xd   : > { %1343 = vmatprep.subr.bf16.mxu0 %v1431_v0  ;;  %1391 = vmatprep.subr.bf16.mxu1 %v1431_v0  ;;  %s1130_s23 = sshll.u32 %s1645_s18, 2  ;;  %v1434_v3 = vld [vmem:[%s1637_s1 + $0x20] sm:$0xff]   ;;  %v1435_v6 = vld [vmem:[%s1637_s1 + $0x18] sm:$0xff]   ;;  %v1436_v7 = vld [vmem:[%s1637_s1 + $0x10] sm:$0xff]  }
   0xe   : > { %1344 = vmatpush3.bf16.msra.mxu0 %v1431_v0  ;;  %1399 = vmatpush3.bf16.msra.mxu1 %v1431_v0  ;;  %s1534_s26 = scalar_lea.vmem %s1636_s0, %s1130_s23  ;;  %v1437_v8 = vld [vmem:[%s1637_s1 + $0x8] sm:$0xff]   ;;  %v1438_v9 = vld [vmem:[%s1637_s1] sm:$0xff]   ;;  %s1585_s17 = scalar_lea.vmem %s1639_s3, %s1130_s23 }
   0xf   : > { %1345 = vmatprep.subr.bf16.mxu0 %v1432_v1  ;;  %1392 = vmatprep.subr.bf16.mxu1 %v1432_v1  ;;  %v1439_v4 = vld [vmem:[%s1534_s26] sm:$0xff]   ;;  %v1441_v10 = vld [vmem:[%s1534_s26 + $0x8] sm:$0xff]   ;;  %v1443_v12 = vld [vmem:[%s1534_s26 + $0x10] sm:$0xff]  }
  0x10   : > { %v1440_v5 = vld [vmem:[%s1534_s26 + $0x40] sm:$0xff]   ;;  %1359 = vmatprep.mubr.bf16.mxu0 %v1439_v4  ;;  %v1442_v11 = vld [vmem:[%s1534_s26 + $0x48] sm:$0xff]   ;;  %v1444_v13 = vld [vmem:[%s1534_s26 + $0x50] sm:$0xff]  }
  0x11   : > { %1375 = vmatprep.mubr.bf16.mxu1 %v1440_v5  ;;  %v1445_v14 = vld [vmem:[%s1534_s26 + $0x18] sm:$0xff]   ;;  %v1447_v16 = vld [vmem:[%s1534_s26 + $0x20] sm:$0xff]   ;;  %v1449_v18 = vld [vmem:[%s1534_s26 + $0x28] sm:$0xff]  }
  0x12   : > { %1346 = vmatpush3.bf16.msra.mxu0 %v1432_v1  ;;  %1400 = vmatpush3.bf16.msra.mxu1 %v1432_v1  ;;  %v1446_v15 = vld [vmem:[%s1534_s26 + $0x58] sm:$0xff]   ;;  %v1448_v17 = vld [vmem:[%s1534_s26 + $0x60] sm:$0xff]   ;;  %v1450_v19 = vld [vmem:[%s1534_s26 + $0x68] sm:$0xff]  }
  0x13   : > { %1347 = vmatprep.subr.bf16.mxu0 %v1433_v2  ;;  %1393 = vmatprep.subr.bf16.mxu1 %v1433_v2  ;;  %v1451_v20 = vld [vmem:[%s1534_s26 + $0x30] sm:$0xff]   ;;  %v1453_v22 = vld [vmem:[%s1534_s26 + $0x38] sm:$0xff]   ;;  %v1570_v24 = vld [vmem:[%s1638_s2] ss:$0 sm:$0xff] }
  0x14   : > { %v1452_v21 = vld [vmem:[%s1534_s26 + $0x70] sm:$0xff]   ;;  %v1454_v23 = vld [vmem:[%s1534_s26 + $0x78] sm:$0xff]  }
  0x16   : > { %1348 = vmatpush3.bf16.msra.mxu0 %v1433_v2  ;;  %1401 = vmatpush3.bf16.msra.mxu1 %v1433_v2 }
  0x17   : > { %1349 = vmatprep.subr.bf16.mxu0 %v1434_v3  ;;  %1394 = vmatprep.subr.bf16.mxu1 %v1434_v3 }
  0x1a   : > { %1350 = vmatpush3.bf16.msra.mxu0 %v1434_v3  ;;  %1402 = vmatpush3.bf16.msra.mxu1 %v1434_v3 }
  0x1b   : > { %1351 = vmatprep.subr.bf16.mxu0 %v1435_v6  ;;  %1395 = vmatprep.subr.bf16.mxu1 %v1435_v6 }
  0x1e   : > { %1352 = vmatpush3.bf16.msra.mxu0 %v1435_v6  ;;  %1403 = vmatpush3.bf16.msra.mxu1 %v1435_v6 }
  0x1f   : > { %1353 = vmatprep.subr.bf16.mxu0 %v1436_v7  ;;  %1396 = vmatprep.subr.bf16.mxu1 %v1436_v7 }
  0x22   : > { %1354 = vmatpush3.bf16.msra.mxu0 %v1436_v7  ;;  %1404 = vmatpush3.bf16.msra.mxu1 %v1436_v7 }
  0x23   : > { %1355 = vmatprep.subr.bf16.mxu0 %v1437_v8  ;;  %1397 = vmatprep.subr.bf16.mxu1 %v1437_v8 }
  0x26   : > { %1356 = vmatpush3.bf16.msra.mxu0 %v1437_v8  ;;  %1405 = vmatpush3.bf16.msra.mxu1 %v1437_v8 }
  0x27   : > { %1357 = vmatprep.subr.bf16.mxu0 %v1438_v9  ;;  %1398 = vmatprep.subr.bf16.mxu1 %v1438_v9 }
  0x2a   : > { %1358 = vmatpush3.bf16.msra.mxu0 %v1438_v9  ;;  %1406 = vmatpush3.bf16.msra.mxu1 %v1438_v9 }
  0x2d   : > { %1360 = vmatmul.mubr.bf16.vlgmr.msra.gmra.mxu0 %v1441_v10  ;;  %1376 = vmatmul.mubr.bf16.vlgmr.msra.gmra.mxu1 %v1442_v11 }
  0x2e   : > { %1363 = vmatprep.mubr.bf16.mxu0 %v1443_v12  ;;  %1379 = vmatprep.mubr.bf16.mxu1 %v1444_v13 }
  0x35   : > { %1364 = vmatmul.mubr.bf16.gmra.mxu0 %v1445_v14  ;;  %1380 = vmatmul.mubr.bf16.gmra.mxu1 %v1446_v15 }
  0x36   : > { %1367 = vmatprep.mubr.bf16.mxu0 %v1447_v16  ;;  %1383 = vmatprep.mubr.bf16.mxu1 %v1448_v17 }
  0x3d   : > { %1368 = vmatmul.mubr.bf16.gmra.mxu0 %v1449_v18  ;;  %1384 = vmatmul.mubr.bf16.gmra.mxu1 %v1450_v19 }
  0x3e   : > { %1371 = vmatprep.mubr.bf16.mxu0 %v1451_v20  ;;  %1387 = vmatprep.mubr.bf16.mxu1 %v1452_v21 }
  0x45   : > { %1372 = vmatmul.mubr.bf16.gmra.mxu0 %v1453_v22  ;;  %1388 = vmatmul.mubr.bf16.gmra.mxu1 %v1454_v23 }
  0xed   : > { %v1361_v25 = vpop.f32.mrf.mxu0  ;;  %v1377_v26 = vpop.f32.mrf.mxu1 }
  0xee   : > { %v789_v27 = vadd.f32 %v1361_v25, %v1570_v24  ;;  %v805_v28 = vadd.f32 %v1377_v26, %v1570_v24 }
  0xef   : > { %v554_v29 = vpop.f32.mrf.mxu0  ;;  %v618_v30 = vpop.f32.mrf.mxu1 }
  0xf0   : > { %v787_v31 = vadd.f32 %v1570_v24, %v554_v29  ;;  %v803_v32 = vadd.f32 %v1570_v24, %v618_v30  ;;  %v821_v37 = vmax.f32 %v789_v27, 0.0  ;;  %v837_v38 = vmax.f32 %v805_v28, 0.0 }
  0xf1   : > { %v1362_v33 = vpop.f32.mrf.mxu0  ;;  %v1378_v34 = vpop.f32.mrf.mxu1 }
  0xf2   : > { %v790_v35 = vadd.f32 %v1362_v33, %v1570_v24  ;;  %v806_v36 = vadd.f32 %v1378_v34, %v1570_v24  ;;  %v819_v45 = vmax.f32 %v787_v31, 0.0  ;;  %v835_v46 = vmax.f32 %v803_v32, 0.0 }
  0xf3   : > { %v557_v39 = vpop.f32.mrf.mxu0  ;;  %v621_v40 = vpop.f32.mrf.mxu1 }
  0xf4   : > { %v822_v41 = vmax.f32 %v790_v35, 0.0  ;;  %v838_v42 = vmax.f32 %v806_v36, 0.0  ;;  %v788_v43 = vadd.f32 %v1570_v24, %v557_v39  ;;  %v804_v44 = vadd.f32 %v1570_v24, %v621_v40 }
  0xf5   : > { %v1365_v47 = vpop.f32.mrf.mxu0  ;;  %v1381_v48 = vpop.f32.mrf.mxu1 }
  0xf6   : > { %v1232_v49 = vpack.c.bf16 %v822_v41, %v821_v37  ;;  %v1272_v50 = vpack.c.bf16 %v838_v42, %v837_v38  ;;  %v820_v51 = vmax.f32 %v788_v43, 0.0  ;;  %v836_v52 = vmax.f32 %v804_v44, 0.0 }
  0xf7   : > { %v793_v53 = vadd.f32 %v1365_v47, %v1570_v24  ;;  %v809_v54 = vadd.f32 %v1381_v48, %v1570_v24  ;;  %v570_v55 = vpop.f32.mrf.mxu0  ;;  %v634_v56 = vpop.f32.mrf.mxu1 }
  0xf8   : > { %1304 = vst [vmem:[%s1585_s17 + $0x8] sm:$0xff] %v1232_v49   ;;  %1312 = vst [vmem:[%s1585_s17 + $0x48] sm:$0xff] %v1272_v50   ;;  %v1227_v57 = vpack.c.bf16 %v820_v51, %v819_v45  ;;  %v1267_v58 = vpack.c.bf16 %v836_v52, %v835_v46  ;;  %v791_v59 = vadd.f32 %v1570_v24, %v570_v55 }
  0xf9   : > { %v807_v60 = vadd.f32 %v1570_v24, %v634_v56  ;;  %v1366_v61 = vpop.f32.mrf.mxu0  ;;  %v1382_v62 = vpop.f32.mrf.mxu1  ;;  %v825_v1 = vmax.f32 %v793_v53, 0.0  ;;  %v841_v2 = vmax.f32 %v809_v54, 0.0 }
  0xfa   : > { %1228 = vst [vmem:[%s1585_s17] sm:$0xff] %v1227_v57   ;;  %1311 = vst [vmem:[%s1585_s17 + $0x40] sm:$0xff] %v1267_v58   ;;  %v794_v63 = vadd.f32 %v1366_v61, %v1570_v24  ;;  %v810_v0 = vadd.f32 %v1382_v62, %v1570_v24  ;;  %v823_v9 = vmax.f32 %v791_v59, 0.0 }
  0xfb   : > { %v573_v3 = vpop.f32.mrf.mxu0  ;;  %v637_v4 = vpop.f32.mrf.mxu1  ;;  %v839_v10 = vmax.f32 %v807_v60, 0.0 }
  0xfc   : > { %v826_v5 = vmax.f32 %v794_v63, 0.0  ;;  %v842_v6 = vmax.f32 %v810_v0, 0.0  ;;  %v792_v7 = vadd.f32 %v1570_v24, %v573_v3  ;;  %v808_v8 = vadd.f32 %v1570_v24, %v637_v4 }
  0xfd   : > { %v1369_v11 = vpop.f32.mrf.mxu0  ;;  %v1385_v12 = vpop.f32.mrf.mxu1 }
  0xfe   : > { %v1242_v13 = vpack.c.bf16 %v826_v5, %v825_v1  ;;  %v1282_v14 = vpack.c.bf16 %v842_v6, %v841_v2  ;;  %v824_v15 = vmax.f32 %v792_v7, 0.0  ;;  %v840_v16 = vmax.f32 %v808_v8, 0.0 }
  0xff   : > { %v797_v17 = vadd.f32 %v1369_v11, %v1570_v24  ;;  %v813_v18 = vadd.f32 %v1385_v12, %v1570_v24  ;;  %v586_v19 = vpop.f32.mrf.mxu0  ;;  %v650_v20 = vpop.f32.mrf.mxu1 }
 0x100   : > { %1306 = vst [vmem:[%s1585_s17 + $0x18] sm:$0xff] %v1242_v13   ;;  %1314 = vst [vmem:[%s1585_s17 + $0x58] sm:$0xff] %v1282_v14   ;;  %v1237_v21 = vpack.c.bf16 %v824_v15, %v823_v9  ;;  %v1277_v22 = vpack.c.bf16 %v840_v16, %v839_v10  ;;  %v795_v23 = vadd.f32 %v1570_v24, %v586_v19 }
 0x101   : > { %v811_v25 = vadd.f32 %v1570_v24, %v650_v20  ;;  %v1370_v26 = vpop.f32.mrf.mxu0  ;;  %v1386_v27 = vpop.f32.mrf.mxu1  ;;  %v829_v30 = vmax.f32 %v797_v17, 0.0  ;;  %v845_v31 = vmax.f32 %v813_v18, 0.0 }
 0x102   : > { %1305 = vst [vmem:[%s1585_s17 + $0x10] sm:$0xff] %v1237_v21   ;;  %1313 = vst [vmem:[%s1585_s17 + $0x50] sm:$0xff] %v1277_v22   ;;  %v798_v28 = vadd.f32 %v1370_v26, %v1570_v24  ;;  %v814_v29 = vadd.f32 %v1386_v27, %v1570_v24  ;;  %v827_v38 = vmax.f32 %v795_v23, 0.0 }
 0x103   : > { %v589_v32 = vpop.f32.mrf.mxu0  ;;  %v653_v33 = vpop.f32.mrf.mxu1  ;;  %v843_v39 = vmax.f32 %v811_v25, 0.0 }
 0x104   : > { %v830_v34 = vmax.f32 %v798_v28, 0.0  ;;  %v846_v35 = vmax.f32 %v814_v29, 0.0  ;;  %v796_v36 = vadd.f32 %v1570_v24, %v589_v32  ;;  %v812_v37 = vadd.f32 %v1570_v24, %v653_v33 }
 0x105   : > { %v1373_v40 = vpop.f32.mrf.mxu0  ;;  %v1389_v41 = vpop.f32.mrf.mxu1 }
 0x106   : > { %v1252_v42 = vpack.c.bf16 %v830_v34, %v829_v30  ;;  %v1292_v43 = vpack.c.bf16 %v846_v35, %v845_v31  ;;  %v828_v44 = vmax.f32 %v796_v36, 0.0  ;;  %v844_v45 = vmax.f32 %v812_v37, 0.0 }
 0x107   : > { %v801_v46 = vadd.f32 %v1373_v40, %v1570_v24  ;;  %v817_v47 = vadd.f32 %v1389_v41, %v1570_v24  ;;  %v602_v48 = vpop.f32.mrf.mxu0  ;;  %v666_v49 = vpop.f32.mrf.mxu1 }
 0x108   : > { %1308 = vst [vmem:[%s1585_s17 + $0x28] sm:$0xff] %v1252_v42   ;;  %1316 = vst [vmem:[%s1585_s17 + $0x68] sm:$0xff] %v1292_v43   ;;  %v1247_v50 = vpack.c.bf16 %v828_v44, %v827_v38  ;;  %v1287_v51 = vpack.c.bf16 %v844_v45, %v843_v39  ;;  %v799_v52 = vadd.f32 %v1570_v24, %v602_v48 }
 0x109   : > { %v815_v53 = vadd.f32 %v1570_v24, %v666_v49  ;;  %v1374_v54 = vpop.f32.mrf.mxu0  ;;  %v1390_v55 = vpop.f32.mrf.mxu1  ;;  %v833_v58 = vmax.f32 %v801_v46, 0.0  ;;  %v849_v59 = vmax.f32 %v817_v47, 0.0 }
 0x10a   : > { %1307 = vst [vmem:[%s1585_s17 + $0x20] sm:$0xff] %v1247_v50   ;;  %1315 = vst [vmem:[%s1585_s17 + $0x60] sm:$0xff] %v1287_v51   ;;  %v802_v56 = vadd.f32 %v1374_v54, %v1570_v24  ;;  %v818_v57 = vadd.f32 %v1390_v55, %v1570_v24  ;;  %v831_v2 = vmax.f32 %v799_v52, 0.0 }
 0x10b   : > { %v605_v60 = vpop.f32.mrf.mxu0  ;;  %v669_v61 = vpop.f32.mrf.mxu1  ;;  %v847_v3 = vmax.f32 %v815_v53, 0.0 }
 0x10c   : > { %v834_v62 = vmax.f32 %v802_v56, 0.0  ;;  %v850_v63 = vmax.f32 %v818_v57, 0.0  ;;  %v800_v0 = vadd.f32 %v1570_v24, %v605_v60  ;;  %v816_v1 = vadd.f32 %v1570_v24, %v669_v61 }
 0x10e   : > { %v1262_v4 = vpack.c.bf16 %v834_v62, %v833_v58  ;;  %v1302_v5 = vpack.c.bf16 %v850_v63, %v849_v59  ;;  %v832_v6 = vmax.f32 %v800_v0, 0.0  ;;  %v848_v7 = vmax.f32 %v816_v1, 0.0 }
 0x110   : > { %1310 = vst [vmem:[%s1585_s17 + $0x38] sm:$0xff] %v1262_v4   ;;  %1318 = vst [vmem:[%s1585_s17 + $0x78] sm:$0xff] %v1302_v5   ;;  %v1257_v8 = vpack.c.bf16 %v832_v6, %v831_v2  ;;  %v1297_v9 = vpack.c.bf16 %v848_v7, %v847_v3 }
 0x112   : > { %1309 = vst [vmem:[%s1585_s17 + $0x30] sm:$0xff] %v1257_v8   ;;  %1317 = vst [vmem:[%s1585_s17 + $0x70] sm:$0xff] %v1297_v9  }
 0x113 PF: > { %s13_s14 = sadd.s32 1, %s1477_s14   ;;  %s1640_s12 = smov %s1473_s13 }
 0x114   : > { %p10_p5 = scmp.ge.s32.totalorder %s13_s14, 4   ;;  %s1641_s13 = smov %s1643_s15 }
 0x116   :  { %12 = sbr.rel (!%p10_p5) target bundleno = 2 (0x2), region = 76 }

// kernel: eco_forward.6
= control target key start
LH: loop header
LB: loop body
LE: loop exit
PB: predicated region body
PF: predicated region fallthrough
CT: control target
= control target key end

     0   :  { %s1738_s12 = smov 0   ;;  %s1740_s13 = smov 0   ;;  %s1983_s0 = inlined_call_operand.vmem [shape: bf16[512,896], index: 0, kind: input, shape index: {}]   ;;  %s1984_s1 = inlined_call_operand.vmem [shape: bf16[896,128], index: 1, kind: input, shape index: {}]   ;;  %s1985_s2 = inlined_call_operand.vmem [shape: f32[1,128], index: 2, kind: input, shape index: {}]   ;;  %s1986_s3 = inlined_call_operand.vmem [shape: bf16[512,128], index: 3, kind: output, shape index: {}]  }
   0x1   :  { %s1742_s14 = smov 0   ;;  %s1744_s15 = smov 0  }
   0x2   :  { %s1746_s16 = smov 0   ;;  %s1748_s17 = smov 0  }
   0x3   :  { %s1750_s18 = smov 0  }
   0x4 LB: > { %s25_s19 = sadd.s32 1, %s1707_s16  ;;  %s32_s20 = sadd.s32 1, %s1711_s17  ;;  %s1715_s18 = sphi %s1750_s18, %s13_s18   ;;  %s1711_s17 = sphi %s1748_s17, %s1992_s17   ;;  %s1707_s16 = sphi %s1746_s16, %s1991_s16   ;;  %s1703_s15 = sphi %s1744_s15, %s1990_s15   ;;  %s1699_s14 = sphi %s1742_s14, %s1989_s14   ;;  %s1695_s13 = sphi %s1740_s13, %s1988_s13   ;;  %s1691_s12 = sphi %s1738_s12, %s1987_s12  }
   0x5   : > { %p26_p0 = scmp.ge.s32.totalorder %s25_s19, 7  ;;  %p48_p1 = scmp.ne.s32.totalorder %s1695_s13, %s1691_s12 }
   0x6   : > { %p49_p2 = scmp.eq.s32.totalorder %s1715_s18, 0  ;;  %s41_s24 = sadd.s32 1, %s1695_s13 }
   0x7   : > { %s1994_s19 = smov (%p26_p0, %s25_s19), 0  ;;  %s1996_s20 = smov (!%p26_p0, %s32_s20), %s1711_s17 }
   0x8   : > { %p50_p3 = por %p49_p2, %p48_p1  ;;  %p34_p4 = scmp.ge.s32.totalorder %s1996_s20, 2 }
   0x9   : > { %s37_s21 = ssub.s32 %s1707_s16, %s1994_s19  ;;  %p1292_p6 = scmp.ge.s32.totalorder %s1715_s18, 14 }
   0xa   : > { %s1998_s20 = smov (%p34_p4, %s1996_s20), 0 }
   0xb   : > { %s36_s22 = ssub.s32 %s1711_s17, %s1998_s20  ;;  %162 = sbr.rel (%p1292_p6) target bundleno = 44 (0x2c), region = 20 }
   0xc   : > { %s38_s23 = sor.u32 %s37_s21, %s36_s22 }
   0xd   : > { %p39_p5 = scmp.eq.s32.totalorder %s38_s23, 0 }
   0xf   : > { %s1789_s25 = scalar_select %p39_p5, %s1695_s13, %s41_s24  }
  0x10   : > { %165 = sbr.rel (!%p50_p3) target bundleno = 44 (0x2c), region = 24  ;;  %s167_s26 = sand.u32 (%p50_p3), 1, %s1695_s13  }
  0x11   : > { %s1579_s27 = smul.u32 (%p50_p3), 224, %s1711_s17  ;;  %s1293_s28 = sshll.u32 (%p50_p3), %s167_s26, 7 }
  0x12   : > { %s1803_s7 = scalar_lea.vmem (%p50_p3), [#allocation3], %s1293_s28 }
  0x13   : > { %s172_s29 = sadd.s32 (%p50_p3), %s1707_s16, %s1579_s27 }
  0x14   : > { %s1296_s30 = sshll.u32 (%p50_p3), %s172_s29, 2 }
  0x15   : > { %s1798_s6 = scalar_lea.vmem %s1983_s0, %s1296_s30 }
  0x16   : > { %v191_v0 = vld [vmem:[%s1798_s6] sm:$0xf]  ;;  %v193_v1 = vld [vmem:[%s1798_s6 + $0x1c] sm:$0xf]  ;;  %v195_v2 = vld [vmem:[%s1798_s6 + $0x38] sm:$0xf] }
  0x17   : > { %192 = vst [vmem:[%s1803_s7] sm:$0xf] %v191_v0  ;;  %194 = vst [vmem:[%s1803_s7 + $0x4] sm:$0xf] %v193_v1  ;;  %v197_v3 = vld [vmem:[%s1798_s6 + $0x54] sm:$0xf] }
  0x18   : > { %196 = vst [vmem:[%s1803_s7 + $0x8] sm:$0xf] %v195_v2  ;;  %v199_v4 = vld [vmem:[%s1798_s6 + $0x70] sm:$0xf]  ;;  %v201_v5 = vld [vmem:[%s1798_s6 + $0x8c] sm:$0xf] }
  0x19   : > { %198 = vst [vmem:[%s1803_s7 + $0xc] sm:$0xf] %v197_v3  ;;  %200 = vst [vmem:[%s1803_s7 + $0x10] sm:$0xf] %v199_v4  ;;  %v203_v6 = vld [vmem:[%s1798_s6 + $0xa8] sm:$0xf] }
  0x1a   : > { %202 = vst [vmem:[%s1803_s7 + $0x14] sm:$0xf] %v201_v5  ;;  %v205_v7 = vld [vmem:[%s1798_s6 + $0xc4] sm:$0xf]  ;;  %v207_v8 = vld [vmem:[%s1798_s6 + $0xe0] sm:$0xf] }
  0x1b   : > { %204 = vst [vmem:[%s1803_s7 + $0x18] sm:$0xf] %v203_v6  ;;  %206 = vst [vmem:[%s1803_s7 + $0x1c] sm:$0xf] %v205_v7  ;;  %v209_v9 = vld [vmem:[%s1798_s6 + $0xfc] sm:$0xf] }
  0x1c   : > { %208 = vst [vmem:[%s1803_s7 + $0x20] sm:$0xf] %v207_v8  ;;  %v211_v10 = vld [vmem:[%s1798_s6 + $0x118] sm:$0xf]  ;;  %v213_v11 = vld [vmem:[%s1798_s6 + $0x134] sm:$0xf] }
  0x1d   : > { %210 = vst [vmem:[%s1803_s7 + $0x24] sm:$0xf] %v209_v9  ;;  %212 = vst [vmem:[%s1803_s7 + $0x28] sm:$0xf] %v211_v10  ;;  %v215_v12 = vld [vmem:[%s1798_s6 + $0x150] sm:$0xf] }
  0x1e   : > { %214 = vst [vmem:[%s1803_s7 + $0x2c] sm:$0xf] %v213_v11  ;;  %v217_v13 = vld [vmem:[%s1798_s6 + $0x16c] sm:$0xf]  ;;  %v219_v14 = vld [vmem:[%s1798_s6 + $0x188] sm:$0xf] }
  0x1f   : > { %216 = vst [vmem:[%s1803_s7 + $0x30] sm:$0xf] %v215_v12  ;;  %218 = vst [vmem:[%s1803_s7 + $0x34] sm:$0xf] %v217_v13  ;;  %v221_v15 = vld [vmem:[%s1798_s6 + $0x1a4] sm:$0xf] }
  0x20   : > { %220 = vst [vmem:[%s1803_s7 + $0x38] sm:$0xf] %v219_v14  ;;  %v223_v16 = vld [vmem:[%s1798_s6 + $0x1c0] sm:$0xf]  ;;  %v225_v17 = vld [vmem:[%s1798_s6 + $0x1dc] sm:$0xf] }
  0x21   : > { %222 = vst [vmem:[%s1803_s7 + $0x3c] sm:$0xf] %v221_v15  ;;  %224 = vst [vmem:[%s1803_s7 + $0x40] sm:$0xf] %v223_v16  ;;  %v227_v18 = vld [vmem:[%s1798_s6 + $0x1f8] sm:$0xf] }
  0x22   : > { %226 = vst [vmem:[%s1803_s7 + $0x44] sm:$0xf] %v225_v17  ;;  %v229_v19 = vld [vmem:[%s1798_s6 + $0x214] sm:$0xf]  ;;  %v231_v20 = vld [vmem:[%s1798_s6 + $0x230] sm:$0xf] }
  0x23   : > { %228 = vst [vmem:[%s1803_s7 + $0x48] sm:$0xf] %v227_v18  ;;  %230 = vst [vmem:[%s1803_s7 + $0x4c] sm:$0xf] %v229_v19  ;;  %v233_v21 = vld [vmem:[%s1798_s6 + $0x24c] sm:$0xf] }
  0x24   : > { %232 = vst [vmem:[%s1803_s7 + $0x50] sm:$0xf] %v231_v20  ;;  %v235_v22 = vld [vmem:[%s1798_s6 + $0x268] sm:$0xf]  ;;  %v237_v23 = vld [vmem:[%s1798_s6 + $0x284] sm:$0xf] }
  0x25   : > { %234 = vst [vmem:[%s1803_s7 + $0x54] sm:$0xf] %v233_v21  ;;  %236 = vst [vmem:[%s1803_s7 + $0x58] sm:$0xf] %v235_v22  ;;  %v239_v24 = vld [vmem:[%s1798_s6 + $0x2a0] sm:$0xf] }
  0x26   : > { %238 = vst [vmem:[%s1803_s7 + $0x5c] sm:$0xf] %v237_v23  ;;  %v241_v25 = vld [vmem:[%s1798_s6 + $0x2bc] sm:$0xf]  ;;  %v243_v26 = vld [vmem:[%s1798_s6 + $0x2d8] sm:$0xf] }
  0x27   : > { %240 = vst [vmem:[%s1803_s7 + $0x60] sm:$0xf] %v239_v24  ;;  %242 = vst [vmem:[%s1803_s7 + $0x64] sm:$0xf] %v241_v25  ;;  %v245_v27 = vld [vmem:[%s1798_s6 + $0x2f4] sm:$0xf] }
  0x28   : > { %244 = vst [vmem:[%s1803_s7 + $0x68] sm:$0xf] %v243_v26  ;;  %v247_v28 = vld [vmem:[%s1798_s6 + $0x310] sm:$0xf]  ;;  %v249_v29 = vld [vmem:[%s1798_s6 + $0x32c] sm:$0xf] }
  0x29   : > { %246 = vst [vmem:[%s1803_s7 + $0x6c] sm:$0xf] %v245_v27  ;;  %248 = vst [vmem:[%s1803_s7 + $0x70] sm:$0xf] %v247_v28  ;;  %v251_v30 = vld [vmem:[%s1798_s6 + $0x348] sm:$0xf] }
  0x2a   : > { %250 = vst [vmem:[%s1803_s7 + $0x74] sm:$0xf] %v249_v29  ;;  %v253_v31 = vld [vmem:[%s1798_s6 + $0x364] sm:$0xf]  ;;  %252 = vst [vmem:[%s1803_s7 + $0x78] sm:$0xf] %v251_v30 }
  0x2b   : > { %254 = vst [vmem:[%s1803_s7 + $0x7c] sm:$0xf] %v253_v31 }
  0x2c PF: > { %p1297_p7 = scmp.ge.s32.totalorder %s1715_s18, 1  ;;  %p353_p8 = scmp.lt.s32.totalorder %s1715_s18, 15 }
  0x2e   : > { %p354_p9 = pnand %p1297_p7, %p353_p8 }
  0x2f   : > { %s360_s8 = sand.u32 (!%p354_p9), 1, %s1691_s12   ;;  %s1299_s9 = sshll.u32 (!%p354_p9), %s1699_s14, 4 }
  0x30   : > { %357 = sbr.rel (%p354_p9) target bundleno = 363 (0x16b), region = 69  ;;  %s1298_s10 = sshll.u32 (!%p354_p9), %s360_s8, 7 }
  0x31   : > { %p399_p10 = scmp.lt.s32.totalorder (!%p354_p9), %s1299_s9, 111  ;;  %s1301_s11 = sshll.u32 (!%p354_p9), %s1703_s15, 5 }
  0x32   : > { %p411_p11 = scmp.lt.s32.totalorder (!%p354_p9), %s1301_s11, 63  ;;  %s1881_s12 = scalar_lea.vmem (!%p354_p9), [#allocation3], %s1298_s10 }
  0x33   : > { %p1303_p12 = scmp.ne.s32.totalorder (!%p354_p9), %s1699_s14, 0 }
  0x35   : > { %s2000_s9 = smov (!%p399_p10, %s1299_s9), 111  ;;  %s2002_s11 = smov (!%p411_p11, %s1301_s11), 63 }
  0x36   : > { %s1300_s21 = sshll.u32 %s2000_s9, 2  ;;  %s1302_s26 = sshll.u32 %s2002_s11, 2 }
  0x37   : > { %s1874_s24 = scalar_lea.vmem %s1984_s1, %s1300_s21  ;;  %s1879_s29 = scalar_lea.vmem %s1986_s3, %s1302_s26 }
  0x38   : > { %423 = sbr.rel (%p1303_p12) target bundleno = 78 (0x4e), region = 77 }
  0x3d   : > { %v1717_v32 = vmov 0.0  }
  0x3e   : > { %424 = vst [vmem:[#allocation2 + $0xb0] sm:$0xff] %v1717_v32  ;;  %425 = vst [vmem:[#allocation2] sm:$0xff] %v1717_v32 }
  0x3f   : > { %426 = vst [vmem:[#allocation2 + $0xd8] sm:$0xff] %v1717_v32  ;;  %427 = vst [vmem:[#allocation2 + $0x18] sm:$0xff] %v1717_v32 }
  0x40   : > { %428 = vst [vmem:[#allocation2 + $0x50] sm:$0xff] %v1717_v32  ;;  %429 = vst [vmem:[#allocation2 + $0x68] sm:$0xff] %v1717_v32 }
  0x41   : > { %430 = vst [vmem:[#allocation2 + $0x30] sm:$0xff] %v1717_v32  ;;  %431 = vst [vmem:[#allocation2 + $0x48] sm:$0xff] %v1717_v32 }
  0x42   : > { %432 = vst [vmem:[#allocation2 + $0x80] sm:$0xff] %v1717_v32  ;;  %433 = vst [vmem:[#allocation2 + $0x88] sm:$0xff] %v1717_v32 }
  0x43   : > { %434 = vst [vmem:[#allocation2 + $0xe8] sm:$0xff] %v1717_v32  ;;  %435 = vst [vmem:[#allocation2 + $0xb8] sm:$0xff] %v1717_v32 }
  0x44   : > { %436 = vst [vmem:[#allocation2 + $0x60] sm:$0xff] %v1717_v32  ;;  %437 = vst [vmem:[#allocation2 + $0xf0] sm:$0xff] %v1717_v32 }
  0x45   : > { %438 = vst [vmem:[#allocation2 + $0x8] sm:$0xff] %v1717_v32  ;;  %439 = vst [vmem:[#allocation2 + $0x78] sm:$0xff] %v1717_v32 }
  0x46   : > { %440 = vst [vmem:[#allocation2 + $0x38] sm:$0xff] %v1717_v32  ;;  %441 = vst [vmem:[#allocation2 + $0x58] sm:$0xff] %v1717_v32 }
  0x47   : > { %442 = vst [vmem:[#allocation2 + $0x40] sm:$0xff] %v1717_v32  ;;  %443 = vst [vmem:[#allocation2 + $0xc8] sm:$0xff] %v1717_v32 }
  0x48   : > { %444 = vst [vmem:[#allocation2 + $0xe0] sm:$0xff] %v1717_v32  ;;  %445 = vst [vmem:[#allocation2 + $0x90] sm:$0xff] %v1717_v32 }
  0x49   : > { %446 = vst [vmem:[#allocation2 + $0x70] sm:$0xff] %v1717_v32  ;;  %447 = vst [vmem:[#allocation2 + $0xc0] sm:$0xff] %v1717_v32 }
  0x4a   : > { %448 = vst [vmem:[#allocation2 + $0xa8] sm:$0xff] %v1717_v32  ;;  %449 = vst [vmem:[#allocation2 + $0xd0] sm:$0xff] %v1717_v32 }
  0x4b   : > { %450 = vst [vmem:[#allocation2 + $0x10] sm:$0xff] %v1717_v32  ;;  %451 = vst [vmem:[#allocation2 + $0x28] sm:$0xff] %v1717_v32 }
  0x4c   : > { %452 = vst [vmem:[#allocation2 + $0xa0] sm:$0xff] %v1717_v32  ;;  %453 = vst [vmem:[#allocation2 + $0xf8] sm:$0xff] %v1717_v32 }
  0x4d   : > { %454 = vst [vmem:[#allocation2 + $0x20] sm:$0xff] %v1717_v32  ;;  %455 = vst [vmem:[#allocation2 + $0x98] sm:$0xff] %v1717_v32 }
  0x4e PF: > { %v1637_v33 = vld [vmem:[%s1874_s24 + $0x38] sm:$0xff]   ;;  %v1638_v34 = vld [vmem:[%s1874_s24 + $0x30] sm:$0xff]   ;;  %v1639_v35 = vld [vmem:[%s1874_s24 + $0x28] sm:$0xff]   ;;  %p1328_p13 = scmp.ne.s32.totalorder %s1699_s14, 6 }
  0x4f   : > { %1515 = vmatprep.subr.bf16.mxu0 %v1637_v33  ;;  %1563 = vmatprep.subr.bf16.mxu1 %v1637_v33  ;;  %v1640_v36 = vld [vmem:[%s1874_s24 + $0x20] sm:$0xff]   ;;  %v1641_v39 = vld [vmem:[%s1874_s24 + $0x18] sm:$0xff]   ;;  %v1642_v40 = vld [vmem:[%s1874_s24 + $0x10] sm:$0xff]  }
  0x50   : > { %1516 = vmatpush3.bf16.msra.mxu0 %v1637_v33  ;;  %1571 = vmatpush3.bf16.msra.mxu1 %v1637_v33  ;;  %v1645_v37 = vld [vmem:[%s1881_s12] sm:$0xff]   ;;  %v1643_v41 = vld [vmem:[%s1874_s24 + $0x8] sm:$0xff]   ;;  %v1649_v45 = vld [vmem:[%s1881_s12 + $0x10] sm:$0xff]  }
  0x51   : > { %1517 = vmatprep.subr.bf16.mxu0 %v1638_v34  ;;  %1564 = vmatprep.subr.bf16.mxu1 %v1638_v34  ;;  %v1646_v38 = vld [vmem:[%s1881_s12 + $0x40] sm:$0xff]   ;;  %v1647_v43 = vld [vmem:[%s1881_s12 + $0x8] sm:$0xff]   ;;  %v1650_v46 = vld [vmem:[%s1881_s12 + $0x50] sm:$0xff]  }
  0x52   : > { %1531 = vmatprep.mubr.bf16.mxu0 %v1645_v37  ;;  %1547 = vmatprep.mubr.bf16.mxu1 %v1646_v38  ;;  %v1644_v42 = vld [vmem:[%s1874_s24] sm:$0xff]   ;;  %v1648_v44 = vld [vmem:[%s1881_s12 + $0x48] sm:$0xff]   ;;  %v1651_v47 = vld [vmem:[%s1881_s12 + $0x18] sm:$0xff]  }
  0x53   : > { %v1652_v48 = vld [vmem:[%s1881_s12 + $0x58] sm:$0xff]   ;;  %v1653_v49 = vld [vmem:[%s1881_s12 + $0x20] sm:$0xff]   ;;  %v1655_v51 = vld [vmem:[%s1881_s12 + $0x28] sm:$0xff]  }
  0x54   : > { %1518 = vmatpush3.bf16.msra.mxu0 %v1638_v34  ;;  %1572 = vmatpush3.bf16.msra.mxu1 %v1638_v34  ;;  %v1654_v50 = vld [vmem:[%s1881_s12 + $0x60] sm:$0xff]   ;;  %v1656_v52 = vld [vmem:[%s1881_s12 + $0x68] sm:$0xff]   ;;  %v1657_v53 = vld [vmem:[%s1881_s12 + $0x30] sm:$0xff]  }
  0x55   : > { %1519 = vmatprep.subr.bf16.mxu0 %v1639_v35  ;;  %1565 = vmatprep.subr.bf16.mxu1 %v1639_v35  ;;  %v1658_v54 = vld [vmem:[%s1881_s12 + $0x70] sm:$0xff]   ;;  %v1659_v55 = vld [vmem:[%s1881_s12 + $0x38] sm:$0xff]   ;;  %v474_v58 = vld [vmem:[#allocation2 + $0x40] sm:$0xff] }
  0x56   : > { %v1660_v56 = vld [vmem:[%s1881_s12 + $0x78] sm:$0xff]   ;;  %v456_v61 = vld [vmem:[#allocation2 + $0xb0] sm:$0xff]  ;;  %v475_v4 = vld [vmem:[#allocation2 + $0xc8] sm:$0xff] }
  0x57   : > { %v458_v57 = vld [vmem:[#allocation2 + $0xd8] sm:$0xff]  ;;  %v457_v9 = vld [vmem:[#allocation2] sm:$0xff]  ;;  %v462_v15 = vld [vmem:[#allocation2 + $0x30] sm:$0xff] }
  0x58   : > { %1520 = vmatpush3.bf16.msra.mxu0 %v1639_v35  ;;  %1573 = vmatpush3.bf16.msra.mxu1 %v1639_v35  ;;  %v472_v62 = vld [vmem:[#allocation2 + $0x38] sm:$0xff]  ;;  %v478_v16 = vld [vmem:[#allocation2 + $0x70] sm:$0xff]  ;;  %v476_v22 = vld [vmem:[#allocation2 + $0xe0] sm:$0xff] }
  0x59   : > { %1521 = vmatprep.subr.bf16.mxu0 %v1640_v36  ;;  %1566 = vmatprep.subr.bf16.mxu1 %v1640_v36  ;;  %v459_v3 = vld [vmem:[#allocation2 + $0x18] sm:$0xff]  ;;  %v460_v21 = vld [vmem:[#allocation2 + $0x50] sm:$0xff]  ;;  %v463_v27 = vld [vmem:[#allocation2 + $0x48] sm:$0xff] }
  0x5a   : > { %v473_v10 = vld [vmem:[#allocation2 + $0x58] sm:$0xff]  ;;  %v479_v28 = vld [vmem:[#allocation2 + $0xc0] sm:$0xff]  ;;  %v461_v33 = vld [vmem:[#allocation2 + $0x68] sm:$0xff] }
  0x5b   : > { %v477_v34 = vld [vmem:[#allocation2 + $0x90] sm:$0xff] }
  0x5c   : > { %1522 = vmatpush3.bf16.msra.mxu0 %v1640_v36  ;;  %1574 = vmatpush3.bf16.msra.mxu1 %v1640_v36 }
  0x5d   : > { %1523 = vmatprep.subr.bf16.mxu0 %v1641_v39  ;;  %1567 = vmatprep.subr.bf16.mxu1 %v1641_v39 }
  0x60   : > { %1524 = vmatpush3.bf16.msra.mxu0 %v1641_v39  ;;  %1575 = vmatpush3.bf16.msra.mxu1 %v1641_v39  ;;  %v466_v39 = vld [vmem:[#allocation2 + $0xe8] sm:$0xff] }
  0x61   : > { %1525 = vmatprep.subr.bf16.mxu0 %v1642_v40  ;;  %1568 = vmatprep.subr.bf16.mxu1 %v1642_v40 }
  0x64   : > { %1526 = vmatpush3.bf16.msra.mxu0 %v1642_v40  ;;  %1576 = vmatpush3.bf16.msra.mxu1 %v1642_v40  ;;  %v482_v40 = vld [vmem:[#allocation2 + $0x10] sm:$0xff] }
  0x65   : > { %1527 = vmatprep.subr.bf16.mxu0 %v1643_v41  ;;  %1569 = vmatprep.subr.bf16.mxu1 %v1643_v41 }
  0x68   : > { %1528 = vmatpush3.bf16.msra.mxu0 %v1643_v41  ;;  %1577 = vmatpush3.bf16.msra.mxu1 %v1643_v41 }
  0x69   : > { %1529 = vmatprep.subr.bf16.mxu0 %v1644_v42  ;;  %1570 = vmatprep.subr.bf16.mxu1 %v1644_v42 }
  0x6c   : > { %1530 = vmatpush3.bf16.msra.mxu0 %v1644_v42  ;;  %1578 = vmatpush3.bf16.msra.mxu1 %v1644_v42 }
  0x6f   : > { %1532 = vmatmul.mubr.bf16.vlgmr.msra.gmra.mxu0 %v1647_v43  ;;  %1548 = vmatmul.mubr.bf16.vlgmr.msra.gmra.mxu1 %v1648_v44 }
  0x70   : > { %1535 = vmatprep.mubr.bf16.mxu0 %v1649_v45  ;;  %1551 = vmatprep.mubr.bf16.mxu1 %v1650_v46  ;;  %v464_v45 = vld [vmem:[#allocation2 + $0x80] sm:$0xff]  ;;  %v480_v46 = vld [vmem:[#allocation2 + $0xa8] sm:$0xff] }
  0x77   : > { %1536 = vmatmul.mubr.bf16.gmra.mxu0 %v1651_v47  ;;  %1552 = vmatmul.mubr.bf16.gmra.mxu1 %v1652_v48 }
  0x78   : > { %1539 = vmatprep.mubr.bf16.mxu0 %v1653_v49  ;;  %1555 = vmatprep.mubr.bf16.mxu1 %v1654_v50 }
  0x7f   : > { %1540 = vmatmul.mubr.bf16.gmra.mxu0 %v1655_v51  ;;  %1556 = vmatmul.mubr.bf16.gmra.mxu1 %v1656_v52  ;;  %v467_v51 = vld [vmem:[#allocation2 + $0xb8] sm:$0xff]  ;;  %v483_v52 = vld [vmem:[#allocation2 + $0x28] sm:$0xff] }
  0x80   : > { %1543 = vmatprep.mubr.bf16.mxu0 %v1657_v53  ;;  %1559 = vmatprep.mubr.bf16.mxu1 %v1658_v54 }
  0x87   : > { %1544 = vmatmul.mubr.bf16.gmra.mxu0 %v1659_v55  ;;  %1560 = vmatmul.mubr.bf16.gmra.mxu1 %v1660_v56 }
 0x12f   : > { %v1533_v59 = vpop.f32.mrf.mxu0  ;;  %v1549_v60 = vpop.f32.mrf.mxu1 }
 0x130   : > { %v843_v63 = vadd.f32 %v1533_v59, %v458_v57  ;;  %v859_v0 = vadd.f32 %v1549_v60, %v474_v58  ;;  %v465_v57 = vld [vmem:[#allocation2 + $0x88] sm:$0xff]  ;;  %v481_v58 = vld [vmem:[#allocation2 + $0xd0] sm:$0xff] }
 0x131   : > { %v714_v1 = vpop.f32.mrf.mxu0  ;;  %v778_v2 = vpop.f32.mrf.mxu1 }
 0x132   : > { %875 = vst [vmem:[#allocation2 + $0xd8] sm:$0xff] %v843_v63  ;;  %891 = vst [vmem:[#allocation2 + $0x40] sm:$0xff] %v859_v0  ;;  %v841_v5 = vadd.f32 %v714_v1, %v456_v61  ;;  %v857_v6 = vadd.f32 %v778_v2, %v472_v62  ;;  %v470_v63 = vld [vmem:[#allocation2 + $0x8] sm:$0xff]  ;;  %v486_v0 = vld [vmem:[#allocation2 + $0x20] sm:$0xff] }
 0x133   : > { %v1534_v7 = vpop.f32.mrf.mxu0  ;;  %v1550_v8 = vpop.f32.mrf.mxu1 }
 0x134   : > { %873 = vst [vmem:[#allocation2 + $0xb0] sm:$0xff] %v841_v5  ;;  %889 = vst [vmem:[#allocation2 + $0x38] sm:$0xff] %v857_v6  ;;  %v844_v11 = vadd.f32 %v1534_v7, %v459_v3  ;;  %v860_v12 = vadd.f32 %v1550_v8, %v475_v4  ;;  %v468_v5 = vld [vmem:[#allocation2 + $0x60] sm:$0xff] }
 0x135   : > { %v717_v13 = vpop.f32.mrf.mxu0  ;;  %v781_v14 = vpop.f32.mrf.mxu1  ;;  %v484_v6 = vld [vmem:[#allocation2 + $0xa0] sm:$0xff] }
 0x136   : > { %876 = vst [vmem:[#allocation2 + $0x18] sm:$0xff] %v844_v11  ;;  %892 = vst [vmem:[#allocation2 + $0xc8] sm:$0xff] %v860_v12  ;;  %v842_v17 = vadd.f32 %v717_v13, %v457_v9  ;;  %v858_v18 = vadd.f32 %v781_v14, %v473_v10  ;;  %v471_v11 = vld [vmem:[#allocation2 + $0x78] sm:$0xff] }
 0x137   : > { %v1537_v19 = vpop.f32.mrf.mxu0  ;;  %v1553_v20 = vpop.f32.mrf.mxu1  ;;  %v487_v12 = vld [vmem:[#allocation2 + $0x98] sm:$0xff] }
 0x138   : > { %874 = vst [vmem:[#allocation2] sm:$0xff] %v842_v17  ;;  %890 = vst [vmem:[#allocation2 + $0x58] sm:$0xff] %v858_v18  ;;  %v847_v23 = vadd.f32 %v1537_v19, %v462_v15  ;;  %v863_v24 = vadd.f32 %v1553_v20, %v478_v16  ;;  %v469_v17 = vld [vmem:[#allocation2 + $0xf0] sm:$0xff]  ;;  %v485_v18 = vld [vmem:[#allocation2 + $0xf8] sm:$0xff] }
 0x139   : > { %v730_v25 = vpop.f32.mrf.mxu0  ;;  %v794_v26 = vpop.f32.mrf.mxu1 }
 0x13a   : > { %879 = vst [vmem:[#allocation2 + $0x30] sm:$0xff] %v847_v23  ;;  %895 = vst [vmem:[#allocation2 + $0x70] sm:$0xff] %v863_v24  ;;  %v845_v29 = vadd.f32 %v730_v25, %v460_v21  ;;  %v861_v30 = vadd.f32 %v794_v26, %v476_v22 }
 0x13b   : > { %v1538_v31 = vpop.f32.mrf.mxu0  ;;  %v1554_v32 = vpop.f32.mrf.mxu1 }
 0x13c   : > { %877 = vst [vmem:[#allocation2 + $0x50] sm:$0xff] %v845_v29  ;;  %893 = vst [vmem:[#allocation2 + $0xe0] sm:$0xff] %v861_v30  ;;  %v848_v35 = vadd.f32 %v1538_v31, %v463_v27  ;;  %v864_v36 = vadd.f32 %v1554_v32, %v479_v28 }
 0x13d   : > { %v733_v37 = vpop.f32.mrf.mxu0  ;;  %v797_v38 = vpop.f32.mrf.mxu1 }
 0x13e   : > { %880 = vst [vmem:[#allocation2 + $0x48] sm:$0xff] %v848_v35  ;;  %896 = vst [vmem:[#allocation2 + $0xc0] sm:$0xff] %v864_v36  ;;  %v846_v41 = vadd.f32 %v733_v37, %v461_v33  ;;  %v862_v42 = vadd.f32 %v797_v38, %v477_v34 }
 0x13f   : > { %v1541_v43 = vpop.f32.mrf.mxu0  ;;  %v1557_v44 = vpop.f32.mrf.mxu1 }
 0x140   : > { %878 = vst [vmem:[#allocation2 + $0x68] sm:$0xff] %v846_v41  ;;  %894 = vst [vmem:[#allocation2 + $0x90] sm:$0xff] %v862_v42  ;;  %v851_v47 = vadd.f32 %v1541_v43, %v466_v39  ;;  %v867_v48 = vadd.f32 %v1557_v44, %v482_v40 }
 0x141   : > { %v746_v49 = vpop.f32.mrf.mxu0  ;;  %v810_v50 = vpop.f32.mrf.mxu1 }
 0x142   : > { %883 = vst [vmem:[#allocation2 + $0xe8] sm:$0xff] %v851_v47  ;;  %899 = vst [vmem:[#allocation2 + $0x10] sm:$0xff] %v867_v48  ;;  %v849_v53 = vadd.f32 %v746_v49, %v464_v45  ;;  %v865_v54 = vadd.f32 %v810_v50, %v480_v46 }
 0x143   : > { %v1542_v55 = vpop.f32.mrf.mxu0  ;;  %v1558_v56 = vpop.f32.mrf.mxu1 }
 0x144   : > { %881 = vst [vmem:[#allocation2 + $0x80] sm:$0xff] %v849_v53  ;;  %897 = vst [vmem:[#allocation2 + $0xa8] sm:$0xff] %v865_v54  ;;  %v852_v59 = vadd.f32 %v1542_v55, %v467_v51  ;;  %v868_v60 = vadd.f32 %v1558_v56, %v483_v52 }
 0x145   : > { %v749_v61 = vpop.f32.mrf.mxu0  ;;  %v813_v62 = vpop.f32.mrf.mxu1 }
 0x146   : > { %884 = vst [vmem:[#allocation2 + $0xb8] sm:$0xff] %v852_v59  ;;  %900 = vst [vmem:[#allocation2 + $0x28] sm:$0xff] %v868_v60  ;;  %v850_v1 = vadd.f32 %v749_v61, %v465_v57  ;;  %v866_v2 = vadd.f32 %v813_v62, %v481_v58 }
 0x147   : > { %v1545_v3 = vpop.f32.mrf.mxu0  ;;  %v1561_v4 = vpop.f32.mrf.mxu1 }
 0x148   : > { %882 = vst [vmem:[#allocation2 + $0x88] sm:$0xff] %v850_v1  ;;  %898 = vst [vmem:[#allocation2 + $0xd0] sm:$0xff] %v866_v2  ;;  %v855_v7 = vadd.f32 %v1545_v3, %v470_v63  ;;  %v871_v8 = vadd.f32 %v1561_v4, %v486_v0 }
 0x149   : > { %v762_v9 = vpop.f32.mrf.mxu0  ;;  %v826_v10 = vpop.f32.mrf.mxu1 }
 0x14a   : > { %887 = vst [vmem:[#allocation2 + $0x8] sm:$0xff] %v855_v7  ;;  %903 = vst [vmem:[#allocation2 + $0x20] sm:$0xff] %v871_v8  ;;  %v853_v13 = vadd.f32 %v762_v9, %v468_v5  ;;  %v869_v14 = vadd.f32 %v826_v10, %v484_v6 }
 0x14b   : > { %v1546_v15 = vpop.f32.mrf.mxu0  ;;  %v1562_v16 = vpop.f32.mrf.mxu1 }
 0x14c   : > { %885 = vst [vmem:[#allocation2 + $0x60] sm:$0xff] %v853_v13  ;;  %901 = vst [vmem:[#allocation2 + $0xa0] sm:$0xff] %v869_v14  ;;  %v856_v19 = vadd.f32 %v1546_v15, %v471_v11  ;;  %v872_v20 = vadd.f32 %v1562_v16, %v487_v12  ;;  %908 = sbr.rel (%p1328_p13) target bundleno = 363 (0x16b), region = 81 }
 0x14d   : > { %v765_v21 = vpop.f32.mrf.mxu0  ;;  %v829_v22 = vpop.f32.mrf.mxu1 }
 0x14e   : > { %888 = vst [vmem:[#allocation2 + $0x78] sm:$0xff] %v856_v19  ;;  %904 = vst [vmem:[#allocation2 + $0x98] sm:$0xff] %v872_v20  ;;  %v854_v23 = vadd.f32 %v765_v21, %v469_v17  ;;  %v870_v24 = vadd.f32 %v829_v22, %v485_v18 }
 0x150   : > { %886 = vst [vmem:[#allocation2 + $0xf0] sm:$0xff] %v854_v23  ;;  %902 = vst [vmem:[#allocation2 + $0xf8] sm:$0xff] %v870_v24 }
 0x151   : > { %v909_v25 = vld [vmem:[#allocation2 + $0xb0] sm:$0xff]  ;;  %v910_v26 = vld [vmem:[#allocation2] sm:$0xff]  ;;  %v911_v30 = vld [vmem:[#allocation2 + $0xd8] sm:$0xff] }
 0x152   : > { %v1912_v27 = vld [vmem:[%s1985_s2] ss:$0 sm:$0xff]  ;;  %v912_v31 = vld [vmem:[#allocation2 + $0x18] sm:$0xff]  ;;  %v913_v32 = vld [vmem:[#allocation2 + $0x50] sm:$0xff] }
 0x153   : > { %v948_v28 = vadd.f32 %v1912_v27, %v909_v25  ;;  %v949_v29 = vadd.f32 %v1912_v27, %v910_v26  ;;  %v950_v33 = vadd.f32 %v1912_v27, %v911_v30  ;;  %v951_v34 = vadd.f32 %v1912_v27, %v912_v31  ;;  %v914_v35 = vld [vmem:[#allocation2 + $0x68] sm:$0xff]  ;;  %v915_v37 = vld [vmem:[#allocation2 + $0x30] sm:$0xff]  ;;  %v917_v43 = vld [vmem:[#allocation2 + $0x80] sm:$0xff] }
 0x154   : > { %v952_v36 = vadd.f32 %v1912_v27, %v913_v32  ;;  %v916_v38 = vld [vmem:[#allocation2 + $0x48] sm:$0xff]  ;;  %v953_v41 = vadd.f32 %v1912_v27, %v914_v35  ;;  %v954_v42 = vadd.f32 %v1912_v27, %v915_v37  ;;  %v920_v50 = vld [vmem:[#allocation2 + $0xb8] sm:$0xff]  ;;  %v921_v51 = vld [vmem:[#allocation2 + $0x60] sm:$0xff]  ;;  %v956_v55 = vadd.f32 %v1912_v27, %v917_v43 }
 0x155   : > { %v980_v39 = vmax.f32 %v948_v28, 0.0  ;;  %v981_v40 = vmax.f32 %v949_v29, 0.0  ;;  %v918_v44 = vld [vmem:[#allocation2 + $0x88] sm:$0xff]  ;;  %v982_v46 = vmax.f32 %v950_v33, 0.0  ;;  %v983_v47 = vmax.f32 %v951_v34, 0.0  ;;  %v924_v62 = vld [vmem:[#allocation2 + $0x78] sm:$0xff] }
 0x156   : > { %v919_v45 = vld [vmem:[#allocation2 + $0xe8] sm:$0xff]  ;;  %v984_v48 = vmax.f32 %v952_v36, 0.0  ;;  %v955_v49 = vadd.f32 %v1912_v27, %v916_v38  ;;  %v985_v53 = vmax.f32 %v953_v41, 0.0  ;;  %v986_v54 = vmax.f32 %v954_v42, 0.0  ;;  %v925_v3 = vld [vmem:[#allocation2 + $0x38] sm:$0xff]  ;;  %v927_v9 = vld [vmem:[#allocation2 + $0x40] sm:$0xff] }
 0x157   : > { %v1399_v52 = vpack.c.bf16 %v981_v40, %v980_v39  ;;  %v922_v56 = vld [vmem:[#allocation2 + $0xf0] sm:$0xff]  ;;  %v1404_v57 = vpack.c.bf16 %v983_v47, %v982_v46  ;;  %v957_v59 = vadd.f32 %v1912_v27, %v918_v44  ;;  %v958_v60 = vadd.f32 %v1912_v27, %v919_v45  ;;  %v923_v61 = vld [vmem:[#allocation2 + $0x8] sm:$0xff]  ;;  %v926_v4 = vld [vmem:[#allocation2 + $0x58] sm:$0xff] }
 0x158   : > { %v987_v58 = vmax.f32 %v955_v49, 0.0  ;;  %v1409_v63 = vpack.c.bf16 %v985_v53, %v984_v48  ;;  %v988_v0 = vmax.f32 %v956_v55, 0.0  ;;  %v959_v1 = vadd.f32 %v1912_v27, %v920_v50  ;;  %v928_v14 = vld [vmem:[#allocation2 + $0xc8] sm:$0xff]  ;;  %v929_v19 = vld [vmem:[#allocation2 + $0xe0] sm:$0xff]  ;;  %v930_v20 = vld [vmem:[#allocation2 + $0x90] sm:$0xff] }
 0x159   : > { %1400 = vst [vmem:[%s1879_s29] sm:$0xff] %v1399_v52   ;;  %v960_v2 = vadd.f32 %v1912_v27, %v921_v51  ;;  %1476 = vst [vmem:[%s1879_s29 + $0x8] sm:$0xff] %v1404_v57   ;;  %v989_v6 = vmax.f32 %v957_v59, 0.0  ;;  %v990_v7 = vmax.f32 %v958_v60, 0.0  ;;  %v961_v8 = vadd.f32 %v1912_v27, %v922_v56  ;;  %v931_v25 = vld [vmem:[#allocation2 + $0x70] sm:$0xff]  ;;  %v932_v26 = vld [vmem:[#allocation2 + $0xc0] sm:$0xff] }
 0x15a   : > { %v1414_v5 = vpack.c.bf16 %v987_v58, %v986_v54  ;;  %1477 = vst [vmem:[%s1879_s29 + $0x10] sm:$0xff] %v1409_v63   ;;  %v991_v10 = vmax.f32 %v959_v1, 0.0  ;;  %v962_v12 = vadd.f32 %v1912_v27, %v923_v61  ;;  %v963_v13 = vadd.f32 %v1912_v27, %v924_v62  ;;  %v933_v32 = vld [vmem:[#allocation2 + $0xa8] sm:$0xff]  ;;  %v934_v33 = vld [vmem:[#allocation2 + $0xd0] sm:$0xff]  ;;  %v937_v48 = vld [vmem:[#allocation2 + $0xa0] sm:$0xff] }
 0x15b   : > { %v992_v11 = vmax.f32 %v960_v2, 0.0  ;;  %v1419_v15 = vpack.c.bf16 %v989_v6, %v988_v0  ;;  %v993_v16 = vmax.f32 %v961_v8, 0.0  ;;  %v964_v17 = vadd.f32 %v1912_v27, %v925_v3  ;;  %v935_v38 = vld [vmem:[#allocation2 + $0x10] sm:$0xff]  ;;  %v936_v43 = vld [vmem:[#allocation2 + $0x28] sm:$0xff]  ;;  %v938_v49 = vld [vmem:[#allocation2 + $0xf8] sm:$0xff] }
 0x15c   : > { %1478 = vst [vmem:[%s1879_s29 + $0x18] sm:$0xff] %v1414_v5   ;;  %v965_v18 = vadd.f32 %v1912_v27, %v926_v4  ;;  %v1424_v21 = vpack.c.bf16 %v991_v10, %v990_v7  ;;  %v994_v22 = vmax.f32 %v962_v12, 0.0  ;;  %v995_v23 = vmax.f32 %v963_v13, 0.0  ;;  %v939_v54 = vld [vmem:[#allocation2 + $0x20] sm:$0xff]  ;;  %v940_v55 = vld [vmem:[#allocation2 + $0x98] sm:$0xff] }
 0x15d   : > { %v966_v24 = vadd.f32 %v1912_v27, %v927_v9  ;;  %1479 = vst [vmem:[%s1879_s29 + $0x20] sm:$0xff] %v1419_v15   ;;  %v1429_v28 = vpack.c.bf16 %v993_v16, %v992_v11  ;;  %v996_v29 = vmax.f32 %v964_v17, 0.0  ;;  %v967_v31 = vadd.f32 %v1912_v27, %v928_v14 }
 0x15e   : > { %v997_v30 = vmax.f32 %v965_v18, 0.0  ;;  %1480 = vst [vmem:[%s1879_s29 + $0x28] sm:$0xff] %v1424_v21   ;;  %v1434_v34 = vpack.c.bf16 %v995_v23, %v994_v22  ;;  %v968_v36 = vadd.f32 %v1912_v27, %v929_v19  ;;  %v969_v37 = vadd.f32 %v1912_v27, %v930_v20 }
 0x15f   : > { %v998_v35 = vmax.f32 %v966_v24, 0.0  ;;  %1481 = vst [vmem:[%s1879_s29 + $0x30] sm:$0xff] %v1429_v28   ;;  %v999_v40 = vmax.f32 %v967_v31, 0.0  ;;  %v970_v41 = vadd.f32 %v1912_v27, %v931_v25  ;;  %v971_v42 = vadd.f32 %v1912_v27, %v932_v26 }
 0x160   : > { %v1439_v39 = vpack.c.bf16 %v997_v30, %v996_v29  ;;  %1482 = vst [vmem:[%s1879_s29 + $0x38] sm:$0xff] %v1434_v34   ;;  %v1000_v44 = vmax.f32 %v968_v36, 0.0  ;;  %v1001_v45 = vmax.f32 %v969_v37, 0.0  ;;  %v972_v46 = vadd.f32 %v1912_v27, %v933_v32 }
 0x161   : > { %v973_v47 = vadd.f32 %v1912_v27, %v934_v33  ;;  %v1444_v50 = vpack.c.bf16 %v999_v40, %v998_v35  ;;  %v1002_v51 = vmax.f32 %v970_v41, 0.0  ;;  %v1003_v52 = vmax.f32 %v971_v42, 0.0 }
 0x162   : > { %1483 = vst [vmem:[%s1879_s29 + $0x40] sm:$0xff] %v1439_v39   ;;  %v974_v53 = vadd.f32 %v1912_v27, %v935_v38  ;;  %v1449_v56 = vpack.c.bf16 %v1001_v45, %v1000_v44  ;;  %v1004_v57 = vmax.f32 %v972_v46, 0.0  ;;  %v975_v59 = vadd.f32 %v1912_v27, %v936_v43 }
 0x163   : > { %v1005_v58 = vmax.f32 %v973_v47, 0.0  ;;  %1484 = vst [vmem:[%s1879_s29 + $0x48] sm:$0xff] %v1444_v50   ;;  %v1454_v60 = vpack.c.bf16 %v1003_v52, %v1002_v51  ;;  %v976_v62 = vadd.f32 %v1912_v27, %v937_v48  ;;  %v977_v63 = vadd.f32 %v1912_v27, %v938_v49 }
 0x164   : > { %v1006_v61 = vmax.f32 %v974_v53, 0.0  ;;  %1485 = vst [vmem:[%s1879_s29 + $0x50] sm:$0xff] %v1449_v56   ;;  %v1007_v1 = vmax.f32 %v975_v59, 0.0  ;;  %v978_v2 = vadd.f32 %v1912_v27, %v939_v54  ;;  %v979_v3 = vadd.f32 %v1912_v27, %v940_v55 }
 0x165   : > { %v1459_v0 = vpack.c.bf16 %v1005_v58, %v1004_v57  ;;  %1486 = vst [vmem:[%s1879_s29 + $0x58] sm:$0xff] %v1454_v60   ;;  %v1008_v4 = vmax.f32 %v976_v62, 0.0  ;;  %v1009_v5 = vmax.f32 %v977_v63, 0.0 }
 0x166   : > { %v1464_v6 = vpack.c.bf16 %v1007_v1, %v1006_v61  ;;  %v1010_v7 = vmax.f32 %v978_v2, 0.0  ;;  %v1011_v8 = vmax.f32 %v979_v3, 0.0 }
 0x167   : > { %1487 = vst [vmem:[%s1879_s29 + $0x60] sm:$0xff] %v1459_v0   ;;  %v1469_v9 = vpack.c.bf16 %v1009_v5, %v1008_v4 }
 0x168   : > { %1488 = vst [vmem:[%s1879_s29 + $0x68] sm:$0xff] %v1464_v6   ;;  %v1474_v10 = vpack.c.bf16 %v1011_v8, %v1010_v7 }
 0x169   : > { %1489 = vst [vmem:[%s1879_s29 + $0x70] sm:$0xff] %v1469_v9  }
 0x16a   : > { %1490 = vst [vmem:[%s1879_s29 + $0x78] sm:$0xff] %v1474_v10  }
 0x16b PF: > { %s13_s18 = sadd.s32 1, %s1715_s18   ;;  %s1987_s12 = smov %s1695_s13 }
 0x16c   : > { %p10_p0 = scmp.ge.s32.totalorder %s13_s18, 16   ;;  %s1988_s13 = smov %s1789_s25 }
 0x16d   : > { %s1989_s14 = smov %s1707_s16  ;;  %s1990_s15 = smov %s1711_s17 }
 0x16e   : > { %s1991_s16 = smov %s1994_s19  ;;  %s1992_s17 = smov %s1998_s20 }
 0x16f   :  { %12 = sbr.rel (!%p10_p0) target bundleno = 4 (0x4), region = 122 }

// kernel: eco_forward.7
= control target key start
LH: loop header
LB: loop body
LE: loop exit
PB: predicated region body
PF: predicated region fallthrough
CT: control target
= control target key end

     0   :  { %v393_v0 = vmov 0.0   ;;  %vm218_vm0 = vcmask 1041409   ;;  %s503_s0 = inlined_call_operand.vmem [shape: bf16[2,256,128], index: 0, kind: input, shape index: {}]   ;;  %s504_s1 = inlined_call_operand.vmem [shape: f32[2,128], index: 1, kind: output, shape index: {}]  }
   0x1   :  { %12 = vst [vmem:[#allocation2] sm:$0x3] %v393_v0  ;;  %v234_v1 = vld [vmem:[%s503_s0] sm:$0xff]   ;;  %v361_v3 = vld [vmem:[%s503_s0 + $0x8] sm:$0xff]   ;;  %v362_v11 = vld [vmem:[%s503_s0 + $0x10] sm:$0xff]  }
   0x2   :  { %v376_v2 = vld [vmem:[%s503_s0 + $0x80] sm:$0xff]   ;;  %v377_v4 = vld [vmem:[%s503_s0 + $0x88] sm:$0xff]   ;;  %v235_v5 = vunpack.c.l.bf16 %v234_v1  ;;  %v236_v6 = vunpack.c.h.bf16 %v234_v1  ;;  %v239_v9 = vunpack.c.l.bf16 %v361_v3  ;;  %v378_v12 = vld [vmem:[%s503_s0 + $0x90] sm:$0xff]   ;;  %v240_v13 = vunpack.c.h.bf16 %v361_v3 }
   0x3   :  { %v299_v7 = vunpack.c.l.bf16 %v376_v2  ;;  %v300_v8 = vunpack.c.h.bf16 %v376_v2  ;;  %v303_v10 = vunpack.c.l.bf16 %v377_v4  ;;  %v304_v14 = vunpack.c.h.bf16 %v377_v4  ;;  %v363_v21 = vld [vmem:[%s503_s0 + $0x18] sm:$0xff]   ;;  %v364_v31 = vld [vmem:[%s503_s0 + $0x20] sm:$0xff]   ;;  %v365_v41 = vld [vmem:[%s503_s0 + $0x28] sm:$0xff]  }
   0x4   :  { %v142_v15 = vadd.f32 %v236_v6, %v235_v5  ;;  %v243_v17 = vunpack.c.l.bf16 %v362_v11  ;;  %v307_v18 = vunpack.c.l.bf16 %v378_v12  ;;  %v379_v22 = vld [vmem:[%s503_s0 + $0x98] sm:$0xff]   ;;  %v244_v23 = vunpack.c.h.bf16 %v362_v11  ;;  %v380_v32 = vld [vmem:[%s503_s0 + $0xa0] sm:$0xff]   ;;  %v381_v42 = vld [vmem:[%s503_s0 + $0xa8] sm:$0xff]  }
   0x5   :  { %v179_v16 = vadd.f32 %v300_v8, %v299_v7  ;;  %v308_v24 = vunpack.c.h.bf16 %v378_v12  ;;  %v247_v27 = vunpack.c.l.bf16 %v363_v21  ;;  %v311_v28 = vunpack.c.l.bf16 %v379_v22  ;;  %v366_v51 = vld [vmem:[%s503_s0 + $0x30] sm:$0xff]   ;;  %v367_v61 = vld [vmem:[%s503_s0 + $0x38] sm:$0xff]   ;;  %v368_v7 = vld [vmem:[%s503_s0 + $0x40] sm:$0xff]  }
   0x6   :  { %v143_v19 = vadd.f32 %v239_v9, %v142_v15  ;;  %v248_v33 = vunpack.c.h.bf16 %v363_v21  ;;  %v312_v34 = vunpack.c.h.bf16 %v379_v22  ;;  %v251_v37 = vunpack.c.l.bf16 %v364_v31  ;;  %v382_v52 = vld [vmem:[%s503_s0 + $0xb0] sm:$0xff]   ;;  %v383_v62 = vld [vmem:[%s503_s0 + $0xb8] sm:$0xff]   ;;  %v384_v8 = vld [vmem:[%s503_s0 + $0xc0] sm:$0xff]  }
   0x7   :  { %v180_v20 = vadd.f32 %v303_v10, %v179_v16  ;;  %v315_v38 = vunpack.c.l.bf16 %v380_v32  ;;  %v252_v43 = vunpack.c.h.bf16 %v364_v31  ;;  %v316_v44 = vunpack.c.h.bf16 %v380_v32 }
   0x8   :  { %v144_v25 = vadd.f32 %v240_v13, %v143_v19  ;;  %v255_v47 = vunpack.c.l.bf16 %v365_v41  ;;  %v319_v48 = vunpack.c.l.bf16 %v381_v42  ;;  %v256_v53 = vunpack.c.h.bf16 %v365_v41 }
   0x9   :  { %v181_v26 = vadd.f32 %v304_v14, %v180_v20  ;;  %v320_v54 = vunpack.c.h.bf16 %v381_v42  ;;  %v259_v57 = vunpack.c.l.bf16 %v366_v51  ;;  %v323_v58 = vunpack.c.l.bf16 %v382_v52 }
   0xa   :  { %v145_v29 = vadd.f32 %v243_v17, %v144_v25  ;;  %v260_v63 = vunpack.c.h.bf16 %v366_v51  ;;  %v324_v0 = vunpack.c.h.bf16 %v382_v52  ;;  %v263_v3 = vunpack.c.l.bf16 %v367_v61  ;;  %v369_v17 = vld [vmem:[%s503_s0 + $0x48] sm:$0xff]  }
   0xb   :  { %v182_v30 = vadd.f32 %v307_v18, %v181_v26  ;;  %v327_v4 = vunpack.c.l.bf16 %v383_v62  ;;  %v264_v9 = vunpack.c.h.bf16 %v367_v61  ;;  %v328_v10 = vunpack.c.h.bf16 %v383_v62  ;;  %v385_v18 = vld [vmem:[%s503_s0 + $0xc8] sm:$0xff]  }
   0xc   :  { %v146_v35 = vadd.f32 %v244_v23, %v145_v29  ;;  %v267_v13 = vunpack.c.l.bf16 %v368_v7  ;;  %v331_v14 = vunpack.c.l.bf16 %v384_v8  ;;  %v268_v19 = vunpack.c.h.bf16 %v368_v7 }
   0xd   :  { %v183_v36 = vadd.f32 %v308_v24, %v182_v30  ;;  %v332_v20 = vunpack.c.h.bf16 %v384_v8  ;;  %v271_v23 = vunpack.c.l.bf16 %v369_v17  ;;  %v335_v24 = vunpack.c.l.bf16 %v385_v18 }
   0xe   :  { %v147_v39 = vadd.f32 %v247_v27, %v146_v35  ;;  %v370_v27 = vld [vmem:[%s503_s0 + $0x50] sm:$0xff]   ;;  %v272_v29 = vunpack.c.h.bf16 %v369_v17  ;;  %v336_v30 = vunpack.c.h.bf16 %v385_v18 }
   0xf   :  { %v184_v40 = vadd.f32 %v311_v28, %v183_v36  ;;  %v386_v28 = vld [vmem:[%s503_s0 + $0xd0] sm:$0xff]  }
  0x10   :  { %v148_v45 = vadd.f32 %v248_v33, %v147_v39  ;;  %v275_v33 = vunpack.c.l.bf16 %v370_v27  ;;  %v276_v39 = vunpack.c.h.bf16 %v370_v27 }
  0x11   :  { %v185_v46 = vadd.f32 %v312_v34, %v184_v40  ;;  %v339_v34 = vunpack.c.l.bf16 %v386_v28  ;;  %v340_v40 = vunpack.c.h.bf16 %v386_v28 }
  0x12   :  { %v149_v49 = vadd.f32 %v251_v37, %v148_v45  ;;  %v371_v37 = vld [vmem:[%s503_s0 + $0x58] sm:$0xff]  }
  0x13   :  { %v186_v50 = vadd.f32 %v315_v38, %v185_v46  ;;  %v387_v38 = vld [vmem:[%s503_s0 + $0xd8] sm:$0xff]  }
  0x14   :  { %v150_v55 = vadd.f32 %v252_v43, %v149_v49  ;;  %v279_v43 = vunpack.c.l.bf16 %v371_v37  ;;  %v280_v49 = vunpack.c.h.bf16 %v371_v37 }
  0x15   :  { %v187_v56 = vadd.f32 %v316_v44, %v186_v50  ;;  %v343_v44 = vunpack.c.l.bf16 %v387_v38  ;;  %v344_v50 = vunpack.c.h.bf16 %v387_v38 }
  0x16   :  { %v151_v59 = vadd.f32 %v255_v47, %v150_v55  ;;  %v372_v47 = vld [vmem:[%s503_s0 + $0x60] sm:$0xff]  }
  0x17   :  { %v188_v60 = vadd.f32 %v319_v48, %v187_v56  ;;  %v388_v48 = vld [vmem:[%s503_s0 + $0xe0] sm:$0xff]  }
  0x18   :  { %v152_v1 = vadd.f32 %v256_v53, %v151_v59  ;;  %v283_v53 = vunpack.c.l.bf16 %v372_v47  ;;  %v284_v59 = vunpack.c.h.bf16 %v372_v47 }
  0x19   :  { %v189_v2 = vadd.f32 %v320_v54, %v188_v60  ;;  %v347_v54 = vunpack.c.l.bf16 %v388_v48  ;;  %v348_v60 = vunpack.c.h.bf16 %v388_v48 }
  0x1a   :  { %v153_v5 = vadd.f32 %v259_v57, %v152_v1  ;;  %v373_v57 = vld [vmem:[%s503_s0 + $0x68] sm:$0xff]  }
  0x1b   :  { %v190_v6 = vadd.f32 %v323_v58, %v189_v2  ;;  %v389_v58 = vld [vmem:[%s503_s0 + $0xe8] sm:$0xff]  }
  0x1c   :  { %v154_v11 = vadd.f32 %v260_v63, %v153_v5  ;;  %v287_v63 = vunpack.c.l.bf16 %v373_v57  ;;  %v288_v5 = vunpack.c.h.bf16 %v373_v57 }
  0x1d   :  { %v191_v12 = vadd.f32 %v324_v0, %v190_v6  ;;  %v351_v0 = vunpack.c.l.bf16 %v389_v58  ;;  %v352_v6 = vunpack.c.h.bf16 %v389_v58 }
  0x1e   :  { %v155_v15 = vadd.f32 %v263_v3, %v154_v11  ;;  %v374_v3 = vld [vmem:[%s503_s0 + $0x70] sm:$0xff]  }
  0x1f   :  { %v192_v16 = vadd.f32 %v327_v4, %v191_v12  ;;  %v390_v4 = vld [vmem:[%s503_s0 + $0xf0] sm:$0xff]  }
  0x20   :  { %v156_v21 = vadd.f32 %v264_v9, %v155_v15  ;;  %v291_v9 = vunpack.c.l.bf16 %v374_v3  ;;  %v292_v15 = vunpack.c.h.bf16 %v374_v3 }
  0x21   :  { %v193_v22 = vadd.f32 %v328_v10, %v192_v16  ;;  %v355_v10 = vunpack.c.l.bf16 %v390_v4  ;;  %v356_v16 = vunpack.c.h.bf16 %v390_v4 }
  0x22   :  { %v157_v25 = vadd.f32 %v267_v13, %v156_v21  ;;  %v375_v13 = vld [vmem:[%s503_s0 + $0x78] sm:$0xff]  }
  0x23   :  { %v194_v26 = vadd.f32 %v331_v14, %v193_v22  ;;  %v391_v14 = vld [vmem:[%s503_s0 + $0xf8] sm:$0xff]  }
  0x24   :  { %v158_v31 = vadd.f32 %v268_v19, %v157_v25  ;;  %v295_v19 = vunpack.c.l.bf16 %v375_v13 }
  0x25   :  { %v195_v32 = vadd.f32 %v332_v20, %v194_v26  ;;  %v359_v20 = vunpack.c.l.bf16 %v391_v14 }
  0x26   :  { %v159_v35 = vadd.f32 %v271_v23, %v158_v31  ;;  %v296_v23 = vunpack.c.h.bf16 %v375_v13 }
  0x27   :  { %v196_v36 = vadd.f32 %v335_v24, %v195_v32  ;;  %v360_v24 = vunpack.c.h.bf16 %v391_v14 }
  0x28   :  { %v160_v41 = vadd.f32 %v272_v29, %v159_v35 }
  0x29   :  { %v197_v42 = vadd.f32 %v336_v30, %v196_v36 }
  0x2a   :  { %v161_v45 = vadd.f32 %v275_v33, %v160_v41  ;;  %v13_v41 = vld [vmem:[#allocation2] sm:$0x3] }
  0x2b   :  { %v198_v46 = vadd.f32 %v339_v34, %v197_v42 }
  0x2c   :  { %v162_v51 = vadd.f32 %v276_v39, %v161_v45 }
  0x2d   :  { %v199_v52 = vadd.f32 %v340_v40, %v198_v46 }
  0x2e   :  { %v163_v55 = vadd.f32 %v279_v43, %v162_v51 }
  0x2f   :  { %v200_v56 = vadd.f32 %v343_v44, %v199_v52 }
  0x30   :  { %v164_v61 = vadd.f32 %v280_v49, %v163_v55 }
  0x31   :  { %v201_v62 = vadd.f32 %v344_v50, %v200_v56 }
  0x32   :  { %v165_v1 = vadd.f32 %v283_v53, %v164_v61 }
  0x33   :  { %v202_v2 = vadd.f32 %v347_v54, %v201_v62 }
  0x34   :  { %v166_v7 = vadd.f32 %v284_v59, %v165_v1 }
  0x35   :  { %v203_v8 = vadd.f32 %v348_v60, %v202_v2 }
  0x36   :  { %v167_v11 = vadd.f32 %v287_v63, %v166_v7 }
  0x37   :  { %v204_v12 = vadd.f32 %v351_v0, %v203_v8 }
  0x38   :  { %v168_v17 = vadd.f32 %v288_v5, %v167_v11 }
  0x39   :  { %v205_v18 = vadd.f32 %v352_v6, %v204_v12 }
  0x3a   :  { %v169_v21 = vadd.f32 %v291_v9, %v168_v17 }
  0x3b   :  { %v206_v22 = vadd.f32 %v355_v10, %v205_v18 }
  0x3c   :  { %v170_v25 = vadd.f32 %v292_v15, %v169_v21 }
  0x3d   :  { %v207_v26 = vadd.f32 %v356_v16, %v206_v22 }
  0x3e   :  { %v171_v27 = vadd.f32 %v295_v19, %v170_v25 }
  0x3f   :  { %v208_v28 = vadd.f32 %v359_v20, %v207_v26 }
  0x40   :  { %v172_v29 = vadd.f32 %v296_v23, %v171_v27 }
  0x41   :  { %v209_v30 = vadd.f32 %v360_v24, %v208_v28 }
  0x42   :  { %v173_v31 = vrot.slane %v172_v29, 4 }
  0x43   :  { %v210_v32 = vrot.slane %v209_v30, 4 }
  0x44   :  { %v174_v33 = vadd.f32 %v173_v31, %v172_v29 }
  0x45   :  { %v211_v34 = vadd.f32 %v210_v32, %v209_v30 }
  0x46   :  { %v175_v35 = vrot.slane %v174_v33, 2 }
  0x47   :  { %v212_v36 = vrot.slane %v211_v34, 2 }
  0x48   :  { %v176_v37 = vadd.f32 %v175_v35, %v174_v33 }
  0x49   :  { %v213_v38 = vadd.f32 %v212_v36, %v211_v34 }
  0x4a   :  { %v177_v39 = vrot.slane %v176_v37, 1 }
  0x4b   :  { %v214_v40 = vrot.slane %v213_v38, 1 }
  0x4c   :  { %v178_v42 = vadd.f32 %v177_v39, %v176_v37 }
  0x4d   :  { %v215_v43 = vadd.f32 %v214_v40, %v213_v38 }
  0x4f   :  { %v219_v44 = vsel %vm218_vm0, %v215_v43, %v178_v42 }
  0x50   :  { %v221_v45 = vadd.f32 %v219_v44, %v13_v41 }
  0x52   :  { %222 = vst [vmem:[#allocation2] sm:$0x3] %v221_v45 }
  0x59   :  { %v226_v46 = vld [vmem:[#allocation2] sm:$0x3] }
  0x5a   :  { %v227_v47 = vmul.f32 0.00390625, %v226_v46 }
  0x5c   :  { %228 = vst [vmem:[%s504_s1] sm:$0x3] %v227_v47 }

// kernel: eco_forward.8
= control target key start
LH: loop header
LB: loop body
LE: loop exit
PB: predicated region body
PF: predicated region fallthrough
CT: control target
= control target key end

     0   :  { %s1827_s12 = smov 0   ;;  %s1829_s13 = smov 0   ;;  %s2317_s0 = inlined_call_operand.vmem [shape: bf16[128,128], index: 0, kind: input, shape index: {}]   ;;  %s2318_s1 = inlined_call_operand.vmem [shape: bf16[128,4096], index: 1, kind: input, shape index: {}]   ;;  %s2319_s2 = inlined_call_operand.vmem [shape: f32[1,4096], index: 2, kind: input, shape index: {}]   ;;  %s2320_s3 = inlined_call_operand.vmem [shape: f32[128,4096], index: 3, kind: output, shape index: {}]  }
   0x1   :  { %s1831_s14 = smov 0   ;;  %s1833_s15 = smov 0  }
   0x2   :  { %s1835_s16 = smov 0  }
   0x3 LB: > { %s28_s17 = sadd.s32 1, %s1800_s15  ;;  %s1610_s18 = sadd.s32 4294967295, %s1804_s16   ;;  %s1804_s16 = sphi %s1835_s16, %s13_s16   ;;  %s1800_s15 = sphi %s1833_s15, %s2325_s15   ;;  %s1796_s14 = sphi %s1831_s14, %s2324_s14   ;;  %s1792_s13 = sphi %s1829_s13, %s2323_s13   ;;  %s1788_s12 = sphi %s1827_s12, %s2322_s12  }
   0x4   : > { %p30_p0 = scmp.ge.s32.totalorder %s28_s17, 8  ;;  %p76_p1 = scmp.ne.s32.totalorder %s1792_s13, %s1788_s12 }
   0x5   : > { %p77_p2 = scmp.eq.s32.totalorder %s1804_s16, 0  ;;  %p134_p4 = scmp.eq.s32.totalorder %s1610_s18, 7 }
   0x6   : > { %s2327_s17 = smov (%p30_p0, %s28_s17), 0  ;;  %s69_s20 = sadd.s32 1, %s1792_s13 }
   0x7   : > { %p78_p3 = por %p77_p2, %p76_p1  ;;  %s65_s19 = ssub.s32 %s1800_s15, %s2327_s17 }
   0x8   : > { %p67_p5 = scmp.eq.s32.totalorder %s65_s19, 0  ;;  %p1862_p6 = por %p134_p4, %p76_p1 }
   0x9   : > { %p1614_p7 = scmp.ge.s32.totalorder %s1804_s16, 8 }
   0xa   : > { %s1867_s22 = scalar_select %p67_p5, %s1792_s13, %s69_s20  }
   0xb   : > { %168 = sbr.rel (%p1614_p7) target bundleno = 36 (0x24), region = 20 }
  0x10   : > { %171 = sbr.rel (!%p78_p3) target bundleno = 36 (0x24), region = 24  ;;  %s173_s23 = sand.u32 (%p78_p3), 1, %s1792_s13  }
  0x11   : > { %s1667_s24 = sshll.u32 (%p78_p3), %s1800_s15, 4  ;;  %s1615_s25 = sshll.u32 (%p78_p3), %s173_s23, 8 }
  0x12   : > { %s1875_s28 = scalar_lea.vmem (%p78_p3), %s2318_s1, %s1667_s24  ;;  %s1880_s29 = scalar_lea.vmem (%p78_p3), [#allocation3], %s1615_s25 }
  0x13   : > { %v194_v0 = vld [vmem:[%s1875_s28] sm:$0xff] (%p78_p3)  ;;  %v196_v1 = vld [vmem:[%s1875_s28 + $0x8] sm:$0xff] (%p78_p3) }
  0x14   : > { %v198_v2 = vld [vmem:[%s1875_s28 + $0x80] sm:$0xff] (%p78_p3)  ;;  %195 = vst [vmem:[%s1880_s29] sm:$0xff] (%p78_p3), %v194_v0  ;;  %197 = vst [vmem:[%s1880_s29 + $0x8] sm:$0xff] (%p78_p3), %v196_v1  ;;  %v200_v3 = vld [vmem:[%s1875_s28 + $0x88] sm:$0xff] (%p78_p3) }
  0x15   : > { %199 = vst [vmem:[%s1880_s29 + $0x10] sm:$0xff] %v198_v2  ;;  %v202_v4 = vld [vmem:[%s1875_s28 + $0x100] sm:$0xff]  ;;  %v204_v5 = vld [vmem:[%s1875_s28 + $0x108] sm:$0xff]  ;;  %201 = vst [vmem:[%s1880_s29 + $0x18] sm:$0xff] %v200_v3 }
  0x16   : > { %203 = vst [vmem:[%s1880_s29 + $0x20] sm:$0xff] %v202_v4  ;;  %205 = vst [vmem:[%s1880_s29 + $0x28] sm:$0xff] %v204_v5  ;;  %v206_v6 = vld [vmem:[%s1875_s28 + $0x180] sm:$0xff]  ;;  %v208_v7 = vld [vmem:[%s1875_s28 + $0x188] sm:$0xff] }
  0x17   : > { %v210_v8 = vld [vmem:[%s1875_s28 + $0x200] sm:$0xff]  ;;  %207 = vst [vmem:[%s1880_s29 + $0x30] sm:$0xff] %v206_v6  ;;  %209 = vst [vmem:[%s1880_s29 + $0x38] sm:$0xff] %v208_v7  ;;  %v212_v9 = vld [vmem:[%s1875_s28 + $0x208] sm:$0xff] }
  0x18   : > { %211 = vst [vmem:[%s1880_s29 + $0x40] sm:$0xff] %v210_v8  ;;  %v214_v10 = vld [vmem:[%s1875_s28 + $0x280] sm:$0xff]  ;;  %v216_v11 = vld [vmem:[%s1875_s28 + $0x288] sm:$0xff]  ;;  %213 = vst [vmem:[%s1880_s29 + $0x48] sm:$0xff] %v212_v9 }
  0x19   : > { %215 = vst [vmem:[%s1880_s29 + $0x50] sm:$0xff] %v214_v10  ;;  %217 = vst [vmem:[%s1880_s29 + $0x58] sm:$0xff] %v216_v11  ;;  %v218_v12 = vld [vmem:[%s1875_s28 + $0x300] sm:$0xff]  ;;  %v220_v13 = vld [vmem:[%s1875_s28 + $0x308] sm:$0xff] }
  0x1a   : > { %v222_v14 = vld [vmem:[%s1875_s28 + $0x380] sm:$0xff]  ;;  %219 = vst [vmem:[%s1880_s29 + $0x60] sm:$0xff] %v218_v12  ;;  %221 = vst [vmem:[%s1880_s29 + $0x68] sm:$0xff] %v220_v13  ;;  %v224_v15 = vld [vmem:[%s1875_s28 + $0x388] sm:$0xff] }
  0x1b   : > { %223 = vst [vmem:[%s1880_s29 + $0x70] sm:$0xff] %v222_v14  ;;  %v226_v16 = vld [vmem:[%s1875_s28 + $0x400] sm:$0xff]  ;;  %v228_v17 = vld [vmem:[%s1875_s28 + $0x408] sm:$0xff]  ;;  %225 = vst [vmem:[%s1880_s29 + $0x78] sm:$0xff] %v224_v15 }
  0x1c   : > { %227 = vst [vmem:[%s1880_s29 + $0x80] sm:$0xff] %v226_v16  ;;  %229 = vst [vmem:[%s1880_s29 + $0x88] sm:$0xff] %v228_v17  ;;  %v230_v18 = vld [vmem:[%s1875_s28 + $0x480] sm:$0xff]  ;;  %v232_v19 = vld [vmem:[%s1875_s28 + $0x488] sm:$0xff] }
  0x1d   : > { %v234_v20 = vld [vmem:[%s1875_s28 + $0x500] sm:$0xff]  ;;  %231 = vst [vmem:[%s1880_s29 + $0x90] sm:$0xff] %v230_v18  ;;  %233 = vst [vmem:[%s1880_s29 + $0x98] sm:$0xff] %v232_v19  ;;  %v236_v21 = vld [vmem:[%s1875_s28 + $0x508] sm:$0xff] }
  0x1e   : > { %235 = vst [vmem:[%s1880_s29 + $0xa0] sm:$0xff] %v234_v20  ;;  %v238_v22 = vld [vmem:[%s1875_s28 + $0x580] sm:$0xff]  ;;  %v240_v23 = vld [vmem:[%s1875_s28 + $0x588] sm:$0xff]  ;;  %237 = vst [vmem:[%s1880_s29 + $0xa8] sm:$0xff] %v236_v21 }
  0x1f   : > { %239 = vst [vmem:[%s1880_s29 + $0xb0] sm:$0xff] %v238_v22  ;;  %241 = vst [vmem:[%s1880_s29 + $0xb8] sm:$0xff] %v240_v23  ;;  %v242_v24 = vld [vmem:[%s1875_s28 + $0x600] sm:$0xff]  ;;  %v244_v25 = vld [vmem:[%s1875_s28 + $0x608] sm:$0xff] }
  0x20   : > { %v246_v26 = vld [vmem:[%s1875_s28 + $0x680] sm:$0xff]  ;;  %243 = vst [vmem:[%s1880_s29 + $0xc0] sm:$0xff] %v242_v24  ;;  %245 = vst [vmem:[%s1880_s29 + $0xc8] sm:$0xff] %v244_v25  ;;  %v248_v27 = vld [vmem:[%s1875_s28 + $0x688] sm:$0xff] }
  0x21   : > { %247 = vst [vmem:[%s1880_s29 + $0xd0] sm:$0xff] %v246_v26  ;;  %v250_v28 = vld [vmem:[%s1875_s28 + $0x700] sm:$0xff]  ;;  %v252_v29 = vld [vmem:[%s1875_s28 + $0x708] sm:$0xff]  ;;  %249 = vst [vmem:[%s1880_s29 + $0xd8] sm:$0xff] %v248_v27 }
  0x22   : > { %251 = vst [vmem:[%s1880_s29 + $0xe0] sm:$0xff] %v250_v28  ;;  %253 = vst [vmem:[%s1880_s29 + $0xe8] sm:$0xff] %v252_v29  ;;  %v254_v30 = vld [vmem:[%s1875_s28 + $0x780] sm:$0xff]  ;;  %v256_v31 = vld [vmem:[%s1875_s28 + $0x788] sm:$0xff] }
  0x23   : > { %255 = vst [vmem:[%s1880_s29 + $0xf0] sm:$0xff] %v254_v30  ;;  %257 = vst [vmem:[%s1880_s29 + $0xf8] sm:$0xff] %v256_v31 }
  0x24 PF: > { %p1618_p8 = scmp.ge.s32.totalorder %s1804_s16, 1  ;;  %p270_p9 = scmp.lt.s32.totalorder %s1804_s16, 9 }
  0x26   : > { %p271_p10 = pnand %p1618_p8, %p270_p9 }
  0x27   : > { %s277_s30 = sand.u32 (!%p271_p10), 1, %s1788_s12  }
  0x28   : > { %274 = sbr.rel (%p271_p10) target bundleno = 361 (0x169), region = 51  ;;  %s1619_s4 = sshll.u32 (!%p271_p10), %s277_s30, 8 }
  0x29   : > { %s1950_s5 = scalar_lea.vmem (!%p271_p10), [#allocation3], %s1619_s4  ;;  %s1621_s4 = sshll.u32 (!%p271_p10), %s1796_s14, 2 }
  0x2a   : > { %p323_p11 = scmp.lt.s32.totalorder (!%p271_p10), %s1621_s4, 31  ;;  %s1620_s8 = sshll.u32 (!%p271_p10), %s277_s30, 9 }
  0x2b   : > { %s2040_s12 = scalar_lea.vmem (!%p271_p10), [#allocation4], %s1620_s8 }
  0x2d   : > { %v1806_v32 = vmov 0   ;;  %v1710_v33 = vld [vmem:[%s1950_s5 + $0xe4] ss:$16 sps:$4 sm:$0xff]   ;;  %v1712_v34 = vld [vmem:[%s1950_s5 + $0xec] ss:$16 sps:$4 sm:$0xff]   ;;  %v1141_v9 = vlaneseq  ;;  %s2329_s4 = smov (!%p323_p11, %s1621_s4), 31 }
  0x2e   : > { %750 = vmatprep.mubr.bf16.mxu0 %v1806_v32  ;;  %863 = vmatprep.mubr.bf16.mxu1 %v1806_v32  ;;  %v1714_v35 = vld [vmem:[%s1950_s5 + $0xe0] ss:$16 sps:$4 sm:$0xff]   ;;  %v1715_v36 = vld [vmem:[%s1950_s5 + $0xe8] ss:$16 sps:$4 sm:$0xff]   ;;  %v1716_v37 = vld [vmem:[%s1950_s5 + $0xc4] ss:$16 sps:$4 sm:$0xff]   ;;  %s325_s7 = scalar_lea.vmem %s2319_s2, %s2329_s4 }
  0x2f   : > { %718 = vmatprep.subr.bf16.mxu0 %v1710_v33  ;;  %831 = vmatprep.subr.bf16.mxu1 %v1712_v34  ;;  %v1718_v38 = vld [vmem:[%s1950_s5 + $0xcc] ss:$16 sps:$4 sm:$0xff]   ;;  %v1720_v39 = vld [vmem:[%s1950_s5 + $0xc0] ss:$16 sps:$4 sm:$0xff]   ;;  %v1721_v40 = vld [vmem:[%s1950_s5 + $0xc8] ss:$16 sps:$4 sm:$0xff]  }
  0x30   : > { %719 = vmatpush1.bf16.msra.mxu0 %v1714_v35  ;;  %832 = vmatpush1.bf16.msra.mxu1 %v1715_v36  ;;  %v1722_v41 = vld [vmem:[%s1950_s5 + $0xa4] ss:$16 sps:$4 sm:$0xff]   ;;  %v1724_v42 = vld [vmem:[%s1950_s5 + $0xac] ss:$16 sps:$4 sm:$0xff]   ;;  %v1726_v43 = vld [vmem:[%s1950_s5 + $0xa0] ss:$16 sps:$4 sm:$0xff]  }
  0x31   : > { %720 = vmatprep.subr.bf16.mxu0 %v1716_v37  ;;  %833 = vmatprep.subr.bf16.mxu1 %v1718_v38  ;;  %v1727_v44 = vld [vmem:[%s1950_s5 + $0xa8] ss:$16 sps:$4 sm:$0xff]   ;;  %v1728_v45 = vld [vmem:[%s1950_s5 + $0x84] ss:$16 sps:$4 sm:$0xff]   ;;  %v1730_v46 = vld [vmem:[%s1950_s5 + $0x8c] ss:$16 sps:$4 sm:$0xff]  }
  0x32   : > { %v1732_v47 = vld [vmem:[%s1950_s5 + $0x80] ss:$16 sps:$4 sm:$0xff]   ;;  %v1733_v48 = vld [vmem:[%s1950_s5 + $0x88] ss:$16 sps:$4 sm:$0xff]   ;;  %v1734_v49 = vld [vmem:[%s1950_s5 + $0x64] ss:$16 sps:$4 sm:$0xff]  }
  0x33   : > { %v1736_v50 = vld [vmem:[%s1950_s5 + $0x6c] ss:$16 sps:$4 sm:$0xff]   ;;  %v1738_v51 = vld [vmem:[%s1950_s5 + $0x60] ss:$16 sps:$4 sm:$0xff]   ;;  %v1739_v52 = vld [vmem:[%s1950_s5 + $0x68] ss:$16 sps:$4 sm:$0xff]  }
  0x34   : > { %721 = vmatpush1.bf16.msra.mxu0 %v1720_v39  ;;  %834 = vmatpush1.bf16.msra.mxu1 %v1721_v40  ;;  %v1740_v53 = vld [vmem:[%s1950_s5 + $0x44] ss:$16 sps:$4 sm:$0xff]   ;;  %v1742_v54 = vld [vmem:[%s1950_s5 + $0x4c] ss:$16 sps:$4 sm:$0xff]   ;;  %v1744_v55 = vld [vmem:[%s1950_s5 + $0x40] ss:$16 sps:$4 sm:$0xff]  }
  0x35   : > { %722 = vmatprep.subr.bf16.mxu0 %v1722_v41  ;;  %835 = vmatprep.subr.bf16.mxu1 %v1724_v42  ;;  %v1745_v56 = vld [vmem:[%s1950_s5 + $0x48] ss:$16 sps:$4 sm:$0xff]   ;;  %v1746_v57 = vld [vmem:[%s1950_s5 + $0x24] ss:$16 sps:$4 sm:$0xff]   ;;  %v1748_v58 = vld [vmem:[%s1950_s5 + $0x2c] ss:$16 sps:$4 sm:$0xff]  }
  0x36   : > { %v1750_v59 = vld [vmem:[%s1950_s5 + $0x20] ss:$16 sps:$4 sm:$0xff]   ;;  %v1751_v60 = vld [vmem:[%s1950_s5 + $0x28] ss:$16 sps:$4 sm:$0xff]   ;;  %v1752_v61 = vld [vmem:[%s1950_s5 + $0x4] ss:$16 sps:$4 sm:$0xff]  }
  0x37   : > { %v1754_v62 = vld [vmem:[%s1950_s5 + $0xc] ss:$16 sps:$4 sm:$0xff]   ;;  %v1756_v63 = vld [vmem:[%s1950_s5] ss:$16 sps:$4 sm:$0xff]   ;;  %v1757_v0 = vld [vmem:[%s1950_s5 + $0x8] ss:$16 sps:$4 sm:$0xff]  }
  0x38   : > { %723 = vmatpush1.bf16.msra.mxu0 %v1726_v43  ;;  %836 = vmatpush1.bf16.msra.mxu1 %v1727_v44  ;;  %v1758_v1 = vld [vmem:[%s2317_s0] sm:$0xff]   ;;  %v1759_v2 = vld [vmem:[%s2317_s0 + $0x8] sm:$0xff]   ;;  %v1760_v3 = vld [vmem:[%s2317_s0 + $0x10] sm:$0xff]   ;;  %v1142_v10 = vshrl.u32 %v1141_v9, 7  ;;  %s1668_s30 = sshll.u32 (%p1862_p6), %s1796_s14, 5 }
  0x39   : > { %724 = vmatprep.subr.bf16.mxu0 %v1728_v45  ;;  %837 = vmatprep.subr.bf16.mxu1 %v1730_v46  ;;  %v1761_v4 = vld [vmem:[%s2317_s0 + $0x18] sm:$0xff]   ;;  %v1762_v5 = vld [vmem:[%s2317_s0 + $0x20] sm:$0xff]   ;;  %v1763_v6 = vld [vmem:[%s2317_s0 + $0x28] sm:$0xff]   ;;  %s2175_s11 = scalar_lea.vmem (%p1862_p6), %s2320_s3, %s1668_s30 }
  0x3a   : > { %v1764_v7 = vld [vmem:[%s2317_s0 + $0x30] sm:$0xff]   ;;  %v1765_v8 = vld [vmem:[%s2317_s0 + $0x38] sm:$0xff]   ;;  %v1143_v11 = vsub.s32 0, %v1142_v10  ;;  %v1151_v12 = vsub.s32 2, %v1142_v10  ;;  %v1139_v13 = vld [vmem:[%s325_s7] sm:$0xf] }
  0x3b   : > { %v1147_v14 = vsub.s32 1, %v1142_v10  ;;  %v1155_v15 = vsub.s32 3, %v1142_v10 }
  0x3c   : > { %725 = vmatpush1.bf16.msra.mxu0 %v1732_v47  ;;  %838 = vmatpush1.bf16.msra.mxu1 %v1733_v48  ;;  %v2026_v16 = vrot.slane %v1139_v13, %v1143_v11  ;;  %v2028_v17 = vrot.slane %v1139_v13, %v1151_v12 }
  0x3d   : > { %726 = vmatprep.subr.bf16.mxu0 %v1734_v49  ;;  %839 = vmatprep.subr.bf16.mxu1 %v1736_v50  ;;  %v2032_v18 = vrot.slane %v1139_v13, %v1147_v14  ;;  %v2034_v19 = vrot.slane %v1139_v13, %v1155_v15 }
  0x40   : > { %727 = vmatpush1.bf16.msra.mxu0 %v1738_v51  ;;  %840 = vmatpush1.bf16.msra.mxu1 %v1739_v52 }
  0x41   : > { %728 = vmatprep.subr.bf16.mxu0 %v1740_v53  ;;  %841 = vmatprep.subr.bf16.mxu1 %v1742_v54 }
  0x44   : > { %729 = vmatpush1.bf16.msra.mxu0 %v1744_v55  ;;  %842 = vmatpush1.bf16.msra.mxu1 %v1745_v56 }
  0x45   : > { %730 = vmatprep.subr.bf16.mxu0 %v1746_v57  ;;  %843 = vmatprep.subr.bf16.mxu1 %v1748_v58 }
  0x48   : > { %731 = vmatpush1.bf16.msra.mxu0 %v1750_v59  ;;  %844 = vmatpush1.bf16.msra.mxu1 %v1751_v60 }
  0x49   : > { %732 = vmatprep.subr.bf16.mxu0 %v1752_v61  ;;  %845 = vmatprep.subr.bf16.mxu1 %v1754_v62 }
  0x4c   : > { %733 = vmatpush1.bf16.msra.mxu0 %v1756_v63  ;;  %846 = vmatpush1.bf16.msra.mxu1 %v1757_v0 }
  0x4f   : > { %751 = vmatmul.mubr.bf16.vlgmr.msra.gmra.mxu0 %v1758_v1  ;;  %864 = vmatmul.mubr.bf16.vlgmr.msra.gmra.mxu1 %v1758_v1 }
  0x50   : > { %760 = vmatprep.mubr.bf16.mxu0 %v1806_v32  ;;  %873 = vmatprep.mubr.bf16.mxu1 %v1806_v32 }
  0x57   : > { %761 = vmatmul.mubr.bf16.gmra.mxu0 %v1759_v2  ;;  %874 = vmatmul.mubr.bf16.gmra.mxu1 %v1759_v2 }
  0x58   : > { %770 = vmatprep.mubr.bf16.mxu0 %v1806_v32  ;;  %883 = vmatprep.mubr.bf16.mxu1 %v1806_v32 }
  0x5f   : > { %771 = vmatmul.mubr.bf16.gmra.mxu0 %v1760_v3  ;;  %884 = vmatmul.mubr.bf16.gmra.mxu1 %v1760_v3 }
  0x60   : > { %780 = vmatprep.mubr.bf16.mxu0 %v1806_v32  ;;  %893 = vmatprep.mubr.bf16.mxu1 %v1806_v32 }
  0x67   : > { %781 = vmatmul.mubr.bf16.gmra.mxu0 %v1761_v4  ;;  %894 = vmatmul.mubr.bf16.gmra.mxu1 %v1761_v4 }
  0x68   : > { %790 = vmatprep.mubr.bf16.mxu0 %v1806_v32  ;;  %903 = vmatprep.mubr.bf16.mxu1 %v1806_v32 }
  0x6f   : > { %791 = vmatmul.mubr.bf16.gmra.mxu0 %v1762_v5  ;;  %904 = vmatmul.mubr.bf16.gmra.mxu1 %v1762_v5 }
  0x70   : > { %800 = vmatprep.mubr.bf16.mxu0 %v1806_v32  ;;  %913 = vmatprep.mubr.bf16.mxu1 %v1806_v32 }
  0x77   : > { %801 = vmatmul.mubr.bf16.gmra.mxu0 %v1763_v6  ;;  %914 = vmatmul.mubr.bf16.gmra.mxu1 %v1763_v6 }
  0x78   : > { %810 = vmatprep.mubr.bf16.mxu0 %v1806_v32  ;;  %923 = vmatprep.mubr.bf16.mxu1 %v1806_v32 }
  0x7f   : > { %811 = vmatmul.mubr.bf16.gmra.mxu0 %v1764_v7  ;;  %924 = vmatmul.mubr.bf16.gmra.mxu1 %v1764_v7 }
  0x80   : > { %820 = vmatprep.mubr.bf16.mxu0 %v1806_v32  ;;  %933 = vmatprep.mubr.bf16.mxu1 %v1806_v32 }
  0x87   : > { %821 = vmatmul.mubr.bf16.gmra.mxu0 %v1765_v8  ;;  %934 = vmatmul.mubr.bf16.gmra.mxu1 %v1765_v8 }
 0x10f   : > { %v752_v20 = vpop.f32.mrf.mxu0  ;;  %v865_v21 = vpop.f32.mrf.mxu1 }
 0x110   : > { %v1161_v22 = vadd.f32 %v2026_v16, %v752_v20  ;;  %v1163_v23 = vadd.f32 %v2028_v17, %v865_v21 }
 0x111   : > { %v754_v24 = vpop.f32.mrf.mxu0  ;;  %v867_v25 = vpop.f32.mrf.mxu1 }
 0x112   : > { %v1225_v26 = vmax.f32 %v1161_v22, 0.0  ;;  %v1227_v27 = vmax.f32 %v1163_v23, 0.0  ;;  %v1162_v28 = vadd.f32 %v2032_v18, %v754_v24  ;;  %v1164_v29 = vadd.f32 %v2034_v19, %v867_v25 }
 0x113   : > { %v756_v30 = vpop.f32.mrf.mxu0  ;;  %v869_v31 = vpop.f32.mrf.mxu1 }
 0x114   : > { %1289 = vst [vmem:[%s2040_s12] sm:$0xff] %v1225_v26  ;;  %1291 = vst [vmem:[%s2040_s12 + $0x10] sm:$0xff] %v1227_v27  ;;  %v1226_v32 = vmax.f32 %v1162_v28, 0.0  ;;  %v1228_v33 = vmax.f32 %v1164_v29, 0.0  ;;  %v1165_v34 = vadd.f32 %v2026_v16, %v756_v30  ;;  %v1167_v35 = vadd.f32 %v2028_v17, %v869_v31 }
 0x115   : > { %v758_v36 = vpop.f32.mrf.mxu0  ;;  %v871_v37 = vpop.f32.mrf.mxu1 }
 0x116   : > { %1290 = vst [vmem:[%s2040_s12 + $0x8] sm:$0xff] %v1226_v32  ;;  %1292 = vst [vmem:[%s2040_s12 + $0x18] sm:$0xff] %v1228_v33  ;;  %v1229_v38 = vmax.f32 %v1165_v34, 0.0  ;;  %v1231_v39 = vmax.f32 %v1167_v35, 0.0  ;;  %v1166_v40 = vadd.f32 %v2032_v18, %v758_v36  ;;  %v1168_v41 = vadd.f32 %v2034_v19, %v871_v37 }
 0x117   : > { %v762_v42 = vpop.f32.mrf.mxu0  ;;  %v875_v43 = vpop.f32.mrf.mxu1 }
 0x118   : > { %1293 = vst [vmem:[%s2040_s12 + $0x20] sm:$0xff] %v1229_v38  ;;  %1295 = vst [vmem:[%s2040_s12 + $0x30] sm:$0xff] %v1231_v39  ;;  %v1230_v44 = vmax.f32 %v1166_v40, 0.0  ;;  %v1232_v45 = vmax.f32 %v1168_v41, 0.0  ;;  %v1169_v46 = vadd.f32 %v2026_v16, %v762_v42  ;;  %v1171_v47 = vadd.f32 %v2028_v17, %v875_v43 }
 0x119   : > { %v764_v48 = vpop.f32.mrf.mxu0  ;;  %v877_v49 = vpop.f32.mrf.mxu1 }
 0x11a   : > { %1294 = vst [vmem:[%s2040_s12 + $0x28] sm:$0xff] %v1230_v44  ;;  %1296 = vst [vmem:[%s2040_s12 + $0x38] sm:$0xff] %v1232_v45  ;;  %v1233_v50 = vmax.f32 %v1169_v46, 0.0  ;;  %v1235_v51 = vmax.f32 %v1171_v47, 0.0  ;;  %v1170_v52 = vadd.f32 %v2032_v18, %v764_v48  ;;  %v1172_v53 = vadd.f32 %v2034_v19, %v877_v49 }
 0x11b   : > { %v766_v54 = vpop.f32.mrf.mxu0  ;;  %v879_v55 = vpop.f32.mrf.mxu1 }
 0x11c   : > { %1297 = vst [vmem:[%s2040_s12 + $0x40] sm:$0xff] %v1233_v50  ;;  %1299 = vst [vmem:[%s2040_s12 + $0x50] sm:$0xff] %v1235_v51  ;;  %v1234_v56 = vmax.f32 %v1170_v52, 0.0  ;;  %v1236_v57 = vmax.f32 %v1172_v53, 0.0  ;;  %v1173_v58 = vadd.f32 %v2026_v16, %v766_v54  ;;  %v1175_v59 = vadd.f32 %v2028_v17, %v879_v55 }
 0x11d   : > { %v768_v60 = vpop.f32.mrf.mxu0  ;;  %v881_v61 = vpop.f32.mrf.mxu1 }
 0x11e   : > { %1298 = vst [vmem:[%s2040_s12 + $0x48] sm:$0xff] %v1234_v56  ;;  %1300 = vst [vmem:[%s2040_s12 + $0x58] sm:$0xff] %v1236_v57  ;;  %v1237_v62 = vmax.f32 %v1173_v58, 0.0  ;;  %v1239_v63 = vmax.f32 %v1175_v59, 0.0  ;;  %v1174_v0 = vadd.f32 %v2032_v18, %v768_v60  ;;  %v1176_v1 = vadd.f32 %v2034_v19, %v881_v61 }
 0x11f   : > { %v772_v2 = vpop.f32.mrf.mxu0  ;;  %v885_v3 = vpop.f32.mrf.mxu1 }
 0x120   : > { %1301 = vst [vmem:[%s2040_s12 + $0x60] sm:$0xff] %v1237_v62  ;;  %1303 = vst [vmem:[%s2040_s12 + $0x70] sm:$0xff] %v1239_v63  ;;  %v1238_v4 = vmax.f32 %v1174_v0, 0.0  ;;  %v1240_v5 = vmax.f32 %v1176_v1, 0.0  ;;  %v1177_v6 = vadd.f32 %v2026_v16, %v772_v2  ;;  %v1179_v7 = vadd.f32 %v2028_v17, %v885_v3 }
 0x121   : > { %v774_v8 = vpop.f32.mrf.mxu0  ;;  %v887_v9 = vpop.f32.mrf.mxu1 }
 0x122   : > { %1302 = vst [vmem:[%s2040_s12 + $0x68] sm:$0xff] %v1238_v4  ;;  %1304 = vst [vmem:[%s2040_s12 + $0x78] sm:$0xff] %v1240_v5  ;;  %v1241_v10 = vmax.f32 %v1177_v6, 0.0  ;;  %v1243_v11 = vmax.f32 %v1179_v7, 0.0  ;;  %v1178_v12 = vadd.f32 %v2032_v18, %v774_v8  ;;  %v1180_v13 = vadd.f32 %v2034_v19, %v887_v9 }
 0x123   : > { %v776_v14 = vpop.f32.mrf.mxu0  ;;  %v889_v15 = vpop.f32.mrf.mxu1 }
 0x124   : > { %1305 = vst [vmem:[%s2040_s12 + $0x80] sm:$0xff] %v1241_v10  ;;  %1307 = vst [vmem:[%s2040_s12 + $0x90] sm:$0xff] %v1243_v11  ;;  %v1242_v20 = vmax.f32 %v1178_v12, 0.0  ;;  %v1244_v21 = vmax.f32 %v1180_v13, 0.0  ;;  %v1181_v22 = vadd.f32 %v2026_v16, %v776_v14  ;;  %v1183_v23 = vadd.f32 %v2028_v17, %v889_v15 }
 0x125   : > { %v778_v24 = vpop.f32.mrf.mxu0  ;;  %v891_v25 = vpop.f32.mrf.mxu1 }
 0x126   : > { %1306 = vst [vmem:[%s2040_s12 + $0x88] sm:$0xff] %v1242_v20  ;;  %1308 = vst [vmem:[%s2040_s12 + $0x98] sm:$0xff] %v1244_v21  ;;  %v1245_v26 = vmax.f32 %v1181_v22, 0.0  ;;  %v1247_v27 = vmax.f32 %v1183_v23, 0.0  ;;  %v1182_v28 = vadd.f32 %v2032_v18, %v778_v24  ;;  %v1184_v29 = vadd.f32 %v2034_v19, %v891_v25 }
 0x127   : > { %v782_v30 = vpop.f32.mrf.mxu0  ;;  %v895_v31 = vpop.f32.mrf.mxu1 }
 0x128   : > { %1309 = vst [vmem:[%s2040_s12 + $0xa0] sm:$0xff] %v1245_v26  ;;  %1311 = vst [vmem:[%s2040_s12 + $0xb0] sm:$0xff] %v1247_v27  ;;  %v1246_v32 = vmax.f32 %v1182_v28, 0.0  ;;  %v1248_v33 = vmax.f32 %v1184_v29, 0.0  ;;  %v1185_v34 = vadd.f32 %v2026_v16, %v782_v30  ;;  %v1187_v35 = vadd.f32 %v2028_v17, %v895_v31 }
 0x129   : > { %v784_v36 = vpop.f32.mrf.mxu0  ;;  %v897_v37 = vpop.f32.mrf.mxu1 }
 0x12a   : > { %1310 = vst [vmem:[%s2040_s12 + $0xa8] sm:$0xff] %v1246_v32  ;;  %1312 = vst [vmem:[%s2040_s12 + $0xb8] sm:$0xff] %v1248_v33  ;;  %v1249_v38 = vmax.f32 %v1185_v34, 0.0  ;;  %v1251_v39 = vmax.f32 %v1187_v35, 0.0  ;;  %v1186_v40 = vadd.f32 %v2032_v18, %v784_v36  ;;  %v1188_v41 = vadd.f32 %v2034_v19, %v897_v37 }
 0x12b   : > { %v786_v42 = vpop.f32.mrf.mxu0  ;;  %v899_v43 = vpop.f32.mrf.mxu1 }
 0x12c   : > { %1313 = vst [vmem:[%s2040_s12 + $0xc0] sm:$0xff] %v1249_v38  ;;  %1315 = vst [vmem:[%s2040_s12 + $0xd0] sm:$0xff] %v1251_v39  ;;  %v1250_v44 = vmax.f32 %v1186_v40, 0.0  ;;  %v1252_v45 = vmax.f32 %v1188_v41, 0.0  ;;  %v1189_v46 = vadd.f32 %v2026_v16, %v786_v42  ;;  %v1191_v47 = vadd.f32 %v2028_v17, %v899_v43 }
 0x12d   : > { %v788_v48 = vpop.f32.mrf.mxu0  ;;  %v901_v49 = vpop.f32.mrf.mxu1 }
 0x12e   : > { %1314 = vst [vmem:[%s2040_s12 + $0xc8] sm:$0xff] %v1250_v44  ;;  %1316 = vst [vmem:[%s2040_s12 + $0xd8] sm:$0xff] %v1252_v45  ;;  %v1253_v50 = vmax.f32 %v1189_v46, 0.0  ;;  %v1255_v51 = vmax.f32 %v1191_v47, 0.0  ;;  %v1190_v52 = vadd.f32 %v2032_v18, %v788_v48  ;;  %v1192_v53 = vadd.f32 %v2034_v19, %v901_v49 }
 0x12f   : > { %v792_v54 = vpop.f32.mrf.mxu0  ;;  %v905_v55 = vpop.f32.mrf.mxu1 }
 0x130   : > { %1317 = vst [vmem:[%s2040_s12 + $0xe0] sm:$0xff] %v1253_v50  ;;  %1319 = vst [vmem:[%s2040_s12 + $0xf0] sm:$0xff] %v1255_v51  ;;  %v1254_v56 = vmax.f32 %v1190_v52, 0.0  ;;  %v1256_v57 = vmax.f32 %v1192_v53, 0.0  ;;  %v1193_v58 = vadd.f32 %v2026_v16, %v792_v54  ;;  %v1195_v59 = vadd.f32 %v2028_v17, %v905_v55 }
 0x131   : > { %v794_v60 = vpop.f32.mrf.mxu0  ;;  %v907_v61 = vpop.f32.mrf.mxu1 }
 0x132   : > { %1318 = vst [vmem:[%s2040_s12 + $0xe8] sm:$0xff] %v1254_v56  ;;  %1320 = vst [vmem:[%s2040_s12 + $0xf8] sm:$0xff] %v1256_v57  ;;  %v1257_v62 = vmax.f32 %v1193_v58, 0.0  ;;  %v1259_v63 = vmax.f32 %v1195_v59, 0.0  ;;  %v1194_v0 = vadd.f32 %v2032_v18, %v794_v60  ;;  %v1196_v1 = vadd.f32 %v2034_v19, %v907_v61 }
 0x133   : > { %v796_v2 = vpop.f32.mrf.mxu0  ;;  %v909_v3 = vpop.f32.mrf.mxu1 }
 0x134   : > { %1321 = vst [vmem:[%s2040_s12 + $0x100] sm:$0xff] %v1257_v62  ;;  %1323 = vst [vmem:[%s2040_s12 + $0x110] sm:$0xff] %v1259_v63  ;;  %v1258_v4 = vmax.f32 %v1194_v0, 0.0  ;;  %v1260_v5 = vmax.f32 %v1196_v1, 0.0  ;;  %v1197_v6 = vadd.f32 %v2026_v16, %v796_v2  ;;  %v1199_v7 = vadd.f32 %v2028_v17, %v909_v3 }
 0x135   : > { %v798_v8 = vpop.f32.mrf.mxu0  ;;  %v911_v9 = vpop.f32.mrf.mxu1 }
 0x136   : > { %1322 = vst [vmem:[%s2040_s12 + $0x108] sm:$0xff] %v1258_v4  ;;  %1324 = vst [vmem:[%s2040_s12 + $0x118] sm:$0xff] %v1260_v5  ;;  %v1261_v10 = vmax.f32 %v1197_v6, 0.0  ;;  %v1263_v11 = vmax.f32 %v1199_v7, 0.0  ;;  %v1198_v12 = vadd.f32 %v2032_v18, %v798_v8  ;;  %v1200_v13 = vadd.f32 %v2034_v19, %v911_v9 }
 0x137   : > { %v802_v14 = vpop.f32.mrf.mxu0  ;;  %v915_v15 = vpop.f32.mrf.mxu1 }
 0x138   : > { %1325 = vst [vmem:[%s2040_s12 + $0x120] sm:$0xff] %v1261_v10  ;;  %1327 = vst [vmem:[%s2040_s12 + $0x130] sm:$0xff] %v1263_v11  ;;  %v1262_v20 = vmax.f32 %v1198_v12, 0.0  ;;  %v1264_v21 = vmax.f32 %v1200_v13, 0.0  ;;  %v1201_v22 = vadd.f32 %v2026_v16, %v802_v14  ;;  %v1203_v23 = vadd.f32 %v2028_v17, %v915_v15 }
 0x139   : > { %v804_v24 = vpop.f32.mrf.mxu0  ;;  %v917_v25 = vpop.f32.mrf.mxu1 }
 0x13a   : > { %1326 = vst [vmem:[%s2040_s12 + $0x128] sm:$0xff] %v1262_v20  ;;  %1328 = vst [vmem:[%s2040_s12 + $0x138] sm:$0xff] %v1264_v21  ;;  %v1265_v26 = vmax.f32 %v1201_v22, 0.0  ;;  %v1267_v27 = vmax.f32 %v1203_v23, 0.0  ;;  %v1202_v28 = vadd.f32 %v2032_v18, %v804_v24  ;;  %v1204_v29 = vadd.f32 %v2034_v19, %v917_v25 }
 0x13b   : > { %v806_v30 = vpop.f32.mrf.mxu0  ;;  %v919_v31 = vpop.f32.mrf.mxu1 }
 0x13c   : > { %1329 = vst [vmem:[%s2040_s12 + $0x140] sm:$0xff] %v1265_v26  ;;  %1331 = vst [vmem:[%s2040_s12 + $0x150] sm:$0xff] %v1267_v27  ;;  %v1266_v32 = vmax.f32 %v1202_v28, 0.0  ;;  %v1268_v33 = vmax.f32 %v1204_v29, 0.0  ;;  %v1205_v34 = vadd.f32 %v2026_v16, %v806_v30  ;;  %v1207_v35 = vadd.f32 %v2028_v17, %v919_v31 }
 0x13d   : > { %v808_v36 = vpop.f32.mrf.mxu0  ;;  %v921_v37 = vpop.f32.mrf.mxu1 }
 0x13e   : > { %1330 = vst [vmem:[%s2040_s12 + $0x148] sm:$0xff] %v1266_v32  ;;  %1332 = vst [vmem:[%s2040_s12 + $0x158] sm:$0xff] %v1268_v33  ;;  %v1269_v38 = vmax.f32 %v1205_v34, 0.0  ;;  %v1271_v39 = vmax.f32 %v1207_v35, 0.0  ;;  %v1206_v40 = vadd.f32 %v2032_v18, %v808_v36  ;;  %v1208_v41 = vadd.f32 %v2034_v19, %v921_v37  ;;  %v1386_v32 = vld [vmem:[%s2040_s12 + $0x20] sm:$0xff] (%p1862_p6)  ;;  %v1388_v33 = vld [vmem:[%s2040_s12 + $0x28] sm:$0xff] (%p1862_p6) }
 0x13f   : > { %v812_v42 = vpop.f32.mrf.mxu0  ;;  %v925_v43 = vpop.f32.mrf.mxu1  ;;  %1387 = vst [vmem:[%s2175_s11 + $0x100] sm:$0xff] (%p1862_p6), %v1386_v32  ;;  %1389 = vst [vmem:[%s2175_s11 + $0x108] sm:$0xff] (%p1862_p6), %v1388_v33  ;;  %v1390_v34 = vld [vmem:[%s2040_s12 + $0x30] sm:$0xff] (%p1862_p6)  ;;  %v1392_v35 = vld [vmem:[%s2040_s12 + $0x38] sm:$0xff] (%p1862_p6) }
 0x140   : > { %1333 = vst [vmem:[%s2040_s12 + $0x160] sm:$0xff] %v1269_v38  ;;  %1335 = vst [vmem:[%s2040_s12 + $0x170] sm:$0xff] %v1271_v39  ;;  %v1270_v44 = vmax.f32 %v1206_v40, 0.0  ;;  %v1272_v45 = vmax.f32 %v1208_v41, 0.0  ;;  %v1209_v46 = vadd.f32 %v2026_v16, %v812_v42  ;;  %v1211_v47 = vadd.f32 %v2028_v17, %v925_v43  ;;  %v1394_v36 = vld [vmem:[%s2040_s12 + $0x40] sm:$0xff] (%p1862_p6)  ;;  %v1396_v37 = vld [vmem:[%s2040_s12 + $0x48] sm:$0xff] (%p1862_p6) }
 0x141   : > { %v814_v48 = vpop.f32.mrf.mxu0  ;;  %v927_v49 = vpop.f32.mrf.mxu1  ;;  %1391 = vst [vmem:[%s2175_s11 + $0x110] sm:$0xff] (%p1862_p6), %v1390_v34  ;;  %1393 = vst [vmem:[%s2175_s11 + $0x118] sm:$0xff] (%p1862_p6), %v1392_v35  ;;  %v1398_v38 = vld [vmem:[%s2040_s12 + $0x50] sm:$0xff] (%p1862_p6)  ;;  %v1400_v39 = vld [vmem:[%s2040_s12 + $0x58] sm:$0xff] (%p1862_p6) }
 0x142   : > { %1334 = vst [vmem:[%s2040_s12 + $0x168] sm:$0xff] %v1270_v44  ;;  %1336 = vst [vmem:[%s2040_s12 + $0x178] sm:$0xff] %v1272_v45  ;;  %v1273_v50 = vmax.f32 %v1209_v46, 0.0  ;;  %v1275_v51 = vmax.f32 %v1211_v47, 0.0  ;;  %v1210_v52 = vadd.f32 %v2032_v18, %v814_v48  ;;  %v1212_v53 = vadd.f32 %v2034_v19, %v927_v49  ;;  %v1402_v40 = vld [vmem:[%s2040_s12 + $0x60] sm:$0xff] (%p1862_p6)  ;;  %v1404_v41 = vld [vmem:[%s2040_s12 + $0x68] sm:$0xff] (%p1862_p6) }
 0x143   : > { %v816_v54 = vpop.f32.mrf.mxu0  ;;  %v929_v55 = vpop.f32.mrf.mxu1  ;;  %1395 = vst [vmem:[%s2175_s11 + $0x200] sm:$0xff] (%p1862_p6), %v1394_v36  ;;  %1397 = vst [vmem:[%s2175_s11 + $0x208] sm:$0xff] (%p1862_p6), %v1396_v37  ;;  %v1406_v42 = vld [vmem:[%s2040_s12 + $0x70] sm:$0xff] (%p1862_p6)  ;;  %v1408_v43 = vld [vmem:[%s2040_s12 + $0x78] sm:$0xff] (%p1862_p6) }
 0x144   : > { %1337 = vst [vmem:[%s2040_s12 + $0x180] sm:$0xff] %v1273_v50  ;;  %1339 = vst [vmem:[%s2040_s12 + $0x190] sm:$0xff] %v1275_v51  ;;  %v1274_v56 = vmax.f32 %v1210_v52, 0.0  ;;  %v1276_v57 = vmax.f32 %v1212_v53, 0.0  ;;  %v1213_v58 = vadd.f32 %v2026_v16, %v816_v54  ;;  %v1215_v59 = vadd.f32 %v2028_v17, %v929_v55  ;;  %v1410_v44 = vld [vmem:[%s2040_s12 + $0x80] sm:$0xff] (%p1862_p6)  ;;  %v1412_v45 = vld [vmem:[%s2040_s12 + $0x88] sm:$0xff] (%p1862_p6) }
 0x145   : > { %v818_v60 = vpop.f32.mrf.mxu0  ;;  %v931_v61 = vpop.f32.mrf.mxu1  ;;  %1399 = vst [vmem:[%s2175_s11 + $0x210] sm:$0xff] (%p1862_p6), %v1398_v38  ;;  %1401 = vst [vmem:[%s2175_s11 + $0x218] sm:$0xff] (%p1862_p6), %v1400_v39  ;;  %v1414_v46 = vld [vmem:[%s2040_s12 + $0x90] sm:$0xff] (%p1862_p6)  ;;  %v1416_v47 = vld [vmem:[%s2040_s12 + $0x98] sm:$0xff] (%p1862_p6) }
 0x146   : > { %1338 = vst [vmem:[%s2040_s12 + $0x188] sm:$0xff] %v1274_v56  ;;  %1340 = vst [vmem:[%s2040_s12 + $0x198] sm:$0xff] %v1276_v57  ;;  %v1277_v62 = vmax.f32 %v1213_v58, 0.0  ;;  %v1279_v63 = vmax.f32 %v1215_v59, 0.0  ;;  %v1214_v0 = vadd.f32 %v2032_v18, %v818_v60  ;;  %v1216_v1 = vadd.f32 %v2034_v19, %v931_v61  ;;  %v1418_v48 = vld [vmem:[%s2040_s12 + $0xa0] sm:$0xff] (%p1862_p6)  ;;  %v1420_v49 = vld [vmem:[%s2040_s12 + $0xa8] sm:$0xff] (%p1862_p6) }
 0x147   : > { %v822_v2 = vpop.f32.mrf.mxu0  ;;  %v935_v3 = vpop.f32.mrf.mxu1  ;;  %1403 = vst [vmem:[%s2175_s11 + $0x300] sm:$0xff] (%p1862_p6), %v1402_v40  ;;  %1405 = vst [vmem:[%s2175_s11 + $0x308] sm:$0xff] (%p1862_p6), %v1404_v41  ;;  %v1422_v50 = vld [vmem:[%s2040_s12 + $0xb0] sm:$0xff] (%p1862_p6)  ;;  %v1424_v51 = vld [vmem:[%s2040_s12 + $0xb8] sm:$0xff] (%p1862_p6) }
 0x148   : > { %1341 = vst [vmem:[%s2040_s12 + $0x1a0] sm:$0xff] %v1277_v62  ;;  %1343 = vst [vmem:[%s2040_s12 + $0x1b0] sm:$0xff] %v1279_v63  ;;  %v1278_v4 = vmax.f32 %v1214_v0, 0.0  ;;  %v1280_v5 = vmax.f32 %v1216_v1, 0.0  ;;  %v1217_v6 = vadd.f32 %v2026_v16, %v822_v2  ;;  %v1219_v7 = vadd.f32 %v2028_v17, %v935_v3  ;;  %v1426_v52 = vld [vmem:[%s2040_s12 + $0xc0] sm:$0xff] (%p1862_p6)  ;;  %v1428_v53 = vld [vmem:[%s2040_s12 + $0xc8] sm:$0xff] (%p1862_p6) }
 0x149   : > { %v824_v8 = vpop.f32.mrf.mxu0  ;;  %v937_v9 = vpop.f32.mrf.mxu1  ;;  %1407 = vst [vmem:[%s2175_s11 + $0x310] sm:$0xff] (%p1862_p6), %v1406_v42  ;;  %1409 = vst [vmem:[%s2175_s11 + $0x318] sm:$0xff] (%p1862_p6), %v1408_v43  ;;  %v1430_v54 = vld [vmem:[%s2040_s12 + $0xd0] sm:$0xff] (%p1862_p6)  ;;  %v1432_v55 = vld [vmem:[%s2040_s12 + $0xd8] sm:$0xff] (%p1862_p6) }
 0x14a   : > { %1342 = vst [vmem:[%s2040_s12 + $0x1a8] sm:$0xff] %v1278_v4  ;;  %1344 = vst [vmem:[%s2040_s12 + $0x1b8] sm:$0xff] %v1280_v5  ;;  %v1281_v10 = vmax.f32 %v1217_v6, 0.0  ;;  %v1283_v11 = vmax.f32 %v1219_v7, 0.0  ;;  %v1218_v12 = vadd.f32 %v2032_v18, %v824_v8  ;;  %v1220_v13 = vadd.f32 %v2034_v19, %v937_v9  ;;  %v1434_v56 = vld [vmem:[%s2040_s12 + $0xe0] sm:$0xff] (%p1862_p6)  ;;  %v1436_v57 = vld [vmem:[%s2040_s12 + $0xe8] sm:$0xff] (%p1862_p6) }
 0x14b   : > { %v826_v14 = vpop.f32.mrf.mxu0  ;;  %v939_v15 = vpop.f32.mrf.mxu1  ;;  %1411 = vst [vmem:[%s2175_s11 + $0x400] sm:$0xff] (%p1862_p6), %v1410_v44  ;;  %1413 = vst [vmem:[%s2175_s11 + $0x408] sm:$0xff] (%p1862_p6), %v1412_v45  ;;  %v1438_v58 = vld [vmem:[%s2040_s12 + $0xf0] sm:$0xff] (%p1862_p6)  ;;  %v1440_v59 = vld [vmem:[%s2040_s12 + $0xf8] sm:$0xff] (%p1862_p6) }
 0x14c   : > { %1345 = vst [vmem:[%s2040_s12 + $0x1c0] sm:$0xff] %v1281_v10  ;;  %1347 = vst [vmem:[%s2040_s12 + $0x1d0] sm:$0xff] %v1283_v11  ;;  %v1282_v20 = vmax.f32 %v1218_v12, 0.0  ;;  %v1284_v21 = vmax.f32 %v1220_v13, 0.0  ;;  %v1221_v22 = vadd.f32 %v2026_v16, %v826_v14  ;;  %v1223_v23 = vadd.f32 %v2028_v17, %v939_v15  ;;  %v1378_v16 = vld [vmem:[%s2040_s12] sm:$0xff] (%p1862_p6)  ;;  %v1380_v17 = vld [vmem:[%s2040_s12 + $0x8] sm:$0xff] (%p1862_p6) }
 0x14d   : > { %v828_v24 = vpop.f32.mrf.mxu0  ;;  %v941_v25 = vpop.f32.mrf.mxu1  ;;  %1379 = vst [vmem:[%s2175_s11] sm:$0xff] (%p1862_p6), %v1378_v16  ;;  %1381 = vst [vmem:[%s2175_s11 + $0x8] sm:$0xff] (%p1862_p6), %v1380_v17  ;;  %v1442_v60 = vld [vmem:[%s2040_s12 + $0x100] sm:$0xff] (%p1862_p6)  ;;  %v1444_v61 = vld [vmem:[%s2040_s12 + $0x108] sm:$0xff] (%p1862_p6) }
 0x14e   : > { %1346 = vst [vmem:[%s2040_s12 + $0x1c8] sm:$0xff] %v1282_v20  ;;  %1348 = vst [vmem:[%s2040_s12 + $0x1d8] sm:$0xff] %v1284_v21  ;;  %v1285_v26 = vmax.f32 %v1221_v22, 0.0  ;;  %v1287_v27 = vmax.f32 %v1223_v23, 0.0  ;;  %v1222_v28 = vadd.f32 %v2032_v18, %v828_v24  ;;  %v1224_v29 = vadd.f32 %v2034_v19, %v941_v25  ;;  %1359 = sbr.rel (!%p1862_p6) target bundleno = 361 (0x169), region = 67  ;;  %v1382_v18 = vld [vmem:[%s2040_s12 + $0x10] sm:$0xff] (%p1862_p6) }
 0x14f   : > { %v1384_v19 = vld [vmem:[%s2040_s12 + $0x18] sm:$0xff] (%p1862_p6)  ;;  %1383 = vst [vmem:[%s2175_s11 + $0x10] sm:$0xff] (%p1862_p6), %v1382_v18  ;;  %1415 = vst [vmem:[%s2175_s11 + $0x410] sm:$0xff] (%p1862_p6), %v1414_v46  ;;  %v1446_v62 = vld [vmem:[%s2040_s12 + $0x110] sm:$0xff] (%p1862_p6) }
 0x150   : > { %1349 = vst [vmem:[%s2040_s12 + $0x1e0] sm:$0xff] %v1285_v26  ;;  %1351 = vst [vmem:[%s2040_s12 + $0x1f0] sm:$0xff] %v1287_v27  ;;  %v1286_v30 = vmax.f32 %v1222_v28, 0.0  ;;  %v1288_v31 = vmax.f32 %v1224_v29, 0.0  ;;  %v1448_v63 = vld [vmem:[%s2040_s12 + $0x118] sm:$0xff] (%p1862_p6)  ;;  %v1450_v0 = vld [vmem:[%s2040_s12 + $0x120] sm:$0xff] (%p1862_p6) }
 0x151   : > { %1385 = vst [vmem:[%s2175_s11 + $0x18] sm:$0xff] (%p1862_p6), %v1384_v19  ;;  %1417 = vst [vmem:[%s2175_s11 + $0x418] sm:$0xff] (%p1862_p6), %v1416_v47  ;;  %v1452_v1 = vld [vmem:[%s2040_s12 + $0x128] sm:$0xff] (%p1862_p6)  ;;  %v1454_v2 = vld [vmem:[%s2040_s12 + $0x130] sm:$0xff] (%p1862_p6) }
 0x152   : > { %1350 = vst [vmem:[%s2040_s12 + $0x1e8] sm:$0xff] %v1286_v30  ;;  %1352 = vst [vmem:[%s2040_s12 + $0x1f8] sm:$0xff] %v1288_v31  ;;  %v1456_v3 = vld [vmem:[%s2040_s12 + $0x138] sm:$0xff] (%p1862_p6)  ;;  %v1458_v4 = vld [vmem:[%s2040_s12 + $0x140] sm:$0xff] (%p1862_p6) }
 0x153   : > { %1419 = vst [vmem:[%s2175_s11 + $0x500] sm:$0xff] %v1418_v48  ;;  %1421 = vst [vmem:[%s2175_s11 + $0x508] sm:$0xff] %v1420_v49  ;;  %v1460_v5 = vld [vmem:[%s2040_s12 + $0x148] sm:$0xff]  ;;  %v1462_v6 = vld [vmem:[%s2040_s12 + $0x150] sm:$0xff] }
 0x154   : > { %1423 = vst [vmem:[%s2175_s11 + $0x510] sm:$0xff] %v1422_v50  ;;  %1425 = vst [vmem:[%s2175_s11 + $0x518] sm:$0xff] %v1424_v51  ;;  %v1464_v7 = vld [vmem:[%s2040_s12 + $0x158] sm:$0xff]  ;;  %v1466_v8 = vld [vmem:[%s2040_s12 + $0x160] sm:$0xff] }
 0x155   : > { %1427 = vst [vmem:[%s2175_s11 + $0x600] sm:$0xff] %v1426_v52  ;;  %1429 = vst [vmem:[%s2175_s11 + $0x608] sm:$0xff] %v1428_v53  ;;  %v1468_v9 = vld [vmem:[%s2040_s12 + $0x168] sm:$0xff]  ;;  %v1470_v10 = vld [vmem:[%s2040_s12 + $0x170] sm:$0xff] }
 0x156   : > { %1431 = vst [vmem:[%s2175_s11 + $0x610] sm:$0xff] %v1430_v54  ;;  %1433 = vst [vmem:[%s2175_s11 + $0x618] sm:$0xff] %v1432_v55  ;;  %v1472_v11 = vld [vmem:[%s2040_s12 + $0x178] sm:$0xff]  ;;  %v1474_v12 = vld [vmem:[%s2040_s12 + $0x180] sm:$0xff] }
 0x157   : > { %1435 = vst [vmem:[%s2175_s11 + $0x700] sm:$0xff] %v1434_v56  ;;  %1437 = vst [vmem:[%s2175_s11 + $0x708] sm:$0xff] %v1436_v57  ;;  %v1476_v13 = vld [vmem:[%s2040_s12 + $0x188] sm:$0xff]  ;;  %v1478_v14 = vld [vmem:[%s2040_s12 + $0x190] sm:$0xff] }
 0x158   : > { %1439 = vst [vmem:[%s2175_s11 + $0x710] sm:$0xff] %v1438_v58  ;;  %1441 = vst [vmem:[%s2175_s11 + $0x718] sm:$0xff] %v1440_v59  ;;  %v1480_v15 = vld [vmem:[%s2040_s12 + $0x198] sm:$0xff]  ;;  %v1482_v20 = vld [vmem:[%s2040_s12 + $0x1a0] sm:$0xff] }
 0x159   : > { %1443 = vst [vmem:[%s2175_s11 + $0x800] sm:$0xff] %v1442_v60  ;;  %1445 = vst [vmem:[%s2175_s11 + $0x808] sm:$0xff] %v1444_v61  ;;  %v1484_v21 = vld [vmem:[%s2040_s12 + $0x1a8] sm:$0xff]  ;;  %v1486_v22 = vld [vmem:[%s2040_s12 + $0x1b0] sm:$0xff] }
 0x15a   : > { %1447 = vst [vmem:[%s2175_s11 + $0x810] sm:$0xff] %v1446_v62  ;;  %1449 = vst [vmem:[%s2175_s11 + $0x818] sm:$0xff] %v1448_v63  ;;  %v1488_v23 = vld [vmem:[%s2040_s12 + $0x1b8] sm:$0xff]  ;;  %v1490_v24 = vld [vmem:[%s2040_s12 + $0x1c0] sm:$0xff] }
 0x15b   : > { %1451 = vst [vmem:[%s2175_s11 + $0x900] sm:$0xff] %v1450_v0  ;;  %1453 = vst [vmem:[%s2175_s11 + $0x908] sm:$0xff] %v1452_v1  ;;  %v1492_v25 = vld [vmem:[%s2040_s12 + $0x1c8] sm:$0xff]  ;;  %v1494_v26 = vld [vmem:[%s2040_s12 + $0x1d0] sm:$0xff] }
 0x15c   : > { %1455 = vst [vmem:[%s2175_s11 + $0x910] sm:$0xff] %v1454_v2  ;;  %1457 = vst [vmem:[%s2175_s11 + $0x918] sm:$0xff] %v1456_v3  ;;  %v1496_v27 = vld [vmem:[%s2040_s12 + $0x1d8] sm:$0xff]  ;;  %v1498_v28 = vld [vmem:[%s2040_s12 + $0x1e0] sm:$0xff] }
 0x15d   : > { %1459 = vst [vmem:[%s2175_s11 + $0xa00] sm:$0xff] %v1458_v4  ;;  %1461 = vst [vmem:[%s2175_s11 + $0xa08] sm:$0xff] %v1460_v5  ;;  %v1500_v29 = vld [vmem:[%s2040_s12 + $0x1e8] sm:$0xff]  ;;  %v1502_v30 = vld [vmem:[%s2040_s12 + $0x1f0] sm:$0xff] }
 0x15e   : > { %1463 = vst [vmem:[%s2175_s11 + $0xa10] sm:$0xff] %v1462_v6  ;;  %1465 = vst [vmem:[%s2175_s11 + $0xa18] sm:$0xff] %v1464_v7  ;;  %v1504_v31 = vld [vmem:[%s2040_s12 + $0x1f8] sm:$0xff] }
 0x15f   : > { %1467 = vst [vmem:[%s2175_s11 + $0xb00] sm:$0xff] %v1466_v8  ;;  %1469 = vst [vmem:[%s2175_s11 + $0xb08] sm:$0xff] %v1468_v9 }
 0x160   : > { %1471 = vst [vmem:[%s2175_s11 + $0xb10] sm:$0xff] %v1470_v10  ;;  %1473 = vst [vmem:[%s2175_s11 + $0xb18] sm:$0xff] %v1472_v11 }
 0x161   : > { %1475 = vst [vmem:[%s2175_s11 + $0xc00] sm:$0xff] %v1474_v12  ;;  %1477 = vst [vmem:[%s2175_s11 + $0xc08] sm:$0xff] %v1476_v13 }
 0x162   : > { %1479 = vst [vmem:[%s2175_s11 + $0xc10] sm:$0xff] %v1478_v14  ;;  %1481 = vst [vmem:[%s2175_s11 + $0xc18] sm:$0xff] %v1480_v15 }
 0x163   : > { %1483 = vst [vmem:[%s2175_s11 + $0xd00] sm:$0xff] %v1482_v20  ;;  %1485 = vst [vmem:[%s2175_s11 + $0xd08] sm:$0xff] %v1484_v21 }
 0x164   : > { %1487 = vst [vmem:[%s2175_s11 + $0xd10] sm:$0xff] %v1486_v22  ;;  %1489 = vst [vmem:[%s2175_s11 + $0xd18] sm:$0xff] %v1488_v23 }
 0x165   : > { %1491 = vst [vmem:[%s2175_s11 + $0xe00] sm:$0xff] %v1490_v24  ;;  %1493 = vst [vmem:[%s2175_s11 + $0xe08] sm:$0xff] %v1492_v25 }
 0x166   : > { %1495 = vst [vmem:[%s2175_s11 + $0xe10] sm:$0xff] %v1494_v26  ;;  %1497 = vst [vmem:[%s2175_s11 + $0xe18] sm:$0xff] %v1496_v27 }
 0x167   : > { %1499 = vst [vmem:[%s2175_s11 + $0xf00] sm:$0xff] %v1498_v28  ;;  %1501 = vst [vmem:[%s2175_s11 + $0xf08] sm:$0xff] %v1500_v29 }
 0x168   : > { %1503 = vst [vmem:[%s2175_s11 + $0xf10] sm:$0xff] %v1502_v30  ;;  %1505 = vst [vmem:[%s2175_s11 + $0xf18] sm:$0xff] %v1504_v31 }
 0x169 PF: > { %s13_s16 = sadd.s32 1, %s1804_s16   ;;  %s2322_s12 = smov %s1792_s13 }
 0x16a   : > { %p10_p12 = scmp.ge.s32.totalorder %s13_s16, 10   ;;  %s2323_s13 = smov %s1867_s22 }
 0x16b   : > { %s2324_s14 = smov %s1800_s15  ;;  %s2325_s15 = smov %s2327_s17 }
 0x16c   :  { %12 = sbr.rel (!%p10_p12) target bundleno = 3 (0x3), region = 127 }

// kernel: eco_forward.9
= control target key start
LH: loop header
LB: loop body
LE: loop exit
PB: predicated region body
PF: predicated region fallthrough
CT: control target
= control target key end

     0   :  { %s1609_s12 = smov 0   ;;  %s1611_s13 = smov 0   ;;  %s1863_s0 = inlined_call_operand.vmem [shape: bf16[128,4096], index: 0, kind: input, shape index: {}]   ;;  %s1864_s1 = inlined_call_operand.vmem [shape: bf16[4096,128], index: 1, kind: input, shape index: {}]   ;;  %s1865_s2 = inlined_call_operand.vmem [shape: f32[1,128], index: 2, kind: input, shape index: {}]   ;;  %s1866_s3 = inlined_call_operand.vmem [shape: f32[128,128], index: 3, kind: output, shape index: {}]  }
   0x1   :  { %s1613_s14 = smov 0   ;;  %s1615_s15 = smov 0  }
   0x2   :  { %s1617_s16 = smov 0  }
   0x3 LB: > { %s25_s17 = sadd.s32 1, %s1582_s15  ;;  %p48_p1 = scmp.ne.s32.totalorder %s1574_s13, %s1570_s12  ;;  %s1586_s16 = sphi %s1617_s16, %s13_s16   ;;  %s1582_s15 = sphi %s1615_s15, %s1870_s15   ;;  %s1578_s14 = sphi %s1613_s14, %s1869_s14   ;;  %s1574_s13 = sphi %s1611_s13, %s1868_s13   ;;  %s1570_s12 = sphi %s1609_s12, %s1867_s12  }
   0x4   : > { %p26_p0 = scmp.ge.s32.totalorder %s25_s17, 8  ;;  %p49_p2 = scmp.eq.s32.totalorder %s1586_s16, 0 }
   0x5   : > { %s41_s19 = sadd.s32 1, %s1574_s13  ;;  %p1219_p5 = scmp.ge.s32.totalorder %s1586_s16, 8 }
   0x6   : > { %s1872_s17 = smov (%p26_p0, %s25_s17), 0  ;;  %p50_p3 = por %p49_p2, %p48_p1 }
   0x7   : > { %s37_s18 = ssub.s32 %s1582_s15, %s1872_s17  ;;  %162 = sbr.rel (%p1219_p5) target bundleno = 32 (0x20), region = 20 }
   0x8   : > { %p39_p4 = scmp.eq.s32.totalorder %s37_s18, 0 }
   0xa   : > { %s1644_s20 = scalar_select %p39_p4, %s1574_s13, %s41_s19  }
   0xc   : > { %165 = sbr.rel (!%p50_p3) target bundleno = 32 (0x20), region = 24  ;;  %s167_s21 = sand.u32 (%p50_p3), 1, %s1574_s13  }
   0xd   : > { %s1298_s22 = sshll.u32 (%p50_p3), %s1582_s15, 4  ;;  %s1220_s23 = sshll.u32 (%p50_p3), %s167_s21, 8 }
   0xe   : > { %s1652_s26 = scalar_lea.vmem (%p50_p3), %s1863_s0, %s1298_s22  ;;  %s1657_s27 = scalar_lea.vmem (%p50_p3), [#allocation3], %s1220_s23 }
   0xf   : > { %v188_v0 = vld [vmem:[%s1652_s26] sm:$0xff] (%p50_p3)  ;;  %v190_v1 = vld [vmem:[%s1652_s26 + $0x8] sm:$0xff] (%p50_p3) }
  0x10   : > { %v192_v2 = vld [vmem:[%s1652_s26 + $0x80] sm:$0xff] (%p50_p3)  ;;  %189 = vst [vmem:[%s1657_s27] sm:$0xff] (%p50_p3), %v188_v0  ;;  %191 = vst [vmem:[%s1657_s27 + $0x8] sm:$0xff] (%p50_p3), %v190_v1  ;;  %v194_v3 = vld [vmem:[%s1652_s26 + $0x88] sm:$0xff] (%p50_p3) }
  0x11   : > { %193 = vst [vmem:[%s1657_s27 + $0x10] sm:$0xff] %v192_v2  ;;  %v196_v4 = vld [vmem:[%s1652_s26 + $0x100] sm:$0xff]  ;;  %v198_v5 = vld [vmem:[%s1652_s26 + $0x108] sm:$0xff]  ;;  %195 = vst [vmem:[%s1657_s27 + $0x18] sm:$0xff] %v194_v3 }
  0x12   : > { %197 = vst [vmem:[%s1657_s27 + $0x20] sm:$0xff] %v196_v4  ;;  %199 = vst [vmem:[%s1657_s27 + $0x28] sm:$0xff] %v198_v5  ;;  %v200_v6 = vld [vmem:[%s1652_s26 + $0x180] sm:$0xff]  ;;  %v202_v7 = vld [vmem:[%s1652_s26 + $0x188] sm:$0xff] }
  0x13   : > { %v204_v8 = vld [vmem:[%s1652_s26 + $0x200] sm:$0xff]  ;;  %201 = vst [vmem:[%s1657_s27 + $0x30] sm:$0xff] %v200_v6  ;;  %203 = vst [vmem:[%s1657_s27 + $0x38] sm:$0xff] %v202_v7  ;;  %v206_v9 = vld [vmem:[%s1652_s26 + $0x208] sm:$0xff] }
  0x14   : > { %205 = vst [vmem:[%s1657_s27 + $0x40] sm:$0xff] %v204_v8  ;;  %v208_v10 = vld [vmem:[%s1652_s26 + $0x280] sm:$0xff]  ;;  %v210_v11 = vld [vmem:[%s1652_s26 + $0x288] sm:$0xff]  ;;  %207 = vst [vmem:[%s1657_s27 + $0x48] sm:$0xff] %v206_v9 }
  0x15   : > { %209 = vst [vmem:[%s1657_s27 + $0x50] sm:$0xff] %v208_v10  ;;  %211 = vst [vmem:[%s1657_s27 + $0x58] sm:$0xff] %v210_v11  ;;  %v212_v12 = vld [vmem:[%s1652_s26 + $0x300] sm:$0xff]  ;;  %v214_v13 = vld [vmem:[%s1652_s26 + $0x308] sm:$0xff] }
  0x16   : > { %v216_v14 = vld [vmem:[%s1652_s26 + $0x380] sm:$0xff]  ;;  %213 = vst [vmem:[%s1657_s27 + $0x60] sm:$0xff] %v212_v12  ;;  %215 = vst [vmem:[%s1657_s27 + $0x68] sm:$0xff] %v214_v13  ;;  %v218_v15 = vld [vmem:[%s1652_s26 + $0x388] sm:$0xff] }
  0x17   : > { %217 = vst [vmem:[%s1657_s27 + $0x70] sm:$0xff] %v216_v14  ;;  %v220_v16 = vld [vmem:[%s1652_s26 + $0x400] sm:$0xff]  ;;  %v222_v17 = vld [vmem:[%s1652_s26 + $0x408] sm:$0xff]  ;;  %219 = vst [vmem:[%s1657_s27 + $0x78] sm:$0xff] %v218_v15 }
  0x18   : > { %221 = vst [vmem:[%s1657_s27 + $0x80] sm:$0xff] %v220_v16  ;;  %223 = vst [vmem:[%s1657_s27 + $0x88] sm:$0xff] %v222_v17  ;;  %v224_v18 = vld [vmem:[%s1652_s26 + $0x480] sm:$0xff]  ;;  %v226_v19 = vld [vmem:[%s1652_s26 + $0x488] sm:$0xff] }
  0x19   : > { %v228_v20 = vld [vmem:[%s1652_s26 + $0x500] sm:$0xff]  ;;  %225 = vst [vmem:[%s1657_s27 + $0x90] sm:$0xff] %v224_v18  ;;  %227 = vst [vmem:[%s1657_s27 + $0x98] sm:$0xff] %v226_v19  ;;  %v230_v21 = vld [vmem:[%s1652_s26 + $0x508] sm:$0xff] }
  0x1a   : > { %229 = vst [vmem:[%s1657_s27 + $0xa0] sm:$0xff] %v228_v20  ;;  %v232_v22 = vld [vmem:[%s1652_s26 + $0x580] sm:$0xff]  ;;  %v234_v23 = vld [vmem:[%s1652_s26 + $0x588] sm:$0xff]  ;;  %231 = vst [vmem:[%s1657_s27 + $0xa8] sm:$0xff] %v230_v21 }
  0x1b   : > { %233 = vst [vmem:[%s1657_s27 + $0xb0] sm:$0xff] %v232_v22  ;;  %235 = vst [vmem:[%s1657_s27 + $0xb8] sm:$0xff] %v234_v23  ;;  %v236_v24 = vld [vmem:[%s1652_s26 + $0x600] sm:$0xff]  ;;  %v238_v25 = vld [vmem:[%s1652_s26 + $0x608] sm:$0xff] }
  0x1c   : > { %v240_v26 = vld [vmem:[%s1652_s26 + $0x680] sm:$0xff]  ;;  %237 = vst [vmem:[%s1657_s27 + $0xc0] sm:$0xff] %v236_v24  ;;  %239 = vst [vmem:[%s1657_s27 + $0xc8] sm:$0xff] %v238_v25  ;;  %v242_v27 = vld [vmem:[%s1652_s26 + $0x688] sm:$0xff] }
  0x1d   : > { %241 = vst [vmem:[%s1657_s27 + $0xd0] sm:$0xff] %v240_v26  ;;  %v244_v28 = vld [vmem:[%s1652_s26 + $0x700] sm:$0xff]  ;;  %v246_v29 = vld [vmem:[%s1652_s26 + $0x708] sm:$0xff]  ;;  %243 = vst [vmem:[%s1657_s27 + $0xd8] sm:$0xff] %v242_v27 }
  0x1e   : > { %245 = vst [vmem:[%s1657_s27 + $0xe0] sm:$0xff] %v244_v28  ;;  %247 = vst [vmem:[%s1657_s27 + $0xe8] sm:$0xff] %v246_v29  ;;  %v248_v30 = vld [vmem:[%s1652_s26 + $0x780] sm:$0xff]  ;;  %v250_v31 = vld [vmem:[%s1652_s26 + $0x788] sm:$0xff] }
  0x1f   : > { %249 = vst [vmem:[%s1657_s27 + $0xf0] sm:$0xff] %v248_v30  ;;  %251 = vst [vmem:[%s1657_s27 + $0xf8] sm:$0xff] %v250_v31 }
  0x20 PF: > { %p1223_p6 = scmp.ge.s32.totalorder %s1586_s16, 1  ;;  %p268_p7 = scmp.lt.s32.totalorder %s1586_s16, 9 }
  0x22   : > { %p269_p8 = pnand %p1223_p6, %p268_p7 }
  0x23   : > { %s275_s28 = sand.u32 (!%p269_p8), 1, %s1570_s12   ;;  %s1225_s29 = sshll.u32 (!%p269_p8), %s1578_s14, 6 }
  0x24   : > { %272 = sbr.rel (%p269_p8) target bundleno = 363 (0x16b), region = 51  ;;  %s1224_s30 = sshll.u32 (!%p269_p8), %s275_s28, 8 }
  0x25   : > { %p315_p9 = scmp.lt.s32.totalorder (!%p269_p8), %s1225_s29, 511  ;;  %s1729_s8 = scalar_lea.vmem (!%p269_p8), [#allocation3], %s1224_s30 }
  0x26   : > { %p1227_p10 = scmp.ne.s32.totalorder (!%p269_p8), %s1578_s14, 0 }
  0x29   : > { %s1874_s29 = smov (!%p315_p9, %s1225_s29), 511  ;;  %339 = sbr.rel (%p1227_p10) target bundleno = 55 (0x37), region = 59 }
  0x2a   : > { %s1226_s4 = sshll.u32 %s1874_s29, 2 }
  0x2b   : > { %s1727_s7 = scalar_lea.vmem %s1864_s1, %s1226_s4 }
  0x2e   : > { %v1588_v32 = vmov 0.0  }
  0x2f   : > { %340 = vst [vmem:[#allocation2 + $0x30] sm:$0xff] %v1588_v32  ;;  %341 = vst [vmem:[#allocation2] sm:$0xff] %v1588_v32 }
  0x30   : > { %342 = vst [vmem:[#allocation2 + $0x58] sm:$0xff] %v1588_v32  ;;  %343 = vst [vmem:[#allocation2 + $0x18] sm:$0xff] %v1588_v32 }
  0x31   : > { %344 = vst [vmem:[#allocation2 + $0x50] sm:$0xff] %v1588_v32  ;;  %345 = vst [vmem:[#allocation2 + $0x68] sm:$0xff] %v1588_v32 }
  0x32   : > { %346 = vst [vmem:[#allocation2 + $0x8] sm:$0xff] %v1588_v32  ;;  %347 = vst [vmem:[#allocation2 + $0x48] sm:$0xff] %v1588_v32 }
  0x33   : > { %348 = vst [vmem:[#allocation2 + $0x40] sm:$0xff] %v1588_v32  ;;  %349 = vst [vmem:[#allocation2 + $0x20] sm:$0xff] %v1588_v32 }
  0x34   : > { %350 = vst [vmem:[#allocation2 + $0x10] sm:$0xff] %v1588_v32  ;;  %351 = vst [vmem:[#allocation2 + $0x38] sm:$0xff] %v1588_v32 }
  0x35   : > { %352 = vst [vmem:[#allocation2 + $0x60] sm:$0xff] %v1588_v32  ;;  %353 = vst [vmem:[#allocation2 + $0x70] sm:$0xff] %v1588_v32 }
  0x36   : > { %354 = vst [vmem:[#allocation2 + $0x78] sm:$0xff] %v1588_v32  ;;  %355 = vst [vmem:[#allocation2 + $0x28] sm:$0xff] %v1588_v32 }
  0x37 PF: > { %v1468_v33 = vld [vmem:[%s1727_s7 + $0x78] sm:$0xff]   ;;  %v1472_v37 = vld [vmem:[%s1727_s7 + $0x70] sm:$0xff]   ;;  %v1476_v41 = vld [vmem:[%s1727_s7 + $0x68] sm:$0xff]   ;;  %p1292_p11 = scmp.ne.s32.totalorder %s1578_s14, 7 }
  0x38   : > { %v1469_v34 = vld [vmem:[%s1727_s7 + $0xf8] sm:$0xff]   ;;  %1299 = vmatprep.subr.bf16.mxu0 %v1468_v33  ;;  %v1473_v38 = vld [vmem:[%s1727_s7 + $0xf0] sm:$0xff]   ;;  %v1477_v42 = vld [vmem:[%s1727_s7 + $0xe8] sm:$0xff]  }
  0x39   : > { %v1470_v35 = vld [vmem:[%s1727_s7 + $0x38] sm:$0xff]   ;;  %1363 = vmatprep.subr.bf16.mxu1 %v1469_v34  ;;  %v1474_v39 = vld [vmem:[%s1727_s7 + $0x30] sm:$0xff]   ;;  %v1478_v43 = vld [vmem:[%s1727_s7 + $0x28] sm:$0xff]  }
  0x3a   : > { %v1471_v36 = vld [vmem:[%s1727_s7 + $0xb8] sm:$0xff]   ;;  %1300 = vmatpush3.bf16.msra.mxu0 %v1470_v35  ;;  %v1475_v40 = vld [vmem:[%s1727_s7 + $0xb0] sm:$0xff]   ;;  %v1479_v44 = vld [vmem:[%s1727_s7 + $0xa8] sm:$0xff]  }
  0x3b   : > { %1364 = vmatpush3.bf16.msra.mxu1 %v1471_v36  ;;  %1301 = vmatprep.subr.bf16.mxu0 %v1472_v37  ;;  %v1480_v45 = vld [vmem:[%s1727_s7 + $0x60] sm:$0xff]   ;;  %v1484_v49 = vld [vmem:[%s1727_s7 + $0x58] sm:$0xff]   ;;  %v1488_v53 = vld [vmem:[%s1727_s7 + $0x50] sm:$0xff]  }
  0x3c   : > { %1365 = vmatprep.subr.bf16.mxu1 %v1473_v38  ;;  %v1481_v46 = vld [vmem:[%s1727_s7 + $0xe0] sm:$0xff]   ;;  %v1485_v50 = vld [vmem:[%s1727_s7 + $0xd8] sm:$0xff]   ;;  %v1489_v54 = vld [vmem:[%s1727_s7 + $0xd0] sm:$0xff]  }
  0x3d   : > { %v1482_v47 = vld [vmem:[%s1727_s7 + $0x20] sm:$0xff]   ;;  %v1486_v51 = vld [vmem:[%s1727_s7 + $0x18] sm:$0xff]   ;;  %v1490_v55 = vld [vmem:[%s1727_s7 + $0x10] sm:$0xff]  }
  0x3e   : > { %1302 = vmatpush3.bf16.msra.mxu0 %v1474_v39  ;;  %v1483_v48 = vld [vmem:[%s1727_s7 + $0xa0] sm:$0xff]   ;;  %v1487_v52 = vld [vmem:[%s1727_s7 + $0x98] sm:$0xff]   ;;  %v1491_v56 = vld [vmem:[%s1727_s7 + $0x90] sm:$0xff]  }
  0x3f   : > { %1366 = vmatpush3.bf16.msra.mxu1 %v1475_v40  ;;  %1303 = vmatprep.subr.bf16.mxu0 %v1476_v41  ;;  %v1492_v57 = vld [vmem:[%s1727_s7 + $0x48] sm:$0xff]   ;;  %v1496_v61 = vld [vmem:[%s1727_s7 + $0x40] sm:$0xff]   ;;  %v356_v40 = vld [vmem:[#allocation2 + $0x30] sm:$0xff] }
  0x40   : > { %1367 = vmatprep.subr.bf16.mxu1 %v1477_v42  ;;  %v1493_v58 = vld [vmem:[%s1727_s7 + $0xc8] sm:$0xff]   ;;  %v1497_v62 = vld [vmem:[%s1727_s7 + $0xc0] sm:$0xff]  }
  0x41   : > { %v1494_v59 = vld [vmem:[%s1727_s7 + $0x8] sm:$0xff]   ;;  %v1498_v63 = vld [vmem:[%s1727_s7] sm:$0xff]  }
  0x42   : > { %1304 = vmatpush3.bf16.msra.mxu0 %v1478_v43  ;;  %v1495_v60 = vld [vmem:[%s1727_s7 + $0x88] sm:$0xff]   ;;  %v1499_v0 = vld [vmem:[%s1727_s7 + $0x80] sm:$0xff]  }
  0x43   : > { %1368 = vmatpush3.bf16.msra.mxu1 %v1479_v44  ;;  %1305 = vmatprep.subr.bf16.mxu0 %v1480_v45  ;;  %v1500_v1 = vld [vmem:[%s1729_s8] ss:$16 sps:$4 sm:$0xff]   ;;  %v1502_v2 = vld [vmem:[%s1729_s8 + $0x4] ss:$16 sps:$4 sm:$0xff]   ;;  %v1503_v3 = vld [vmem:[%s1729_s8 + $0x8] ss:$16 sps:$4 sm:$0xff]  }
  0x44   : > { %1369 = vmatprep.subr.bf16.mxu1 %v1481_v46  ;;  %v1505_v4 = vld [vmem:[%s1729_s8 + $0xc] ss:$16 sps:$4 sm:$0xff]   ;;  %852 = vmatprep.mubr.bf16.mxu0 %v1502_v2  ;;  %v1506_v5 = vld [vmem:[%s1729_s8 + $0x24] ss:$16 sps:$4 sm:$0xff]   ;;  %v1510_v7 = vld [vmem:[%s1729_s8 + $0x20] ss:$16 sps:$4 sm:$0xff]  }
  0x45   : > { %949 = vmatprep.mubr.bf16.mxu1 %v1505_v4  ;;  %v1508_v6 = vld [vmem:[%s1729_s8 + $0x2c] ss:$16 sps:$4 sm:$0xff]   ;;  %v1511_v8 = vld [vmem:[%s1729_s8 + $0x28] ss:$16 sps:$4 sm:$0xff]   ;;  %v1512_v9 = vld [vmem:[%s1729_s8 + $0x44] ss:$16 sps:$4 sm:$0xff]  }
  0x46   : > { %1306 = vmatpush3.bf16.msra.mxu0 %v1482_v47  ;;  %v1514_v10 = vld [vmem:[%s1729_s8 + $0x4c] ss:$16 sps:$4 sm:$0xff]   ;;  %v1516_v11 = vld [vmem:[%s1729_s8 + $0x40] ss:$16 sps:$4 sm:$0xff]   ;;  %v1517_v12 = vld [vmem:[%s1729_s8 + $0x48] ss:$16 sps:$4 sm:$0xff]  }
  0x47   : > { %1370 = vmatpush3.bf16.msra.mxu1 %v1483_v48  ;;  %1307 = vmatprep.subr.bf16.mxu0 %v1484_v49  ;;  %v1518_v13 = vld [vmem:[%s1729_s8 + $0x64] ss:$16 sps:$4 sm:$0xff]   ;;  %v1520_v14 = vld [vmem:[%s1729_s8 + $0x6c] ss:$16 sps:$4 sm:$0xff]   ;;  %v1522_v15 = vld [vmem:[%s1729_s8 + $0x60] ss:$16 sps:$4 sm:$0xff]  }
  0x48   : > { %1371 = vmatprep.subr.bf16.mxu1 %v1485_v50  ;;  %v1523_v16 = vld [vmem:[%s1729_s8 + $0x68] ss:$16 sps:$4 sm:$0xff]   ;;  %v1524_v17 = vld [vmem:[%s1729_s8 + $0x84] ss:$16 sps:$4 sm:$0xff]   ;;  %v1526_v18 = vld [vmem:[%s1729_s8 + $0x8c] ss:$16 sps:$4 sm:$0xff]  }
  0x49   : > { %v1528_v19 = vld [vmem:[%s1729_s8 + $0x80] ss:$16 sps:$4 sm:$0xff]   ;;  %v1529_v20 = vld [vmem:[%s1729_s8 + $0x88] ss:$16 sps:$4 sm:$0xff]   ;;  %v1530_v21 = vld [vmem:[%s1729_s8 + $0xa4] ss:$16 sps:$4 sm:$0xff]  }
  0x4a   : > { %1308 = vmatpush3.bf16.msra.mxu0 %v1486_v51  ;;  %v1532_v22 = vld [vmem:[%s1729_s8 + $0xac] ss:$16 sps:$4 sm:$0xff]   ;;  %v1534_v23 = vld [vmem:[%s1729_s8 + $0xa0] ss:$16 sps:$4 sm:$0xff]   ;;  %v1535_v24 = vld [vmem:[%s1729_s8 + $0xa8] ss:$16 sps:$4 sm:$0xff]  }
  0x4b   : > { %1372 = vmatpush3.bf16.msra.mxu1 %v1487_v52  ;;  %1309 = vmatprep.subr.bf16.mxu0 %v1488_v53  ;;  %v1536_v25 = vld [vmem:[%s1729_s8 + $0xc4] ss:$16 sps:$4 sm:$0xff]   ;;  %v1538_v26 = vld [vmem:[%s1729_s8 + $0xcc] ss:$16 sps:$4 sm:$0xff]   ;;  %v1540_v27 = vld [vmem:[%s1729_s8 + $0xc0] ss:$16 sps:$4 sm:$0xff]  }
  0x4c   : > { %1373 = vmatprep.subr.bf16.mxu1 %v1489_v54  ;;  %v1541_v28 = vld [vmem:[%s1729_s8 + $0xc8] ss:$16 sps:$4 sm:$0xff]   ;;  %v1542_v29 = vld [vmem:[%s1729_s8 + $0xe4] ss:$16 sps:$4 sm:$0xff]   ;;  %v1544_v30 = vld [vmem:[%s1729_s8 + $0xec] ss:$16 sps:$4 sm:$0xff]  }
  0x4d   : > { %v1546_v31 = vld [vmem:[%s1729_s8 + $0xe0] ss:$16 sps:$4 sm:$0xff]   ;;  %v1547_v32 = vld [vmem:[%s1729_s8 + $0xe8] ss:$16 sps:$4 sm:$0xff]  }
  0x4e   : > { %1310 = vmatpush3.bf16.msra.mxu0 %v1490_v55  ;;  %v357_v49 = vld [vmem:[#allocation2] sm:$0xff] }
  0x4f   : > { %1374 = vmatpush3.bf16.msra.mxu1 %v1491_v56  ;;  %1311 = vmatprep.subr.bf16.mxu0 %v1492_v57 }
  0x50   : > { %1375 = vmatprep.subr.bf16.mxu1 %v1493_v58  ;;  %v358_v58 = vld [vmem:[#allocation2 + $0x58] sm:$0xff] }
  0x52   : > { %1312 = vmatpush3.bf16.msra.mxu0 %v1494_v59 }
  0x53   : > { %1376 = vmatpush3.bf16.msra.mxu1 %v1495_v60  ;;  %1313 = vmatprep.subr.bf16.mxu0 %v1496_v61 }
  0x54   : > { %1377 = vmatprep.subr.bf16.mxu1 %v1497_v62 }
  0x56   : > { %1314 = vmatpush3.bf16.msra.mxu0 %v1498_v63 }
  0x57   : > { %1378 = vmatpush3.bf16.msra.mxu1 %v1499_v0 }
  0x59   : > { %853 = vmatmul.mubr.bf16.vlgmr.msra.gmra.mxu0 %v1500_v1 }
  0x5a   : > { %950 = vmatmul.mubr.bf16.vlgmr.msra.gmra.mxu1 %v1503_v3  ;;  %860 = vmatprep.mubr.bf16.mxu0 %v1506_v5  ;;  %v359_v3 = vld [vmem:[#allocation2 + $0x18] sm:$0xff] }
  0x5b   : > { %957 = vmatprep.mubr.bf16.mxu1 %v1508_v6 }
  0x61   : > { %861 = vmatmul.mubr.bf16.gmra.mxu0 %v1510_v7 }
  0x62   : > { %958 = vmatmul.mubr.bf16.gmra.mxu1 %v1511_v8  ;;  %868 = vmatprep.mubr.bf16.mxu0 %v1512_v9 }
  0x63   : > { %965 = vmatprep.mubr.bf16.mxu1 %v1514_v10 }
  0x69   : > { %869 = vmatmul.mubr.bf16.gmra.mxu0 %v1516_v11 }
  0x6a   : > { %966 = vmatmul.mubr.bf16.gmra.mxu1 %v1517_v12  ;;  %876 = vmatprep.mubr.bf16.mxu0 %v1518_v13  ;;  %v360_v12 = vld [vmem:[#allocation2 + $0x50] sm:$0xff] }
  0x6b   : > { %973 = vmatprep.mubr.bf16.mxu1 %v1520_v14 }
  0x71   : > { %877 = vmatmul.mubr.bf16.gmra.mxu0 %v1522_v15 }
  0x72   : > { %974 = vmatmul.mubr.bf16.gmra.mxu1 %v1523_v16  ;;  %884 = vmatprep.mubr.bf16.mxu0 %v1524_v17 }
  0x73   : > { %981 = vmatprep.mubr.bf16.mxu1 %v1526_v18 }
  0x79   : > { %885 = vmatmul.mubr.bf16.gmra.mxu0 %v1528_v19 }
  0x7a   : > { %982 = vmatmul.mubr.bf16.gmra.mxu1 %v1529_v20  ;;  %892 = vmatprep.mubr.bf16.mxu0 %v1530_v21  ;;  %v361_v21 = vld [vmem:[#allocation2 + $0x68] sm:$0xff] }
  0x7b   : > { %989 = vmatprep.mubr.bf16.mxu1 %v1532_v22 }
  0x81   : > { %893 = vmatmul.mubr.bf16.gmra.mxu0 %v1534_v23 }
  0x82   : > { %990 = vmatmul.mubr.bf16.gmra.mxu1 %v1535_v24  ;;  %900 = vmatprep.mubr.bf16.mxu0 %v1536_v25 }
  0x83   : > { %997 = vmatprep.mubr.bf16.mxu1 %v1538_v26 }
  0x89   : > { %901 = vmatmul.mubr.bf16.gmra.mxu0 %v1540_v27 }
  0x8a   : > { %998 = vmatmul.mubr.bf16.gmra.mxu1 %v1541_v28  ;;  %908 = vmatprep.mubr.bf16.mxu0 %v1542_v29 }
  0x8b   : > { %1005 = vmatprep.mubr.bf16.mxu1 %v1544_v30  ;;  %v362_v30 = vld [vmem:[#allocation2 + $0x8] sm:$0xff] }
  0x91   : > { %909 = vmatmul.mubr.bf16.gmra.mxu0 %v1546_v31 }
  0x92   : > { %1006 = vmatmul.mubr.bf16.gmra.mxu1 %v1547_v32 }
 0x119   : > { %v1315_v33 = vpop.f32.mrf.mxu0 }
 0x11a   : > { %v1379_v34 = vpop.f32.mrf.mxu1 }
 0x11b   : > { %v1316_v35 = vpop.f32.mrf.mxu0 }
 0x11c   : > { %v1317_v36 = vadd.f32 %v1316_v35, %v1315_v33  ;;  %v1380_v37 = vpop.f32.mrf.mxu1 }
 0x11d   : > { %v1381_v38 = vadd.f32 %v1380_v37, %v1379_v34  ;;  %v1318_v39 = vpop.f32.mrf.mxu0 }
 0x11e   : > { %v1382_v41 = vpop.f32.mrf.mxu1 }
 0x11f   : > { %v952_v42 = vadd.f32 %v1381_v38, %v1317_v36  ;;  %v1319_v43 = vpop.f32.mrf.mxu0 }
 0x120   : > { %v1320_v44 = vadd.f32 %v1319_v43, %v1318_v39  ;;  %v1383_v45 = vpop.f32.mrf.mxu1  ;;  %v363_v39 = vld [vmem:[#allocation2 + $0x48] sm:$0xff] }
 0x121   : > { %v1014_v46 = vadd.f32 %v952_v42, %v356_v40  ;;  %v1384_v47 = vadd.f32 %v1383_v45, %v1382_v41  ;;  %v1321_v48 = vpop.f32.mrf.mxu0 }
 0x122   : > { %v1385_v50 = vpop.f32.mrf.mxu1 }
 0x123   : > { %1030 = vst [vmem:[#allocation2 + $0x30] sm:$0xff] %v1014_v46  ;;  %v955_v51 = vadd.f32 %v1384_v47, %v1320_v44  ;;  %v1322_v52 = vpop.f32.mrf.mxu0 }
 0x124   : > { %v1323_v53 = vadd.f32 %v1322_v52, %v1321_v48  ;;  %v1386_v54 = vpop.f32.mrf.mxu1  ;;  %v364_v48 = vld [vmem:[#allocation2 + $0x40] sm:$0xff] }
 0x125   : > { %v1015_v55 = vadd.f32 %v955_v51, %v357_v49  ;;  %v1387_v56 = vadd.f32 %v1386_v54, %v1385_v50  ;;  %v1324_v57 = vpop.f32.mrf.mxu0 }
 0x126   : > { %v1388_v59 = vpop.f32.mrf.mxu1 }
 0x127   : > { %1031 = vst [vmem:[#allocation2] sm:$0xff] %v1015_v55  ;;  %v960_v60 = vadd.f32 %v1387_v56, %v1323_v53  ;;  %v1325_v61 = vpop.f32.mrf.mxu0 }
 0x128   : > { %v1326_v62 = vadd.f32 %v1325_v61, %v1324_v57  ;;  %v1389_v63 = vpop.f32.mrf.mxu1  ;;  %v365_v57 = vld [vmem:[#allocation2 + $0x20] sm:$0xff] }
 0x129   : > { %v1016_v0 = vadd.f32 %v960_v60, %v358_v58  ;;  %v1390_v1 = vadd.f32 %v1389_v63, %v1388_v59  ;;  %v1327_v2 = vpop.f32.mrf.mxu0 }
 0x12a   : > { %v1391_v4 = vpop.f32.mrf.mxu1 }
 0x12b   : > { %1032 = vst [vmem:[#allocation2 + $0x58] sm:$0xff] %v1016_v0  ;;  %v963_v5 = vadd.f32 %v1390_v1, %v1326_v62  ;;  %v1328_v6 = vpop.f32.mrf.mxu0 }
 0x12c   : > { %v1329_v7 = vadd.f32 %v1328_v6, %v1327_v2  ;;  %v1392_v8 = vpop.f32.mrf.mxu1  ;;  %v366_v2 = vld [vmem:[#allocation2 + $0x10] sm:$0xff] }
 0x12d   : > { %v1017_v9 = vadd.f32 %v963_v5, %v359_v3  ;;  %v1393_v10 = vadd.f32 %v1392_v8, %v1391_v4  ;;  %v1330_v11 = vpop.f32.mrf.mxu0 }
 0x12e   : > { %v1394_v13 = vpop.f32.mrf.mxu1 }
 0x12f   : > { %1033 = vst [vmem:[#allocation2 + $0x18] sm:$0xff] %v1017_v9  ;;  %v968_v14 = vadd.f32 %v1393_v10, %v1329_v7  ;;  %v1331_v15 = vpop.f32.mrf.mxu0 }
 0x130   : > { %v1332_v16 = vadd.f32 %v1331_v15, %v1330_v11  ;;  %v1395_v17 = vpop.f32.mrf.mxu1  ;;  %v367_v11 = vld [vmem:[#allocation2 + $0x38] sm:$0xff] }
 0x131   : > { %v1018_v18 = vadd.f32 %v968_v14, %v360_v12  ;;  %v1396_v19 = vadd.f32 %v1395_v17, %v1394_v13  ;;  %v1333_v20 = vpop.f32.mrf.mxu0 }
 0x132   : > { %v1397_v22 = vpop.f32.mrf.mxu1 }
 0x133   : > { %1034 = vst [vmem:[#allocation2 + $0x50] sm:$0xff] %v1018_v18  ;;  %v971_v23 = vadd.f32 %v1396_v19, %v1332_v16  ;;  %v1334_v24 = vpop.f32.mrf.mxu0 }
 0x134   : > { %v1335_v25 = vadd.f32 %v1334_v24, %v1333_v20  ;;  %v1398_v26 = vpop.f32.mrf.mxu1  ;;  %v368_v20 = vld [vmem:[#allocation2 + $0x60] sm:$0xff] }
 0x135   : > { %v1019_v27 = vadd.f32 %v971_v23, %v361_v21  ;;  %v1399_v28 = vadd.f32 %v1398_v26, %v1397_v22  ;;  %v1336_v29 = vpop.f32.mrf.mxu0 }
 0x136   : > { %v1400_v31 = vpop.f32.mrf.mxu1 }
 0x137   : > { %1035 = vst [vmem:[#allocation2 + $0x68] sm:$0xff] %v1019_v27  ;;  %v976_v32 = vadd.f32 %v1399_v28, %v1335_v25  ;;  %v1337_v33 = vpop.f32.mrf.mxu0 }
 0x138   : > { %v1338_v34 = vadd.f32 %v1337_v33, %v1336_v29  ;;  %v1401_v35 = vpop.f32.mrf.mxu1  ;;  %v369_v29 = vld [vmem:[#allocation2 + $0x70] sm:$0xff] }
 0x139   : > { %v1020_v36 = vadd.f32 %v976_v32, %v362_v30  ;;  %v1402_v37 = vadd.f32 %v1401_v35, %v1400_v31  ;;  %v1339_v38 = vpop.f32.mrf.mxu0 }
 0x13a   : > { %v1403_v40 = vpop.f32.mrf.mxu1 }
 0x13b   : > { %1036 = vst [vmem:[#allocation2 + $0x8] sm:$0xff] %v1020_v36  ;;  %v979_v41 = vadd.f32 %v1402_v37, %v1338_v34  ;;  %v1340_v42 = vpop.f32.mrf.mxu0 }
 0x13c   : > { %v1341_v43 = vadd.f32 %v1340_v42, %v1339_v38  ;;  %v1404_v44 = vpop.f32.mrf.mxu1  ;;  %v370_v38 = vld [vmem:[#allocation2 + $0x78] sm:$0xff] }
 0x13d   : > { %v1021_v45 = vadd.f32 %v979_v41, %v363_v39  ;;  %v1405_v46 = vadd.f32 %v1404_v44, %v1403_v40  ;;  %v1342_v47 = vpop.f32.mrf.mxu0 }
 0x13e   : > { %v1406_v49 = vpop.f32.mrf.mxu1 }
 0x13f   : > { %1037 = vst [vmem:[#allocation2 + $0x48] sm:$0xff] %v1021_v45  ;;  %v984_v50 = vadd.f32 %v1405_v46, %v1341_v43  ;;  %v1343_v51 = vpop.f32.mrf.mxu0  ;;  %v371_v46 = vld [vmem:[#allocation2 + $0x28] sm:$0xff] }
 0x140   : > { %v1344_v52 = vadd.f32 %v1343_v51, %v1342_v47  ;;  %v1407_v53 = vpop.f32.mrf.mxu1 }
 0x141   : > { %v1022_v54 = vadd.f32 %v984_v50, %v364_v48  ;;  %v1408_v55 = vadd.f32 %v1407_v53, %v1406_v49  ;;  %v1345_v56 = vpop.f32.mrf.mxu0 }
 0x142   : > { %v1409_v58 = vpop.f32.mrf.mxu1 }
 0x143   : > { %1038 = vst [vmem:[#allocation2 + $0x40] sm:$0xff] %v1022_v54  ;;  %v987_v59 = vadd.f32 %v1408_v55, %v1344_v52  ;;  %v1346_v60 = vpop.f32.mrf.mxu0 }
 0x144   : > { %v1347_v61 = vadd.f32 %v1346_v60, %v1345_v56  ;;  %v1410_v62 = vpop.f32.mrf.mxu1 }
 0x145   : > { %v1023_v63 = vadd.f32 %v987_v59, %v365_v57  ;;  %v1411_v0 = vadd.f32 %v1410_v62, %v1409_v58  ;;  %v1348_v1 = vpop.f32.mrf.mxu0 }
 0x146   : > { %v1412_v3 = vpop.f32.mrf.mxu1 }
 0x147   : > { %1039 = vst [vmem:[#allocation2 + $0x20] sm:$0xff] %v1023_v63  ;;  %v992_v4 = vadd.f32 %v1411_v0, %v1347_v61  ;;  %v1349_v5 = vpop.f32.mrf.mxu0 }
 0x148   : > { %v1350_v6 = vadd.f32 %v1349_v5, %v1348_v1  ;;  %v1413_v7 = vpop.f32.mrf.mxu1 }
 0x149   : > { %v1024_v8 = vadd.f32 %v992_v4, %v366_v2  ;;  %v1414_v9 = vadd.f32 %v1413_v7, %v1412_v3  ;;  %v1351_v10 = vpop.f32.mrf.mxu0 }
 0x14a   : > { %v1415_v12 = vpop.f32.mrf.mxu1 }
 0x14b   : > { %1040 = vst [vmem:[#allocation2 + $0x10] sm:$0xff] %v1024_v8  ;;  %v995_v13 = vadd.f32 %v1414_v9, %v1350_v6  ;;  %v1352_v14 = vpop.f32.mrf.mxu0 }
 0x14c   : > { %v1353_v15 = vadd.f32 %v1352_v14, %v1351_v10  ;;  %v1416_v16 = vpop.f32.mrf.mxu1 }
 0x14d   : > { %v1025_v17 = vadd.f32 %v995_v13, %v367_v11  ;;  %v1417_v18 = vadd.f32 %v1416_v16, %v1415_v12  ;;  %v1354_v19 = vpop.f32.mrf.mxu0 }
 0x14e   : > { %v1418_v21 = vpop.f32.mrf.mxu1 }
 0x14f   : > { %1041 = vst [vmem:[#allocation2 + $0x38] sm:$0xff] %v1025_v17  ;;  %v1000_v22 = vadd.f32 %v1417_v18, %v1353_v15  ;;  %v1355_v23 = vpop.f32.mrf.mxu0 }
 0x150   : > { %v1356_v24 = vadd.f32 %v1355_v23, %v1354_v19  ;;  %v1419_v25 = vpop.f32.mrf.mxu1 }
 0x151   : > { %v1026_v26 = vadd.f32 %v1000_v22, %v368_v20  ;;  %v1420_v27 = vadd.f32 %v1419_v25, %v1418_v21  ;;  %v1357_v28 = vpop.f32.mrf.mxu0 }
 0x152   : > { %v1421_v30 = vpop.f32.mrf.mxu1 }
 0x153   : > { %1042 = vst [vmem:[#allocation2 + $0x60] sm:$0xff] %v1026_v26  ;;  %v1003_v31 = vadd.f32 %v1420_v27, %v1356_v24  ;;  %v1358_v32 = vpop.f32.mrf.mxu0 }
 0x154   : > { %v1359_v33 = vadd.f32 %v1358_v32, %v1357_v28  ;;  %v1422_v34 = vpop.f32.mrf.mxu1 }
 0x155   : > { %v1027_v35 = vadd.f32 %v1003_v31, %v369_v29  ;;  %v1423_v36 = vadd.f32 %v1422_v34, %v1421_v30  ;;  %v1360_v37 = vpop.f32.mrf.mxu0 }
 0x156   : > { %v1424_v39 = vpop.f32.mrf.mxu1 }
 0x157   : > { %1043 = vst [vmem:[#allocation2 + $0x70] sm:$0xff] %v1027_v35  ;;  %v1008_v40 = vadd.f32 %v1423_v36, %v1359_v33  ;;  %v1361_v41 = vpop.f32.mrf.mxu0 }
 0x158   : > { %v1362_v42 = vadd.f32 %v1361_v41, %v1360_v37  ;;  %v1425_v43 = vpop.f32.mrf.mxu1 }
 0x159   : > { %v1028_v44 = vadd.f32 %v1008_v40, %v370_v38  ;;  %v1426_v45 = vadd.f32 %v1425_v43, %v1424_v39 }
 0x15b   : > { %1044 = vst [vmem:[#allocation2 + $0x78] sm:$0xff] %v1028_v44  ;;  %v1011_v47 = vadd.f32 %v1426_v45, %v1362_v42  ;;  %1049 = sbr.rel (%p1292_p11) target bundleno = 363 (0x16b), region = 63 }
 0x15d   : > { %v1029_v48 = vadd.f32 %v1011_v47, %v371_v46 }
 0x15f   : > { %1045 = vst [vmem:[#allocation2 + $0x28] sm:$0xff] %v1029_v48 }
 0x160   : > { %v1050_v49 = vld [vmem:[#allocation2 + $0x30] sm:$0xff]  ;;  %v1293_v50 = vld [vmem:[%s1865_s2] ss:$0 sm:$0xff]  ;;  %v1052_v54 = vld [vmem:[#allocation2 + $0x58] sm:$0xff] }
 0x161   : > { %v1051_v51 = vld [vmem:[#allocation2] sm:$0xff]  ;;  %v1073_v52 = vadd.f32 %v1293_v50, %v1050_v49  ;;  %v1053_v55 = vld [vmem:[#allocation2 + $0x18] sm:$0xff]  ;;  %v1054_v56 = vld [vmem:[#allocation2 + $0x50] sm:$0xff]  ;;  %v1075_v57 = vadd.f32 %v1293_v50, %v1052_v54 }
 0x162   : > { %v1074_v53 = vadd.f32 %v1293_v50, %v1051_v51  ;;  %v1076_v58 = vadd.f32 %v1293_v50, %v1053_v55  ;;  %v1077_v59 = vadd.f32 %v1293_v50, %v1054_v56  ;;  %v1055_v60 = vld [vmem:[#allocation2 + $0x68] sm:$0xff]  ;;  %v1058_v2 = vld [vmem:[#allocation2 + $0x40] sm:$0xff]  ;;  %v1060_v4 = vld [vmem:[#allocation2 + $0x10] sm:$0xff] }
 0x163   : > { %v1056_v61 = vld [vmem:[#allocation2 + $0x8] sm:$0xff]  ;;  %1089 = vst [vmem:[%s1866_s3] sm:$0xff] %v1073_v52  ;;  %v1078_v63 = vadd.f32 %v1293_v50, %v1055_v60  ;;  %v1059_v3 = vld [vmem:[#allocation2 + $0x20] sm:$0xff]  ;;  %1091 = vst [vmem:[%s1866_s3 + $0x10] sm:$0xff] %v1075_v57  ;;  %v1081_v5 = vadd.f32 %v1293_v50, %v1058_v2  ;;  %v1083_v7 = vadd.f32 %v1293_v50, %v1060_v4 }
 0x164   : > { %v1057_v62 = vld [vmem:[#allocation2 + $0x48] sm:$0xff]  ;;  %1090 = vst [vmem:[%s1866_s3 + $0x8] sm:$0xff] %v1074_v53  ;;  %v1079_v0 = vadd.f32 %v1293_v50, %v1056_v61  ;;  %1092 = vst [vmem:[%s1866_s3 + $0x18] sm:$0xff] %v1076_v58  ;;  %v1082_v6 = vadd.f32 %v1293_v50, %v1059_v3  ;;  %v1061_v8 = vld [vmem:[#allocation2 + $0x38] sm:$0xff] }
 0x165   : > { %v1080_v1 = vadd.f32 %v1293_v50, %v1057_v62  ;;  %1093 = vst [vmem:[%s1866_s3 + $0x20] sm:$0xff] %v1077_v59  ;;  %v1062_v9 = vld [vmem:[#allocation2 + $0x60] sm:$0xff]  ;;  %v1063_v10 = vld [vmem:[#allocation2 + $0x70] sm:$0xff]  ;;  %1094 = vst [vmem:[%s1866_s3 + $0x28] sm:$0xff] %v1078_v63  ;;  %v1084_v11 = vadd.f32 %v1293_v50, %v1061_v8 }
 0x166   : > { %1095 = vst [vmem:[%s1866_s3 + $0x30] sm:$0xff] %v1079_v0  ;;  %v1085_v12 = vadd.f32 %v1293_v50, %v1062_v9  ;;  %v1086_v13 = vadd.f32 %v1293_v50, %v1063_v10  ;;  %v1064_v14 = vld [vmem:[#allocation2 + $0x78] sm:$0xff]  ;;  %v1065_v15 = vld [vmem:[#allocation2 + $0x28] sm:$0xff]  ;;  %1097 = vst [vmem:[%s1866_s3 + $0x40] sm:$0xff] %v1081_v5 }
 0x167   : > { %1096 = vst [vmem:[%s1866_s3 + $0x38] sm:$0xff] %v1080_v1  ;;  %1098 = vst [vmem:[%s1866_s3 + $0x48] sm:$0xff] %v1082_v6  ;;  %v1087_v16 = vadd.f32 %v1293_v50, %v1064_v14  ;;  %v1088_v17 = vadd.f32 %v1293_v50, %v1065_v15 }
 0x168   : > { %1099 = vst [vmem:[%s1866_s3 + $0x50] sm:$0xff] %v1083_v7  ;;  %1100 = vst [vmem:[%s1866_s3 + $0x58] sm:$0xff] %v1084_v11 }
 0x169   : > { %1101 = vst [vmem:[%s1866_s3 + $0x60] sm:$0xff] %v1085_v12  ;;  %1102 = vst [vmem:[%s1866_s3 + $0x68] sm:$0xff] %v1086_v13 }
 0x16a   : > { %1103 = vst [vmem:[%s1866_s3 + $0x70] sm:$0xff] %v1087_v16  ;;  %1104 = vst [vmem:[%s1866_s3 + $0x78] sm:$0xff] %v1088_v17 }
 0x16b PF: > { %s13_s16 = sadd.s32 1, %s1586_s16   ;;  %s1867_s12 = smov %s1574_s13 }
 0x16c   : > { %p10_p12 = scmp.ge.s32.totalorder %s13_s16, 10   ;;  %s1868_s13 = smov %s1644_s20 }
 0x16d   : > { %s1869_s14 = smov %s1582_s15  ;;  %s1870_s15 = smov %s1872_s17 }
 0x16e   :  { %12 = sbr.rel (!%p10_p12) target bundleno = 3 (0x3), region = 104 }

</bundles_post_ra>
